<compile_context>
chip_gen: v6e
topology: v6e:2x2x1
jax: 0.10.0
libtpu: 0.0.40
codegen_flags: <defaults>
</compile_context>

<pallas_src>
import functools

import jax
import jax.numpy as jnp
import numpy as np
from jax.experimental import pallas as pl
from jax.experimental.pallas import tpu as pltpu

NUM_HIDDENS = 32
NUM_RESIDUAL_LAYERS = 2
NUM_RESIDUAL_HIDDENS = 8
NUM_EMBEDDINGS = 16
EMBEDDING_DIM = 8
COMMITMENT_COST = 0.25
IMAGE_CHANNELS = 3

COARSE = 4                       # total encoder stride (2*2): whole net runs on the H/4 x W/4 grid
_HIGHEST = jax.lax.Precision.HIGHEST


# ----------------------------------------------------------------------------
# raw parameters (PyTorch layouts)
# ----------------------------------------------------------------------------
def init_params(key):
    keys = iter(jax.random.split(key, 32))

    def w(shape, scale=0.05):
        return scale * jax.random.normal(next(keys), shape, jnp.float32)

    nh, nrh, ed, ic = NUM_HIDDENS, NUM_RESIDUAL_HIDDENS, EMBEDDING_DIM, IMAGE_CHANNELS
    p = {}
    # Encoder: conv4x4/s2 -> conv4x4/s2 -> conv3x3/s1 -> residual stack
    p["enc_w1"] = w((nh // 2, ic, 4, 4)); p["enc_b1"] = w((nh // 2,))
    p["enc_w2"] = w((nh, nh // 2, 4, 4)); p["enc_b2"] = w((nh,))
    p["enc_w3"] = w((nh, nh, 3, 3));      p["enc_b3"] = w((nh,))
    p["enc_res"] = [(w((nrh, nh, 3, 3)), w((nh, nrh, 1, 1)))      # bias=False
                    for _ in range(NUM_RESIDUAL_LAYERS)]
    p["pre_vq_w"] = w((ed, nh, 1, 1)); p["pre_vq_b"] = w((ed,))
    p["embedding"] = w((NUM_EMBEDDINGS, ed), scale=1.0)
    # Decoder: conv3x3 -> residual stack -> convT4x4/s2 -> convT4x4/s2
    p["dec_w1"] = w((nh, ed, 3, 3)); p["dec_b1"] = w((nh,))
    p["dec_res"] = [(w((nrh, nh, 3, 3)), w((nh, nrh, 1, 1)))
                    for _ in range(NUM_RESIDUAL_LAYERS)]
    p["dec_tw1"] = w((nh, nh // 2, 4, 4)); p["dec_tb1"] = w((nh // 2,))
    p["dec_tw2"] = w((nh // 2, ic, 4, 4)); p["dec_tb2"] = w((ic,))
    return p


# ----------------------------------------------------------------------------
# reference fine-level ops (PyTorch semantics) -- used for the one-time weight
# remap (probing) and for numerical validation in __main__
# ----------------------------------------------------------------------------
def _conv2d_nchw(x, w, b, stride, pad):
    """nn.Conv2d semantics: cross-correlation, OIHW weights."""
    y = jax.lax.conv_general_dilated(
        x, w, (stride, stride), [(pad, pad), (pad, pad)],
        dimension_numbers=("NCHW", "OIHW", "NCHW"), precision=_HIGHEST)
    return y if b is None else y + b.reshape(1, -1, 1, 1)


def _convt2d_nchw(x, w, b, stride, pad):
    """nn.ConvTranspose2d semantics: IOHW weights, spatially flipped dilated conv."""
    k = w.shape[-1]
    w_f = jnp.transpose(jnp.flip(w, (-2, -1)), (1, 0, 2, 3))     # -> OIHW
    y = jax.lax.conv_general_dilated(
        x, w_f, (1, 1), [(k - 1 - pad, k - 1 - pad)] * 2,
        lhs_dilation=(stride, stride),
        dimension_numbers=("NCHW", "OIHW", "NCHW"), precision=_HIGHEST)
    return y if b is None else y + b.reshape(1, -1, 1, 1)


def reference_encode(p, x):
    relu = jax.nn.relu
    h = relu(_conv2d_nchw(x, p["enc_w1"], p["enc_b1"], 2, 1))
    h = relu(_conv2d_nchw(h, p["enc_w2"], p["enc_b2"], 2, 1))
    h = _conv2d_nchw(h, p["enc_w3"], p["enc_b3"], 1, 1)
    for w3, w1 in p["enc_res"]:
        h = h + _conv2d_nchw(relu(_conv2d_nchw(relu(h), w3, None, 1, 1)), w1, None, 1, 0)
    h = relu(h)
    return _conv2d_nchw(h, p["pre_vq_w"], p["pre_vq_b"], 1, 0)


def reference_decode(p, q):
    relu = jax.nn.relu
    g = _conv2d_nchw(q, p["dec_w1"], p["dec_b1"], 1, 1)
    for w3, w1 in p["dec_res"]:
        g = g + _conv2d_nchw(relu(_conv2d_nchw(relu(g), w3, None, 1, 1)), w1, None, 1, 0)
    g = relu(g)
    g = relu(_convt2d_nchw(g, p["dec_tw1"], p["dec_tb1"], 2, 1))
    return _convt2d_nchw(g, p["dec_tw2"], p["dec_tb2"], 2, 1)


# ----------------------------------------------------------------------------
# one-time weight remap: every layer -> 3x3 conv on the coarse (H/4, W/4) grid
# ----------------------------------------------------------------------------
def _coarse3x3_from_fine(apply_fine, c_in_fine, p_in, p_out):
    """Exact (9, C_in_coarse, C_out_coarse) matmul weights of the coarse-grid 3x3
    conv equivalent to the translation-invariant fine op `apply_fine` (NCHW->NCHW),
    extracted by probing it with one-hot inputs placed in the centre coarse cell."""
    cic = p_in * p_in * c_in_fine
    eye = jnp.eye(cic, dtype=jnp.float32).reshape(cic, p_in, p_in, c_in_fine)
    canvas = jnp.zeros((cic, 3 * p_in, 3 * p_in, c_in_fine), jnp.float32)
    canvas = canvas.at[:, p_in:2 * p_in, p_in:2 * p_in, :].set(eye)
    out = apply_fine(jnp.transpose(canvas, (0, 3, 1, 2)))          # NCHW probe
    out = jnp.transpose(out, (0, 2, 3, 1))                         # -> NHWC
    cof = out.shape[-1]
    out = out.reshape(cic, 3, p_out, 3, p_out, cof)
    out = jnp.transpose(out, (0, 1, 3, 2, 4, 5)).reshape(cic, 3, 3, p_out * p_out * cof)
    out = out[:, ::-1, ::-1, :]        # tap (di, dj) reads probe output cell (2-di, 2-dj)
    return jnp.transpose(out, (1, 2, 0, 3)).reshape(9, cic, p_out * p_out * cof)


def prepare_params(p):
    """Hoisted, one-time conversion of PyTorch-layout weights into kernel-ready
    coarse-grid matmul operands (ordered exactly as the fused kernel consumes them)."""
    nh, nrh, ed = NUM_HIDDENS, NUM_RESIDUAL_HIDDENS, EMBEDDING_DIM

    def conv_c(w, stride, pad, p_in, p_out):
        return _coarse3x3_from_fine(lambda c: _conv2d_nchw(c, w, None, stride, pad),
                                    w.shape[1], p_in, p_out)

    def convt_c(w, stride, pad, p_in, p_out):
        return _coarse3x3_from_fine(lambda c: _convt2d_nchw(c, w, None, stride, pad),
                                    w.shape[0], p_in, p_out)

    def bias_c(b, p_out):
        return jnp.tile(b, (p_out * p_out,)).reshape(1, -1).astype(jnp.float32)

    emb = p["embedding"].astype(jnp.float32)
    args = [
        # ---- encoder ----
        conv_c(p["enc_w1"], 2, 1, 4, 2), bias_c(p["enc_b1"], 2),    # (9, 48, 64)
        conv_c(p["enc_w2"], 2, 1, 2, 1), bias_c(p["enc_b2"], 1),    # (9, 64, 32)
        conv_c(p["enc_w3"], 1, 1, 1, 1), bias_c(p["enc_b3"], 1),    # (9, 32, 32)
    ]
    for w3, w1 in p["enc_res"]:
        args += [conv_c(w3, 1, 1, 1, 1), w1.reshape(nh, nrh).T]     # bias=False
    args += [
        # ---- pre-VQ 1x1 + codebook ----
        p["pre_vq_w"].reshape(ed, nh).T, p["pre_vq_b"].reshape(1, ed),
        emb, jnp.sum(emb * emb, axis=1).reshape(1, -1),
        # ---- decoder ----
        conv_c(p["dec_w1"], 1, 1, 1, 1), bias_c(p["dec_b1"], 1),
    ]
    for w3, w1 in p["dec_res"]:
        args += [conv_c(w3, 1, 1, 1, 1), w1.reshape(nh, nrh).T]
    args += [
        convt_c(p["dec_tw1"], 2, 1, 1, 2), bias_c(p["dec_tb1"], 2), # (9, 32, 64)
        convt_c(p["dec_tw2"], 2, 1, 2, 4), bias_c(p["dec_tb2"], 4), # (9, 64, 48)
    ]
    return {"kernel_args": [jnp.asarray(a, jnp.float32) for a in args],
            "embedding": emb}


def _shift_matrices(hc, wc):
    """(9*Hc*Wc, Hc*Wc) stacked 0/1 shift matrices: row block d selects the
    (di-1, dj-1)-shifted coarse image (zeros outside the border).  This is the
    in-kernel 'im2col' -- pure matmuls, no patch materialisation in HBM."""
    m = hc * wc
    s = np.zeros((9, m, m), np.float32)
    for di in range(3):
        for dj in range(3):
            for i in range(hc):
                si = i + di - 1
                if si < 0 or si >= hc:
                    continue
                for j in range(wc):
                    sj = j + dj - 1
                    if 0 <= sj < wc:
                        s[di * 3 + dj, i * wc + j, si * wc + sj] = 1.0
    return jnp.asarray(s.reshape(9 * m, m))


# ----------------------------------------------------------------------------
# the fused Pallas kernel: encoder -> VQ -> decoder for ONE image per grid step
# ----------------------------------------------------------------------------
def _fused_vqvae_kernel(x_ref, s_ref, *refs, num_res_layers, mi):
    *w_refs, recon_ref, z_out_ref, idx_out_ref = refs
    w_it = iter(w_refs)
    nxt = lambda: next(w_it)

    s_all = s_ref[...]                                   # (9*MI, MI) 0/1 shift matrices

    def conv3x3(x, w_ref, b_ref=None, relu=False):
        # 3x3 coarse-grid conv = one shift matmul + 9-tap matmul accumulation.
        shifted = jnp.dot(s_all, x, preferred_element_type=jnp.float32)   # (9*MI, Cin)
        acc = None
        for d in range(9):
            sx = shifted[d * mi:(d + 1) * mi, :]
            t = jnp.dot(sx, w_ref[d], preferred_element_type=jnp.float32)
            acc = t if acc is None else acc + t
        if b_ref is not None:
            acc = acc + b_ref[...]
        return jnp.maximum(acc, 0.0) if relu else acc

    def conv1x1(x, w_ref, b_ref=None):
        y = jnp.dot(x, w_ref[...], preferred_element_type=jnp.float32)
        return y if b_ref is None else y + b_ref[...]

    def residual_stack(h):
        for _ in range(num_res_layers):
            w3, w1 = nxt(), nxt()
            h = h + conv1x1(jnp.maximum(conv3x3(jnp.maximum(h, 0.0), w3), 0.0), w1)
        return jnp.maximum(h, 0.0)                       # trailing F.relu of the stack

    x = x_ref[0]                                         # (MI, 16*image_channels)

    # ------------------------------ encoder ------------------------------
    h = conv3x3(x, nxt(), nxt(), relu=True)              # Conv2d(4,4,s2,p1) #1 (coarse remap)
    h = conv3x3(h, nxt(), nxt(), relu=True)              # Conv2d(4,4,s2,p1) #2 (coarse remap)
    h = conv3x3(h, nxt(), nxt())                         # Conv2d(3,3,s1,p1)
    h = residual_stack(h)
    z = conv1x1(h, nxt(), nxt())                         # pre-VQ 1x1 conv -> (MI, D)

    # ---------------- vector quantizer (EMA variant, inference) ----------------
    e_ref, esq_ref = nxt(), nxt()
    e = e_ref[...]                                       # (K, D) codebook, f32
    k = e.shape[0]
    cross = jax.lax.dot_general(z, e, (((1,), (1,)), ((), ())),
                                preferred_element_type=jnp.float32)       # (MI, K)
    score = esq_ref[...] - 2.0 * cross                   # ||z||^2 dropped: argmin-invariant
    best = jnp.min(score, axis=1, keepdims=True)
    iota_k = jax.lax.broadcasted_iota(jnp.int32, (mi, k), 1)
    first = jnp.min(jnp.where(score <= best, iota_k, k), axis=1, keepdims=True)
    enc = (iota_k == first).astype(jnp.float32)          # first-argmin one-hot (torch tie-break)
    q = jnp.dot(enc, e, preferred_element_type=jnp.float32)               # (MI, D)

    z_out_ref[0] = z                                     # per-latent outputs; the global
    idx_out_ref[0] = first                               # loss/perplexity are finalised in XLA

    # ---------------- decoder (straight-through: forward value = codebook rows) ----------------
    g = conv3x3(q, nxt(), nxt())                         # Conv2d(3,3,s1,p1)
    g = residual_stack(g)
    g = conv3x3(g, nxt(), nxt(), relu=True)              # ConvTranspose2d(4,4,s2,p1) #1 (coarse remap)
    g = conv3x3(g, nxt(), nxt())                         # ConvTranspose2d(4,4,s2,p1) #2 (coarse remap)
    recon_ref[0] = g


# ----------------------------------------------------------------------------
# forward wrapper: layout plumbing + single pallas_call + tiny scalar epilogue
# ----------------------------------------------------------------------------
def _vqvae_forward_impl(prep, x_nchw):
    n, c, h, w = x_nchw.shape
    assert h % COARSE == 0 and w % COARSE == 0, "H and W must be multiples of 4"
    hc, wc = h // COARSE, w // COARSE
    mi = hc * wc
    cin0 = COARSE * COARSE * c
    cout_last = COARSE * COARSE * IMAGE_CHANNELS
    kernel_args = prep["kernel_args"]

    # bijective coarse-grid repack of the input (tiny layout plumbing, stays in XLA)
    xc = jnp.transpose(x_nchw, (0, 2, 3, 1)).reshape(n, hc, COARSE, wc, COARSE, c)
    xc = jnp.transpose(xc, (0, 1, 3, 2, 4, 5)).reshape(n, mi, cin0)

    s_all = _shift_matrices(hc, wc)
    # TODO(synk): for large latent grids, replace the dense shift matrices (O((Hc*Wc)^2))
    # with in-kernel roll/concat shifts or a spatially tiled grid.

    in_specs = [pl.BlockSpec((1, mi, cin0), lambda b: (b, 0, 0)),
                pl.BlockSpec(s_all.shape, lambda b: (0, 0))]
    in_specs += [pl.BlockSpec(a.shape, lambda b, nd=a.ndim: (0,) * nd)
                 for a in kernel_args]

    kernel = functools.partial(_fused_vqvae_kernel,
                               num_res_layers=NUM_RESIDUAL_LAYERS, mi=mi)

    recon_c, z_lat, idx = pl.pallas_call(
        kernel,
        grid=(n,),                                       # one image per step; >=2 steps so v7x
        in_specs=in_specs,                               # can split the batch across both TCs
        out_specs=(pl.BlockSpec((1, mi, cout_last), lambda b: (b, 0, 0)),
                   pl.BlockSpec((1, mi, EMBEDDING_DIM), lambda b: (b, 0, 0)),
                   pl.BlockSpec((1, mi, 1), lambda b: (b, 0, 0))),
        out_shape=(jax.ShapeDtypeStruct((n, mi, cout_last), jnp.float32),
                   jax.ShapeDtypeStruct((n, mi, EMBEDDING_DIM), jnp.float32),
                   jax.ShapeDtypeStruct((n, mi, 1), jnp.int32)),
        compiler_params=pltpu.CompilerParams(
            dimension_semantics=("parallel",)),
    )(xc, s_all, *kernel_args)

    # un-pack the reconstruction back to NCHW (bijective, tiny)
    rec = recon_c.reshape(n, hc, wc, COARSE, COARSE, IMAGE_CHANNELS)
    rec = jnp.transpose(rec, (0, 1, 3, 2, 4, 5)).reshape(n, h, w, IMAGE_CHANNELS)
    rec = jnp.transpose(rec, (0, 3, 1, 2))

    # finalise the two global VQ scalars from the per-latent kernel outputs
    # (XLA epilogue over n*hc*wc rows -- the "partials + finalize" split).
    emb = prep["embedding"]
    idx2 = idx[..., 0]                                   # (n, mi) int32
    quant = jnp.take(emb, idx2, axis=0)                  # (n, mi, D)
    loss = COMMITMENT_COST * jnp.mean((quant - z_lat) ** 2)
    onehot = jax.nn.one_hot(idx2.reshape(-1), NUM_EMBEDDINGS, dtype=jnp.float32)
    avg = jnp.mean(onehot, axis=0)
    perplexity = jnp.exp(-jnp.sum(avg * jnp.log(avg + 1e-10)))
    # TODO(synk): the EMA codebook-buffer update only runs in training mode and does not
    # affect forward outputs; it (and a straight-through custom VJP) is omitted here.
    return loss, rec, perplexity, z_lat, idx2


def vqvae_forward(prep, x_nchw):
    loss, recon, perplexity, _, _ = _vqvae_forward_impl(prep, x_nchw)
    return loss, recon, perplexity


# ----------------------------------------------------------------------------
if __name__ == "__main__":
    key = jax.random.PRNGKey(0)
    pkey, xkey = jax.random.split(key)
    raw = init_params(pkey)
    prep = prepare_params(raw)               # one-time weight remap, hoisted out of forward
    x = jax.random.normal(xkey, (2, IMAGE_CHANNELS, 16, 16), jnp.float32)

    fwd = jax.jit(_vqvae_forward_impl)
    loss, recon, perplexity, z_lat, idx = fwd(prep, x)
    jax.block_until_ready((loss, recon, perplexity, z_lat, idx))

    assert recon.shape == x.shape and loss.shape == () and perplexity.shape == ()
    assert bool(jnp.all(jnp.isfinite(recon)))

    # ---- numerical validation against a pure-JAX reference of the PyTorch module ----
    # encoder + pre-VQ latents
    z_ref = jnp.transpose(reference_encode(raw, x), (0, 2, 3, 1))          # (N, Hc, Wc, D)
    z_k = np.asarray(z_lat).reshape(-1, EMBEDDING_DIM)
    np.testing.assert_allclose(z_k, np.asarray(z_ref).reshape(-1, EMBEDDING_DIM),
                               rtol=5e-2, atol=5e-3)

    # kernel's code choice must be a (near-)argmin of the true squared distances
    emb_np = np.asarray(raw["embedding"], np.float64)
    zd = z_k.astype(np.float64)
    d = (zd ** 2).sum(1, keepdims=True) + (emb_np ** 2).sum(1)[None, :] - 2.0 * zd @ emb_np.T
    idx_k = np.asarray(idx).reshape(-1)
    assert np.all(d[np.arange(d.shape[0]), idx_k] <= d.min(axis=1) + 1e-2)

    # loss / perplexity recomputed from the kernel's own latents + assignments
    q_k = emb_np[idx_k]
    np.testing.assert_allclose(float(loss),
                               COMMITMENT_COST * np.mean((q_k - zd) ** 2), rtol=1e-3)
    cnt = np.bincount(idx_k, minlength=NUM_EMBEDDINGS) / idx_k.size
    np.testing.assert_allclose(float(perplexity),
                               np.exp(-np.sum(cnt * np.log(cnt + 1e-10))), rtol=1e-3)

    # decoder (incl. the ConvTranspose2d coarse remap) vs the reference decoder
    n_img, hc, wc = x.shape[0], x.shape[2] // COARSE, x.shape[3] // COARSE
    q_nchw = jnp.transpose(
        jnp.asarray(q_k, jnp.float32).reshape(n_img, hc, wc, EMBEDDING_DIM), (0, 3, 1, 2))
    recon_ref = reference_decode(raw, q_nchw)
    np.testing.assert_allclose(np.asarray(recon), np.asarray(recon_ref),
                               rtol=5e-2, atol=2e-2)

    print("KERNEL_OK")
</pallas_src>

<mosaic_0001>
module attributes {stable_mosaic.version = 11 : i64} {
  func.func @_fused_vqvae_kernel(%arg0: i32, %arg1: memref<1x16x48xf32, #tpu.memory_space<vmem>>, %arg2: memref<144x16xf32, #tpu.memory_space<vmem>>, %arg3: memref<9x48x64xf32, #tpu.memory_space<vmem>>, %arg4: memref<1x64xf32, #tpu.memory_space<vmem>>, %arg5: memref<9x64x32xf32, #tpu.memory_space<vmem>>, %arg6: memref<1x32xf32, #tpu.memory_space<vmem>>, %arg7: memref<9x32x32xf32, #tpu.memory_space<vmem>>, %arg8: memref<1x32xf32, #tpu.memory_space<vmem>>, %arg9: memref<9x32x8xf32, #tpu.memory_space<vmem>>, %arg10: memref<8x32xf32, #tpu.memory_space<vmem>>, %arg11: memref<9x32x8xf32, #tpu.memory_space<vmem>>, %arg12: memref<8x32xf32, #tpu.memory_space<vmem>>, %arg13: memref<32x8xf32, #tpu.memory_space<vmem>>, %arg14: memref<1x8xf32, #tpu.memory_space<vmem>>, %arg15: memref<16x8xf32, #tpu.memory_space<vmem>>, %arg16: memref<1x16xf32, #tpu.memory_space<vmem>>, %arg17: memref<9x8x32xf32, #tpu.memory_space<vmem>>, %arg18: memref<1x32xf32, #tpu.memory_space<vmem>>, %arg19: memref<9x32x8xf32, #tpu.memory_space<vmem>>, %arg20: memref<8x32xf32, #tpu.memory_space<vmem>>, %arg21: memref<9x32x8xf32, #tpu.memory_space<vmem>>, %arg22: memref<8x32xf32, #tpu.memory_space<vmem>>, %arg23: memref<9x32x64xf32, #tpu.memory_space<vmem>>, %arg24: memref<1x64xf32, #tpu.memory_space<vmem>>, %arg25: memref<9x64x48xf32, #tpu.memory_space<vmem>>, %arg26: memref<1x48xf32, #tpu.memory_space<vmem>>, %arg27: memref<1x16x48xf32, #tpu.memory_space<vmem>>, %arg28: memref<1x16x8xf32, #tpu.memory_space<vmem>>, %arg29: memref<1x16x1xi32, #tpu.memory_space<vmem>>) attributes {dimension_semantics = [#tpu.dimension_semantics<parallel>], iteration_bounds = array<i64: 2>, scalar_prefetch = 0 : i64, scratch_operands = 0 : i64, tpu.core_type = #tpu.core_type<tc>, window_params = [{transform_indices = @transform_0, window_bounds = array<i64: 1, 16, 48>}, {pipeline_mode = #tpu.pipeline_mode<synchronous>, transform_indices = @transform_1, window_bounds = array<i64: 144, 16>}, {pipeline_mode = #tpu.pipeline_mode<synchronous>, transform_indices = @transform_2, window_bounds = array<i64: 9, 48, 64>}, {pipeline_mode = #tpu.pipeline_mode<synchronous>, transform_indices = @transform_3, window_bounds = array<i64: 1, 64>}, {pipeline_mode = #tpu.pipeline_mode<synchronous>, transform_indices = @transform_4, window_bounds = array<i64: 9, 64, 32>}, {pipeline_mode = #tpu.pipeline_mode<synchronous>, transform_indices = @transform_5, window_bounds = array<i64: 1, 32>}, {pipeline_mode = #tpu.pipeline_mode<synchronous>, transform_indices = @transform_6, window_bounds = array<i64: 9, 32, 32>}, {pipeline_mode = #tpu.pipeline_mode<synchronous>, transform_indices = @transform_7, window_bounds = array<i64: 1, 32>}, {pipeline_mode = #tpu.pipeline_mode<synchronous>, transform_indices = @transform_8, window_bounds = array<i64: 9, 32, 8>}, {pipeline_mode = #tpu.pipeline_mode<synchronous>, transform_indices = @transform_9, window_bounds = array<i64: 8, 32>}, {pipeline_mode = #tpu.pipeline_mode<synchronous>, transform_indices = @transform_10, window_bounds = array<i64: 9, 32, 8>}, {pipeline_mode = #tpu.pipeline_mode<synchronous>, transform_indices = @transform_11, window_bounds = array<i64: 8, 32>}, {pipeline_mode = #tpu.pipeline_mode<synchronous>, transform_indices = @transform_12, window_bounds = array<i64: 32, 8>}, {pipeline_mode = #tpu.pipeline_mode<synchronous>, transform_indices = @transform_13, window_bounds = array<i64: 1, 8>}, {pipeline_mode = #tpu.pipeline_mode<synchronous>, transform_indices = @transform_14, window_bounds = array<i64: 16, 8>}, {pipeline_mode = #tpu.pipeline_mode<synchronous>, transform_indices = @transform_15, window_bounds = array<i64: 1, 16>}, {pipeline_mode = #tpu.pipeline_mode<synchronous>, transform_indices = @transform_16, window_bounds = array<i64: 9, 8, 32>}, {pipeline_mode = #tpu.pipeline_mode<synchronous>, transform_indices = @transform_17, window_bounds = array<i64: 1, 32>}, {pipeline_mode = #tpu.pipeline_mode<synchronous>, transform_indices = @transform_18, window_bounds = array<i64: 9, 32, 8>}, {pipeline_mode = #tpu.pipeline_mode<synchronous>, transform_indices = @transform_19, window_bounds = array<i64: 8, 32>}, {pipeline_mode = #tpu.pipeline_mode<synchronous>, transform_indices = @transform_20, window_bounds = array<i64: 9, 32, 8>}, {pipeline_mode = #tpu.pipeline_mode<synchronous>, transform_indices = @transform_21, window_bounds = array<i64: 8, 32>}, {pipeline_mode = #tpu.pipeline_mode<synchronous>, transform_indices = @transform_22, window_bounds = array<i64: 9, 32, 64>}, {pipeline_mode = #tpu.pipeline_mode<synchronous>, transform_indices = @transform_23, window_bounds = array<i64: 1, 64>}, {pipeline_mode = #tpu.pipeline_mode<synchronous>, transform_indices = @transform_24, window_bounds = array<i64: 9, 64, 48>}, {pipeline_mode = #tpu.pipeline_mode<synchronous>, transform_indices = @transform_25, window_bounds = array<i64: 1, 48>}, {transform_indices = @transform_26, window_bounds = array<i64: 1, 16, 48>}, {transform_indices = @transform_27, window_bounds = array<i64: 1, 16, 8>}, {transform_indices = @transform_28, window_bounds = array<i64: 1, 16, 1>}]} {
    %c0 = arith.constant 0 : index
    %c0_0 = arith.constant 0 : index
    %0 = vector.load %arg2[%c0, %c0_0] : memref<144x16xf32, #tpu.memory_space<vmem>>, vector<144x16xf32>
    %c0_1 = arith.constant 0 : index
    %c0_2 = arith.constant 0 : index
    %c0_3 = arith.constant 0 : index
    %1 = vector.load %arg1[%c0_1, %c0_2, %c0_3] : memref<1x16x48xf32, #tpu.memory_space<vmem>>, vector<1x16x48xf32>
    %2 = vector.shape_cast %1 : vector<1x16x48xf32> to vector<16x48xf32>
    %cst = arith.constant dense<0.000000e+00> : vector<144x48xf32>
    %3 = tpu.matmul %0, %2, %cst {dimension_numbers = #tpu.dot_dimension_numbers<[1], [0], [0], [1], [0, 0, 1, 1], [], []>} : vector<144x16xf32>, vector<16x48xf32>, vector<144x48xf32> -> vector<144x48xf32>
    %4 = vector.extract_strided_slice %3 {offsets = [0, 0], sizes = [16, 48], strides = [1, 1]} : vector<144x48xf32> to vector<16x48xf32>
    %c0_4 = arith.constant 0 : index
    %c0_5 = arith.constant 0 : index
    %c0_6 = arith.constant 0 : index
    %5 = vector.load %arg3[%c0_4, %c0_5, %c0_6] : memref<9x48x64xf32, #tpu.memory_space<vmem>>, vector<1x48x64xf32>
    %6 = vector.shape_cast %5 : vector<1x48x64xf32> to vector<48x64xf32>
    %cst_7 = arith.constant dense<0.000000e+00> : vector<16x64xf32>
    %7 = tpu.matmul %4, %6, %cst_7 {dimension_numbers = #tpu.dot_dimension_numbers<[1], [0], [0], [1], [0, 0, 1, 1], [], []>} : vector<16x48xf32>, vector<48x64xf32>, vector<16x64xf32> -> vector<16x64xf32>
    %8 = vector.extract_strided_slice %3 {offsets = [16, 0], sizes = [16, 48], strides = [1, 1]} : vector<144x48xf32> to vector<16x48xf32>
    %c1 = arith.constant 1 : index
    %c0_8 = arith.constant 0 : index
    %c0_9 = arith.constant 0 : index
    %9 = vector.load %arg3[%c1, %c0_8, %c0_9] : memref<9x48x64xf32, #tpu.memory_space<vmem>>, vector<1x48x64xf32>
    %10 = vector.shape_cast %9 : vector<1x48x64xf32> to vector<48x64xf32>
    %cst_10 = arith.constant dense<0.000000e+00> : vector<16x64xf32>
    %11 = tpu.matmul %8, %10, %cst_10 {dimension_numbers = #tpu.dot_dimension_numbers<[1], [0], [0], [1], [0, 0, 1, 1], [], []>} : vector<16x48xf32>, vector<48x64xf32>, vector<16x64xf32> -> vector<16x64xf32>
    %12 = arith.addf %7, %11 : vector<16x64xf32>
    %13 = vector.extract_strided_slice %3 {offsets = [32, 0], sizes = [16, 48], strides = [1, 1]} : vector<144x48xf32> to vector<16x48xf32>
    %c2 = arith.constant 2 : index
    %c0_11 = arith.constant 0 : index
    %c0_12 = arith.constant 0 : index
    %14 = vector.load %arg3[%c2, %c0_11, %c0_12] : memref<9x48x64xf32, #tpu.memory_space<vmem>>, vector<1x48x64xf32>
    %15 = vector.shape_cast %14 : vector<1x48x64xf32> to vector<48x64xf32>
    %cst_13 = arith.constant dense<0.000000e+00> : vector<16x64xf32>
    %16 = tpu.matmul %13, %15, %cst_13 {dimension_numbers = #tpu.dot_dimension_numbers<[1], [0], [0], [1], [0, 0, 1, 1], [], []>} : vector<16x48xf32>, vector<48x64xf32>, vector<16x64xf32> -> vector<16x64xf32>
    %17 = arith.addf %12, %16 : vector<16x64xf32>
    %18 = vector.extract_strided_slice %3 {offsets = [48, 0], sizes = [16, 48], strides = [1, 1]} : vector<144x48xf32> to vector<16x48xf32>
    %c3 = arith.constant 3 : index
    %c0_14 = arith.constant 0 : index
    %c0_15 = arith.constant 0 : index
    %19 = vector.load %arg3[%c3, %c0_14, %c0_15] : memref<9x48x64xf32, #tpu.memory_space<vmem>>, vector<1x48x64xf32>
    %20 = vector.shape_cast %19 : vector<1x48x64xf32> to vector<48x64xf32>
    %cst_16 = arith.constant dense<0.000000e+00> : vector<16x64xf32>
    %21 = tpu.matmul %18, %20, %cst_16 {dimension_numbers = #tpu.dot_dimension_numbers<[1], [0], [0], [1], [0, 0, 1, 1], [], []>} : vector<16x48xf32>, vector<48x64xf32>, vector<16x64xf32> -> vector<16x64xf32>
    %22 = arith.addf %17, %21 : vector<16x64xf32>
    %23 = vector.extract_strided_slice %3 {offsets = [64, 0], sizes = [16, 48], strides = [1, 1]} : vector<144x48xf32> to vector<16x48xf32>
    %c4 = arith.constant 4 : index
    %c0_17 = arith.constant 0 : index
    %c0_18 = arith.constant 0 : index
    %24 = vector.load %arg3[%c4, %c0_17, %c0_18] : memref<9x48x64xf32, #tpu.memory_space<vmem>>, vector<1x48x64xf32>
    %25 = vector.shape_cast %24 : vector<1x48x64xf32> to vector<48x64xf32>
    %cst_19 = arith.constant dense<0.000000e+00> : vector<16x64xf32>
    %26 = tpu.matmul %23, %25, %cst_19 {dimension_numbers = #tpu.dot_dimension_numbers<[1], [0], [0], [1], [0, 0, 1, 1], [], []>} : vector<16x48xf32>, vector<48x64xf32>, vector<16x64xf32> -> vector<16x64xf32>
    %27 = arith.addf %22, %26 : vector<16x64xf32>
    %28 = vector.extract_strided_slice %3 {offsets = [80, 0], sizes = [16, 48], strides = [1, 1]} : vector<144x48xf32> to vector<16x48xf32>
    %c5 = arith.constant 5 : index
    %c0_20 = arith.constant 0 : index
    %c0_21 = arith.constant 0 : index
    %29 = vector.load %arg3[%c5, %c0_20, %c0_21] : memref<9x48x64xf32, #tpu.memory_space<vmem>>, vector<1x48x64xf32>
    %30 = vector.shape_cast %29 : vector<1x48x64xf32> to vector<48x64xf32>
    %cst_22 = arith.constant dense<0.000000e+00> : vector<16x64xf32>
    %31 = tpu.matmul %28, %30, %cst_22 {dimension_numbers = #tpu.dot_dimension_numbers<[1], [0], [0], [1], [0, 0, 1, 1], [], []>} : vector<16x48xf32>, vector<48x64xf32>, vector<16x64xf32> -> vector<16x64xf32>
    %32 = arith.addf %27, %31 : vector<16x64xf32>
    %33 = vector.extract_strided_slice %3 {offsets = [96, 0], sizes = [16, 48], strides = [1, 1]} : vector<144x48xf32> to vector<16x48xf32>
    %c6 = arith.constant 6 : index
    %c0_23 = arith.constant 0 : index
    %c0_24 = arith.constant 0 : index
    %34 = vector.load %arg3[%c6, %c0_23, %c0_24] : memref<9x48x64xf32, #tpu.memory_space<vmem>>, vector<1x48x64xf32>
    %35 = vector.shape_cast %34 : vector<1x48x64xf32> to vector<48x64xf32>
    %cst_25 = arith.constant dense<0.000000e+00> : vector<16x64xf32>
    %36 = tpu.matmul %33, %35, %cst_25 {dimension_numbers = #tpu.dot_dimension_numbers<[1], [0], [0], [1], [0, 0, 1, 1], [], []>} : vector<16x48xf32>, vector<48x64xf32>, vector<16x64xf32> -> vector<16x64xf32>
    %37 = arith.addf %32, %36 : vector<16x64xf32>
    %38 = vector.extract_strided_slice %3 {offsets = [112, 0], sizes = [16, 48], strides = [1, 1]} : vector<144x48xf32> to vector<16x48xf32>
    %c7 = arith.constant 7 : index
    %c0_26 = arith.constant 0 : index
    %c0_27 = arith.constant 0 : index
    %39 = vector.load %arg3[%c7, %c0_26, %c0_27] : memref<9x48x64xf32, #tpu.memory_space<vmem>>, vector<1x48x64xf32>
    %40 = vector.shape_cast %39 : vector<1x48x64xf32> to vector<48x64xf32>
    %cst_28 = arith.constant dense<0.000000e+00> : vector<16x64xf32>
    %41 = tpu.matmul %38, %40, %cst_28 {dimension_numbers = #tpu.dot_dimension_numbers<[1], [0], [0], [1], [0, 0, 1, 1], [], []>} : vector<16x48xf32>, vector<48x64xf32>, vector<16x64xf32> -> vector<16x64xf32>
    %42 = arith.addf %37, %41 : vector<16x64xf32>
    %43 = vector.extract_strided_slice %3 {offsets = [128, 0], sizes = [16, 48], strides = [1, 1]} : vector<144x48xf32> to vector<16x48xf32>
    %c8 = arith.constant 8 : index
    %c0_29 = arith.constant 0 : index
    %c0_30 = arith.constant 0 : index
    %44 = vector.load %arg3[%c8, %c0_29, %c0_30] : memref<9x48x64xf32, #tpu.memory_space<vmem>>, vector<1x48x64xf32>
    %45 = vector.shape_cast %44 : vector<1x48x64xf32> to vector<48x64xf32>
    %cst_31 = arith.constant dense<0.000000e+00> : vector<16x64xf32>
    %46 = tpu.matmul %43, %45, %cst_31 {dimension_numbers = #tpu.dot_dimension_numbers<[1], [0], [0], [1], [0, 0, 1, 1], [], []>} : vector<16x48xf32>, vector<48x64xf32>, vector<16x64xf32> -> vector<16x64xf32>
    %47 = arith.addf %42, %46 : vector<16x64xf32>
    %c0_32 = arith.constant 0 : index
    %c0_33 = arith.constant 0 : index
    %48 = vector.load %arg4[%c0_32, %c0_33] : memref<1x64xf32, #tpu.memory_space<vmem>>, vector<1x64xf32>
    %49 = vector.broadcast %48 : vector<1x64xf32> to vector<16x64xf32>
    %50 = arith.addf %47, %49 : vector<16x64xf32>
    %cst_34 = arith.constant 0.000000e+00 : f32
    %51 = vector.broadcast %cst_34 : f32 to vector<16x64xf32>
    %52 = arith.maximumf %50, %51 : vector<16x64xf32>
    %cst_35 = arith.constant dense<0.000000e+00> : vector<144x64xf32>
    %53 = tpu.matmul %0, %52, %cst_35 {dimension_numbers = #tpu.dot_dimension_numbers<[1], [0], [0], [1], [0, 0, 1, 1], [], []>} : vector<144x16xf32>, vector<16x64xf32>, vector<144x64xf32> -> vector<144x64xf32>
    %54 = vector.extract_strided_slice %53 {offsets = [0, 0], sizes = [16, 64], strides = [1, 1]} : vector<144x64xf32> to vector<16x64xf32>
    %c0_36 = arith.constant 0 : index
    %c0_37 = arith.constant 0 : index
    %c0_38 = arith.constant 0 : index
    %55 = vector.load %arg5[%c0_36, %c0_37, %c0_38] : memref<9x64x32xf32, #tpu.memory_space<vmem>>, vector<1x64x32xf32>
    %56 = vector.shape_cast %55 : vector<1x64x32xf32> to vector<64x32xf32>
    %cst_39 = arith.constant dense<0.000000e+00> : vector<16x32xf32>
    %57 = tpu.matmul %54, %56, %cst_39 {dimension_numbers = #tpu.dot_dimension_numbers<[1], [0], [0], [1], [0, 0, 1, 1], [], []>} : vector<16x64xf32>, vector<64x32xf32>, vector<16x32xf32> -> vector<16x32xf32>
    %58 = vector.extract_strided_slice %53 {offsets = [16, 0], sizes = [16, 64], strides = [1, 1]} : vector<144x64xf32> to vector<16x64xf32>
    %c1_40 = arith.constant 1 : index
    %c0_41 = arith.constant 0 : index
    %c0_42 = arith.constant 0 : index
    %59 = vector.load %arg5[%c1_40, %c0_41, %c0_42] : memref<9x64x32xf32, #tpu.memory_space<vmem>>, vector<1x64x32xf32>
    %60 = vector.shape_cast %59 : vector<1x64x32xf32> to vector<64x32xf32>
    %cst_43 = arith.constant dense<0.000000e+00> : vector<16x32xf32>
    %61 = tpu.matmul %58, %60, %cst_43 {dimension_numbers = #tpu.dot_dimension_numbers<[1], [0], [0], [1], [0, 0, 1, 1], [], []>} : vector<16x64xf32>, vector<64x32xf32>, vector<16x32xf32> -> vector<16x32xf32>
    %62 = arith.addf %57, %61 : vector<16x32xf32>
    %63 = vector.extract_strided_slice %53 {offsets = [32, 0], sizes = [16, 64], strides = [1, 1]} : vector<144x64xf32> to vector<16x64xf32>
    %c2_44 = arith.constant 2 : index
    %c0_45 = arith.constant 0 : index
    %c0_46 = arith.constant 0 : index
    %64 = vector.load %arg5[%c2_44, %c0_45, %c0_46] : memref<9x64x32xf32, #tpu.memory_space<vmem>>, vector<1x64x32xf32>
    %65 = vector.shape_cast %64 : vector<1x64x32xf32> to vector<64x32xf32>
    %cst_47 = arith.constant dense<0.000000e+00> : vector<16x32xf32>
    %66 = tpu.matmul %63, %65, %cst_47 {dimension_numbers = #tpu.dot_dimension_numbers<[1], [0], [0], [1], [0, 0, 1, 1], [], []>} : vector<16x64xf32>, vector<64x32xf32>, vector<16x32xf32> -> vector<16x32xf32>
    %67 = arith.addf %62, %66 : vector<16x32xf32>
    %68 = vector.extract_strided_slice %53 {offsets = [48, 0], sizes = [16, 64], strides = [1, 1]} : vector<144x64xf32> to vector<16x64xf32>
    %c3_48 = arith.constant 3 : index
    %c0_49 = arith.constant 0 : index
    %c0_50 = arith.constant 0 : index
    %69 = vector.load %arg5[%c3_48, %c0_49, %c0_50] : memref<9x64x32xf32, #tpu.memory_space<vmem>>, vector<1x64x32xf32>
    %70 = vector.shape_cast %69 : vector<1x64x32xf32> to vector<64x32xf32>
    %cst_51 = arith.constant dense<0.000000e+00> : vector<16x32xf32>
    %71 = tpu.matmul %68, %70, %cst_51 {dimension_numbers = #tpu.dot_dimension_numbers<[1], [0], [0], [1], [0, 0, 1, 1], [], []>} : vector<16x64xf32>, vector<64x32xf32>, vector<16x32xf32> -> vector<16x32xf32>
    %72 = arith.addf %67, %71 : vector<16x32xf32>
    %73 = vector.extract_strided_slice %53 {offsets = [64, 0], sizes = [16, 64], strides = [1, 1]} : vector<144x64xf32> to vector<16x64xf32>
    %c4_52 = arith.constant 4 : index
    %c0_53 = arith.constant 0 : index
    %c0_54 = arith.constant 0 : index
    %74 = vector.load %arg5[%c4_52, %c0_53, %c0_54] : memref<9x64x32xf32, #tpu.memory_space<vmem>>, vector<1x64x32xf32>
    %75 = vector.shape_cast %74 : vector<1x64x32xf32> to vector<64x32xf32>
    %cst_55 = arith.constant dense<0.000000e+00> : vector<16x32xf32>
    %76 = tpu.matmul %73, %75, %cst_55 {dimension_numbers = #tpu.dot_dimension_numbers<[1], [0], [0], [1], [0, 0, 1, 1], [], []>} : vector<16x64xf32>, vector<64x32xf32>, vector<16x32xf32> -> vector<16x32xf32>
    %77 = arith.addf %72, %76 : vector<16x32xf32>
    %78 = vector.extract_strided_slice %53 {offsets = [80, 0], sizes = [16, 64], strides = [1, 1]} : vector<144x64xf32> to vector<16x64xf32>
    %c5_56 = arith.constant 5 : index
    %c0_57 = arith.constant 0 : index
    %c0_58 = arith.constant 0 : index
    %79 = vector.load %arg5[%c5_56, %c0_57, %c0_58] : memref<9x64x32xf32, #tpu.memory_space<vmem>>, vector<1x64x32xf32>
    %80 = vector.shape_cast %79 : vector<1x64x32xf32> to vector<64x32xf32>
    %cst_59 = arith.constant dense<0.000000e+00> : vector<16x32xf32>
    %81 = tpu.matmul %78, %80, %cst_59 {dimension_numbers = #tpu.dot_dimension_numbers<[1], [0], [0], [1], [0, 0, 1, 1], [], []>} : vector<16x64xf32>, vector<64x32xf32>, vector<16x32xf32> -> vector<16x32xf32>
    %82 = arith.addf %77, %81 : vector<16x32xf32>
    %83 = vector.extract_strided_slice %53 {offsets = [96, 0], sizes = [16, 64], strides = [1, 1]} : vector<144x64xf32> to vector<16x64xf32>
    %c6_60 = arith.constant 6 : index
    %c0_61 = arith.constant 0 : index
    %c0_62 = arith.constant 0 : index
    %84 = vector.load %arg5[%c6_60, %c0_61, %c0_62] : memref<9x64x32xf32, #tpu.memory_space<vmem>>, vector<1x64x32xf32>
    %85 = vector.shape_cast %84 : vector<1x64x32xf32> to vector<64x32xf32>
    %cst_63 = arith.constant dense<0.000000e+00> : vector<16x32xf32>
    %86 = tpu.matmul %83, %85, %cst_63 {dimension_numbers = #tpu.dot_dimension_numbers<[1], [0], [0], [1], [0, 0, 1, 1], [], []>} : vector<16x64xf32>, vector<64x32xf32>, vector<16x32xf32> -> vector<16x32xf32>
    %87 = arith.addf %82, %86 : vector<16x32xf32>
    %88 = vector.extract_strided_slice %53 {offsets = [112, 0], sizes = [16, 64], strides = [1, 1]} : vector<144x64xf32> to vector<16x64xf32>
    %c7_64 = arith.constant 7 : index
    %c0_65 = arith.constant 0 : index
    %c0_66 = arith.constant 0 : index
    %89 = vector.load %arg5[%c7_64, %c0_65, %c0_66] : memref<9x64x32xf32, #tpu.memory_space<vmem>>, vector<1x64x32xf32>
    %90 = vector.shape_cast %89 : vector<1x64x32xf32> to vector<64x32xf32>
    %cst_67 = arith.constant dense<0.000000e+00> : vector<16x32xf32>
    %91 = tpu.matmul %88, %90, %cst_67 {dimension_numbers = #tpu.dot_dimension_numbers<[1], [0], [0], [1], [0, 0, 1, 1], [], []>} : vector<16x64xf32>, vector<64x32xf32>, vector<16x32xf32> -> vector<16x32xf32>
    %92 = arith.addf %87, %91 : vector<16x32xf32>
    %93 = vector.extract_strided_slice %53 {offsets = [128, 0], sizes = [16, 64], strides = [1, 1]} : vector<144x64xf32> to vector<16x64xf32>
    %c8_68 = arith.constant 8 : index
    %c0_69 = arith.constant 0 : index
    %c0_70 = arith.constant 0 : index
    %94 = vector.load %arg5[%c8_68, %c0_69, %c0_70] : memref<9x64x32xf32, #tpu.memory_space<vmem>>, vector<1x64x32xf32>
    %95 = vector.shape_cast %94 : vector<1x64x32xf32> to vector<64x32xf32>
    %cst_71 = arith.constant dense<0.000000e+00> : vector<16x32xf32>
    %96 = tpu.matmul %93, %95, %cst_71 {dimension_numbers = #tpu.dot_dimension_numbers<[1], [0], [0], [1], [0, 0, 1, 1], [], []>} : vector<16x64xf32>, vector<64x32xf32>, vector<16x32xf32> -> vector<16x32xf32>
    %97 = arith.addf %92, %96 : vector<16x32xf32>
    %c0_72 = arith.constant 0 : index
    %c0_73 = arith.constant 0 : index
    %98 = vector.load %arg6[%c0_72, %c0_73] : memref<1x32xf32, #tpu.memory_space<vmem>>, vector<1x32xf32>
    %99 = vector.broadcast %98 : vector<1x32xf32> to vector<16x32xf32>
    %100 = arith.addf %97, %99 : vector<16x32xf32>
    %cst_74 = arith.constant 0.000000e+00 : f32
    %101 = vector.broadcast %cst_74 : f32 to vector<16x32xf32>
    %102 = arith.maximumf %100, %101 : vector<16x32xf32>
    %cst_75 = arith.constant dense<0.000000e+00> : vector<144x32xf32>
    %103 = tpu.matmul %0, %102, %cst_75 {dimension_numbers = #tpu.dot_dimension_numbers<[1], [0], [0], [1], [0, 0, 1, 1], [], []>} : vector<144x16xf32>, vector<16x32xf32>, vector<144x32xf32> -> vector<144x32xf32>
    %104 = vector.extract_strided_slice %103 {offsets = [0, 0], sizes = [16, 32], strides = [1, 1]} : vector<144x32xf32> to vector<16x32xf32>
    %c0_76 = arith.constant 0 : index
    %c0_77 = arith.constant 0 : index
    %c0_78 = arith.constant 0 : index
    %105 = vector.load %arg7[%c0_76, %c0_77, %c0_78] : memref<9x32x32xf32, #tpu.memory_space<vmem>>, vector<1x32x32xf32>
    %106 = vector.shape_cast %105 : vector<1x32x32xf32> to vector<32x32xf32>
    %cst_79 = arith.constant dense<0.000000e+00> : vector<16x32xf32>
    %107 = tpu.matmul %104, %106, %cst_79 {dimension_numbers = #tpu.dot_dimension_numbers<[1], [0], [0], [1], [0, 0, 1, 1], [], []>} : vector<16x32xf32>, vector<32x32xf32>, vector<16x32xf32> -> vector<16x32xf32>
    %108 = vector.extract_strided_slice %103 {offsets = [16, 0], sizes = [16, 32], strides = [1, 1]} : vector<144x32xf32> to vector<16x32xf32>
    %c1_80 = arith.constant 1 : index
    %c0_81 = arith.constant 0 : index
    %c0_82 = arith.constant 0 : index
    %109 = vector.load %arg7[%c1_80, %c0_81, %c0_82] : memref<9x32x32xf32, #tpu.memory_space<vmem>>, vector<1x32x32xf32>
    %110 = vector.shape_cast %109 : vector<1x32x32xf32> to vector<32x32xf32>
    %cst_83 = arith.constant dense<0.000000e+00> : vector<16x32xf32>
    %111 = tpu.matmul %108, %110, %cst_83 {dimension_numbers = #tpu.dot_dimension_numbers<[1], [0], [0], [1], [0, 0, 1, 1], [], []>} : vector<16x32xf32>, vector<32x32xf32>, vector<16x32xf32> -> vector<16x32xf32>
    %112 = arith.addf %107, %111 : vector<16x32xf32>
    %113 = vector.extract_strided_slice %103 {offsets = [32, 0], sizes = [16, 32], strides = [1, 1]} : vector<144x32xf32> to vector<16x32xf32>
    %c2_84 = arith.constant 2 : index
    %c0_85 = arith.constant 0 : index
    %c0_86 = arith.constant 0 : index
    %114 = vector.load %arg7[%c2_84, %c0_85, %c0_86] : memref<9x32x32xf32, #tpu.memory_space<vmem>>, vector<1x32x32xf32>
    %115 = vector.shape_cast %114 : vector<1x32x32xf32> to vector<32x32xf32>
    %cst_87 = arith.constant dense<0.000000e+00> : vector<16x32xf32>
    %116 = tpu.matmul %113, %115, %cst_87 {dimension_numbers = #tpu.dot_dimension_numbers<[1], [0], [0], [1], [0, 0, 1, 1], [], []>} : vector<16x32xf32>, vector<32x32xf32>, vector<16x32xf32> -> vector<16x32xf32>
    %117 = arith.addf %112, %116 : vector<16x32xf32>
    %118 = vector.extract_strided_slice %103 {offsets = [48, 0], sizes = [16, 32], strides = [1, 1]} : vector<144x32xf32> to vector<16x32xf32>
    %c3_88 = arith.constant 3 : index
    %c0_89 = arith.constant 0 : index
    %c0_90 = arith.constant 0 : index
    %119 = vector.load %arg7[%c3_88, %c0_89, %c0_90] : memref<9x32x32xf32, #tpu.memory_space<vmem>>, vector<1x32x32xf32>
    %120 = vector.shape_cast %119 : vector<1x32x32xf32> to vector<32x32xf32>
    %cst_91 = arith.constant dense<0.000000e+00> : vector<16x32xf32>
    %121 = tpu.matmul %118, %120, %cst_91 {dimension_numbers = #tpu.dot_dimension_numbers<[1], [0], [0], [1], [0, 0, 1, 1], [], []>} : vector<16x32xf32>, vector<32x32xf32>, vector<16x32xf32> -> vector<16x32xf32>
    %122 = arith.addf %117, %121 : vector<16x32xf32>
    %123 = vector.extract_strided_slice %103 {offsets = [64, 0], sizes = [16, 32], strides = [1, 1]} : vector<144x32xf32> to vector<16x32xf32>
    %c4_92 = arith.constant 4 : index
    %c0_93 = arith.constant 0 : index
    %c0_94 = arith.constant 0 : index
    %124 = vector.load %arg7[%c4_92, %c0_93, %c0_94] : memref<9x32x32xf32, #tpu.memory_space<vmem>>, vector<1x32x32xf32>
    %125 = vector.shape_cast %124 : vector<1x32x32xf32> to vector<32x32xf32>
    %cst_95 = arith.constant dense<0.000000e+00> : vector<16x32xf32>
    %126 = tpu.matmul %123, %125, %cst_95 {dimension_numbers = #tpu.dot_dimension_numbers<[1], [0], [0], [1], [0, 0, 1, 1], [], []>} : vector<16x32xf32>, vector<32x32xf32>, vector<16x32xf32> -> vector<16x32xf32>
    %127 = arith.addf %122, %126 : vector<16x32xf32>
    %128 = vector.extract_strided_slice %103 {offsets = [80, 0], sizes = [16, 32], strides = [1, 1]} : vector<144x32xf32> to vector<16x32xf32>
    %c5_96 = arith.constant 5 : index
    %c0_97 = arith.constant 0 : index
    %c0_98 = arith.constant 0 : index
    %129 = vector.load %arg7[%c5_96, %c0_97, %c0_98] : memref<9x32x32xf32, #tpu.memory_space<vmem>>, vector<1x32x32xf32>
    %130 = vector.shape_cast %129 : vector<1x32x32xf32> to vector<32x32xf32>
    %cst_99 = arith.constant dense<0.000000e+00> : vector<16x32xf32>
    %131 = tpu.matmul %128, %130, %cst_99 {dimension_numbers = #tpu.dot_dimension_numbers<[1], [0], [0], [1], [0, 0, 1, 1], [], []>} : vector<16x32xf32>, vector<32x32xf32>, vector<16x32xf32> -> vector<16x32xf32>
    %132 = arith.addf %127, %131 : vector<16x32xf32>
    %133 = vector.extract_strided_slice %103 {offsets = [96, 0], sizes = [16, 32], strides = [1, 1]} : vector<144x32xf32> to vector<16x32xf32>
    %c6_100 = arith.constant 6 : index
    %c0_101 = arith.constant 0 : index
    %c0_102 = arith.constant 0 : index
    %134 = vector.load %arg7[%c6_100, %c0_101, %c0_102] : memref<9x32x32xf32, #tpu.memory_space<vmem>>, vector<1x32x32xf32>
    %135 = vector.shape_cast %134 : vector<1x32x32xf32> to vector<32x32xf32>
    %cst_103 = arith.constant dense<0.000000e+00> : vector<16x32xf32>
    %136 = tpu.matmul %133, %135, %cst_103 {dimension_numbers = #tpu.dot_dimension_numbers<[1], [0], [0], [1], [0, 0, 1, 1], [], []>} : vector<16x32xf32>, vector<32x32xf32>, vector<16x32xf32> -> vector<16x32xf32>
    %137 = arith.addf %132, %136 : vector<16x32xf32>
    %138 = vector.extract_strided_slice %103 {offsets = [112, 0], sizes = [16, 32], strides = [1, 1]} : vector<144x32xf32> to vector<16x32xf32>
    %c7_104 = arith.constant 7 : index
    %c0_105 = arith.constant 0 : index
    %c0_106 = arith.constant 0 : index
    %139 = vector.load %arg7[%c7_104, %c0_105, %c0_106] : memref<9x32x32xf32, #tpu.memory_space<vmem>>, vector<1x32x32xf32>
    %140 = vector.shape_cast %139 : vector<1x32x32xf32> to vector<32x32xf32>
    %cst_107 = arith.constant dense<0.000000e+00> : vector<16x32xf32>
    %141 = tpu.matmul %138, %140, %cst_107 {dimension_numbers = #tpu.dot_dimension_numbers<[1], [0], [0], [1], [0, 0, 1, 1], [], []>} : vector<16x32xf32>, vector<32x32xf32>, vector<16x32xf32> -> vector<16x32xf32>
    %142 = arith.addf %137, %141 : vector<16x32xf32>
    %143 = vector.extract_strided_slice %103 {offsets = [128, 0], sizes = [16, 32], strides = [1, 1]} : vector<144x32xf32> to vector<16x32xf32>
    %c8_108 = arith.constant 8 : index
    %c0_109 = arith.constant 0 : index
    %c0_110 = arith.constant 0 : index
    %144 = vector.load %arg7[%c8_108, %c0_109, %c0_110] : memref<9x32x32xf32, #tpu.memory_space<vmem>>, vector<1x32x32xf32>
    %145 = vector.shape_cast %144 : vector<1x32x32xf32> to vector<32x32xf32>
    %cst_111 = arith.constant dense<0.000000e+00> : vector<16x32xf32>
    %146 = tpu.matmul %143, %145, %cst_111 {dimension_numbers = #tpu.dot_dimension_numbers<[1], [0], [0], [1], [0, 0, 1, 1], [], []>} : vector<16x32xf32>, vector<32x32xf32>, vector<16x32xf32> -> vector<16x32xf32>
    %147 = arith.addf %142, %146 : vector<16x32xf32>
    %c0_112 = arith.constant 0 : index
    %c0_113 = arith.constant 0 : index
    %148 = vector.load %arg8[%c0_112, %c0_113] : memref<1x32xf32, #tpu.memory_space<vmem>>, vector<1x32xf32>
    %149 = vector.broadcast %148 : vector<1x32xf32> to vector<16x32xf32>
    %150 = arith.addf %147, %149 : vector<16x32xf32>
    %cst_114 = arith.constant 0.000000e+00 : f32
    %151 = vector.broadcast %cst_114 : f32 to vector<16x32xf32>
    %152 = arith.maximumf %150, %151 : vector<16x32xf32>
    %cst_115 = arith.constant dense<0.000000e+00> : vector<144x32xf32>
    %153 = tpu.matmul %0, %152, %cst_115 {dimension_numbers = #tpu.dot_dimension_numbers<[1], [0], [0], [1], [0, 0, 1, 1], [], []>} : vector<144x16xf32>, vector<16x32xf32>, vector<144x32xf32> -> vector<144x32xf32>
    %154 = vector.extract_strided_slice %153 {offsets = [0, 0], sizes = [16, 32], strides = [1, 1]} : vector<144x32xf32> to vector<16x32xf32>
    %c0_116 = arith.constant 0 : index
    %c0_117 = arith.constant 0 : index
    %c0_118 = arith.constant 0 : index
    %155 = vector.load %arg9[%c0_116, %c0_117, %c0_118] : memref<9x32x8xf32, #tpu.memory_space<vmem>>, vector<1x32x8xf32>
    %156 = vector.shape_cast %155 : vector<1x32x8xf32> to vector<32x8xf32>
    %cst_119 = arith.constant dense<0.000000e+00> : vector<16x8xf32>
    %157 = tpu.matmul %154, %156, %cst_119 {dimension_numbers = #tpu.dot_dimension_numbers<[1], [0], [0], [1], [0, 0, 1, 1], [], []>} : vector<16x32xf32>, vector<32x8xf32>, vector<16x8xf32> -> vector<16x8xf32>
    %158 = vector.extract_strided_slice %153 {offsets = [16, 0], sizes = [16, 32], strides = [1, 1]} : vector<144x32xf32> to vector<16x32xf32>
    %c1_120 = arith.constant 1 : index
    %c0_121 = arith.constant 0 : index
    %c0_122 = arith.constant 0 : index
    %159 = vector.load %arg9[%c1_120, %c0_121, %c0_122] : memref<9x32x8xf32, #tpu.memory_space<vmem>>, vector<1x32x8xf32>
    %160 = vector.shape_cast %159 : vector<1x32x8xf32> to vector<32x8xf32>
    %cst_123 = arith.constant dense<0.000000e+00> : vector<16x8xf32>
    %161 = tpu.matmul %158, %160, %cst_123 {dimension_numbers = #tpu.dot_dimension_numbers<[1], [0], [0], [1], [0, 0, 1, 1], [], []>} : vector<16x32xf32>, vector<32x8xf32>, vector<16x8xf32> -> vector<16x8xf32>
    %162 = arith.addf %157, %161 : vector<16x8xf32>
    %163 = vector.extract_strided_slice %153 {offsets = [32, 0], sizes = [16, 32], strides = [1, 1]} : vector<144x32xf32> to vector<16x32xf32>
    %c2_124 = arith.constant 2 : index
    %c0_125 = arith.constant 0 : index
    %c0_126 = arith.constant 0 : index
    %164 = vector.load %arg9[%c2_124, %c0_125, %c0_126] : memref<9x32x8xf32, #tpu.memory_space<vmem>>, vector<1x32x8xf32>
    %165 = vector.shape_cast %164 : vector<1x32x8xf32> to vector<32x8xf32>
    %cst_127 = arith.constant dense<0.000000e+00> : vector<16x8xf32>
    %166 = tpu.matmul %163, %165, %cst_127 {dimension_numbers = #tpu.dot_dimension_numbers<[1], [0], [0], [1], [0, 0, 1, 1], [], []>} : vector<16x32xf32>, vector<32x8xf32>, vector<16x8xf32> -> vector<16x8xf32>
    %167 = arith.addf %162, %166 : vector<16x8xf32>
    %168 = vector.extract_strided_slice %153 {offsets = [48, 0], sizes = [16, 32], strides = [1, 1]} : vector<144x32xf32> to vector<16x32xf32>
    %c3_128 = arith.constant 3 : index
    %c0_129 = arith.constant 0 : index
    %c0_130 = arith.constant 0 : index
    %169 = vector.load %arg9[%c3_128, %c0_129, %c0_130] : memref<9x32x8xf32, #tpu.memory_space<vmem>>, vector<1x32x8xf32>
    %170 = vector.shape_cast %169 : vector<1x32x8xf32> to vector<32x8xf32>
    %cst_131 = arith.constant dense<0.000000e+00> : vector<16x8xf32>
    %171 = tpu.matmul %168, %170, %cst_131 {dimension_numbers = #tpu.dot_dimension_numbers<[1], [0], [0], [1], [0, 0, 1, 1], [], []>} : vector<16x32xf32>, vector<32x8xf32>, vector<16x8xf32> -> vector<16x8xf32>
    %172 = arith.addf %167, %171 : vector<16x8xf32>
    %173 = vector.extract_strided_slice %153 {offsets = [64, 0], sizes = [16, 32], strides = [1, 1]} : vector<144x32xf32> to vector<16x32xf32>
    %c4_132 = arith.constant 4 : index
    %c0_133 = arith.constant 0 : index
    %c0_134 = arith.constant 0 : index
    %174 = vector.load %arg9[%c4_132, %c0_133, %c0_134] : memref<9x32x8xf32, #tpu.memory_space<vmem>>, vector<1x32x8xf32>
    %175 = vector.shape_cast %174 : vector<1x32x8xf32> to vector<32x8xf32>
    %cst_135 = arith.constant dense<0.000000e+00> : vector<16x8xf32>
    %176 = tpu.matmul %173, %175, %cst_135 {dimension_numbers = #tpu.dot_dimension_numbers<[1], [0], [0], [1], [0, 0, 1, 1], [], []>} : vector<16x32xf32>, vector<32x8xf32>, vector<16x8xf32> -> vector<16x8xf32>
    %177 = arith.addf %172, %176 : vector<16x8xf32>
    %178 = vector.extract_strided_slice %153 {offsets = [80, 0], sizes = [16, 32], strides = [1, 1]} : vector<144x32xf32> to vector<16x32xf32>
    %c5_136 = arith.constant 5 : index
    %c0_137 = arith.constant 0 : index
    %c0_138 = arith.constant 0 : index
    %179 = vector.load %arg9[%c5_136, %c0_137, %c0_138] : memref<9x32x8xf32, #tpu.memory_space<vmem>>, vector<1x32x8xf32>
    %180 = vector.shape_cast %179 : vector<1x32x8xf32> to vector<32x8xf32>
    %cst_139 = arith.constant dense<0.000000e+00> : vector<16x8xf32>
    %181 = tpu.matmul %178, %180, %cst_139 {dimension_numbers = #tpu.dot_dimension_numbers<[1], [0], [0], [1], [0, 0, 1, 1], [], []>} : vector<16x32xf32>, vector<32x8xf32>, vector<16x8xf32> -> vector<16x8xf32>
    %182 = arith.addf %177, %181 : vector<16x8xf32>
    %183 = vector.extract_strided_slice %153 {offsets = [96, 0], sizes = [16, 32], strides = [1, 1]} : vector<144x32xf32> to vector<16x32xf32>
    %c6_140 = arith.constant 6 : index
    %c0_141 = arith.constant 0 : index
    %c0_142 = arith.constant 0 : index
    %184 = vector.load %arg9[%c6_140, %c0_141, %c0_142] : memref<9x32x8xf32, #tpu.memory_space<vmem>>, vector<1x32x8xf32>
    %185 = vector.shape_cast %184 : vector<1x32x8xf32> to vector<32x8xf32>
    %cst_143 = arith.constant dense<0.000000e+00> : vector<16x8xf32>
    %186 = tpu.matmul %183, %185, %cst_143 {dimension_numbers = #tpu.dot_dimension_numbers<[1], [0], [0], [1], [0, 0, 1, 1], [], []>} : vector<16x32xf32>, vector<32x8xf32>, vector<16x8xf32> -> vector<16x8xf32>
    %187 = arith.addf %182, %186 : vector<16x8xf32>
    %188 = vector.extract_strided_slice %153 {offsets = [112, 0], sizes = [16, 32], strides = [1, 1]} : vector<144x32xf32> to vector<16x32xf32>
    %c7_144 = arith.constant 7 : index
    %c0_145 = arith.constant 0 : index
    %c0_146 = arith.constant 0 : index
    %189 = vector.load %arg9[%c7_144, %c0_145, %c0_146] : memref<9x32x8xf32, #tpu.memory_space<vmem>>, vector<1x32x8xf32>
    %190 = vector.shape_cast %189 : vector<1x32x8xf32> to vector<32x8xf32>
    %cst_147 = arith.constant dense<0.000000e+00> : vector<16x8xf32>
    %191 = tpu.matmul %188, %190, %cst_147 {dimension_numbers = #tpu.dot_dimension_numbers<[1], [0], [0], [1], [0, 0, 1, 1], [], []>} : vector<16x32xf32>, vector<32x8xf32>, vector<16x8xf32> -> vector<16x8xf32>
    %192 = arith.addf %187, %191 : vector<16x8xf32>
    %193 = vector.extract_strided_slice %153 {offsets = [128, 0], sizes = [16, 32], strides = [1, 1]} : vector<144x32xf32> to vector<16x32xf32>
    %c8_148 = arith.constant 8 : index
    %c0_149 = arith.constant 0 : index
    %c0_150 = arith.constant 0 : index
    %194 = vector.load %arg9[%c8_148, %c0_149, %c0_150] : memref<9x32x8xf32, #tpu.memory_space<vmem>>, vector<1x32x8xf32>
    %195 = vector.shape_cast %194 : vector<1x32x8xf32> to vector<32x8xf32>
    %cst_151 = arith.constant dense<0.000000e+00> : vector<16x8xf32>
    %196 = tpu.matmul %193, %195, %cst_151 {dimension_numbers = #tpu.dot_dimension_numbers<[1], [0], [0], [1], [0, 0, 1, 1], [], []>} : vector<16x32xf32>, vector<32x8xf32>, vector<16x8xf32> -> vector<16x8xf32>
    %197 = arith.addf %192, %196 : vector<16x8xf32>
    %cst_152 = arith.constant 0.000000e+00 : f32
    %198 = vector.broadcast %cst_152 : f32 to vector<16x8xf32>
    %199 = arith.maximumf %197, %198 : vector<16x8xf32>
    %c0_153 = arith.constant 0 : index
    %c0_154 = arith.constant 0 : index
    %200 = vector.load %arg10[%c0_153, %c0_154] : memref<8x32xf32, #tpu.memory_space<vmem>>, vector<8x32xf32>
    %cst_155 = arith.constant dense<0.000000e+00> : vector<16x32xf32>
    %201 = tpu.matmul %199, %200, %cst_155 {dimension_numbers = #tpu.dot_dimension_numbers<[1], [0], [0], [1], [0, 0, 1, 1], [], []>} : vector<16x8xf32>, vector<8x32xf32>, vector<16x32xf32> -> vector<16x32xf32>
    %202 = arith.addf %150, %201 : vector<16x32xf32>
    %cst_156 = arith.constant 0.000000e+00 : f32
    %203 = vector.broadcast %cst_156 : f32 to vector<16x32xf32>
    %204 = arith.maximumf %202, %203 : vector<16x32xf32>
    %cst_157 = arith.constant dense<0.000000e+00> : vector<144x32xf32>
    %205 = tpu.matmul %0, %204, %cst_157 {dimension_numbers = #tpu.dot_dimension_numbers<[1], [0], [0], [1], [0, 0, 1, 1], [], []>} : vector<144x16xf32>, vector<16x32xf32>, vector<144x32xf32> -> vector<144x32xf32>
    %206 = vector.extract_strided_slice %205 {offsets = [0, 0], sizes = [16, 32], strides = [1, 1]} : vector<144x32xf32> to vector<16x32xf32>
    %c0_158 = arith.constant 0 : index
    %c0_159 = arith.constant 0 : index
    %c0_160 = arith.constant 0 : index
    %207 = vector.load %arg11[%c0_158, %c0_159, %c0_160] : memref<9x32x8xf32, #tpu.memory_space<vmem>>, vector<1x32x8xf32>
    %208 = vector.shape_cast %207 : vector<1x32x8xf32> to vector<32x8xf32>
    %cst_161 = arith.constant dense<0.000000e+00> : vector<16x8xf32>
    %209 = tpu.matmul %206, %208, %cst_161 {dimension_numbers = #tpu.dot_dimension_numbers<[1], [0], [0], [1], [0, 0, 1, 1], [], []>} : vector<16x32xf32>, vector<32x8xf32>, vector<16x8xf32> -> vector<16x8xf32>
    %210 = vector.extract_strided_slice %205 {offsets = [16, 0], sizes = [16, 32], strides = [1, 1]} : vector<144x32xf32> to vector<16x32xf32>
    %c1_162 = arith.constant 1 : index
    %c0_163 = arith.constant 0 : index
    %c0_164 = arith.constant 0 : index
    %211 = vector.load %arg11[%c1_162, %c0_163, %c0_164] : memref<9x32x8xf32, #tpu.memory_space<vmem>>, vector<1x32x8xf32>
    %212 = vector.shape_cast %211 : vector<1x32x8xf32> to vector<32x8xf32>
    %cst_165 = arith.constant dense<0.000000e+00> : vector<16x8xf32>
    %213 = tpu.matmul %210, %212, %cst_165 {dimension_numbers = #tpu.dot_dimension_numbers<[1], [0], [0], [1], [0, 0, 1, 1], [], []>} : vector<16x32xf32>, vector<32x8xf32>, vector<16x8xf32> -> vector<16x8xf32>
    %214 = arith.addf %209, %213 : vector<16x8xf32>
    %215 = vector.extract_strided_slice %205 {offsets = [32, 0], sizes = [16, 32], strides = [1, 1]} : vector<144x32xf32> to vector<16x32xf32>
    %c2_166 = arith.constant 2 : index
    %c0_167 = arith.constant 0 : index
    %c0_168 = arith.constant 0 : index
    %216 = vector.load %arg11[%c2_166, %c0_167, %c0_168] : memref<9x32x8xf32, #tpu.memory_space<vmem>>, vector<1x32x8xf32>
    %217 = vector.shape_cast %216 : vector<1x32x8xf32> to vector<32x8xf32>
    %cst_169 = arith.constant dense<0.000000e+00> : vector<16x8xf32>
    %218 = tpu.matmul %215, %217, %cst_169 {dimension_numbers = #tpu.dot_dimension_numbers<[1], [0], [0], [1], [0, 0, 1, 1], [], []>} : vector<16x32xf32>, vector<32x8xf32>, vector<16x8xf32> -> vector<16x8xf32>
    %219 = arith.addf %214, %218 : vector<16x8xf32>
    %220 = vector.extract_strided_slice %205 {offsets = [48, 0], sizes = [16, 32], strides = [1, 1]} : vector<144x32xf32> to vector<16x32xf32>
    %c3_170 = arith.constant 3 : index
    %c0_171 = arith.constant 0 : index
    %c0_172 = arith.constant 0 : index
    %221 = vector.load %arg11[%c3_170, %c0_171, %c0_172] : memref<9x32x8xf32, #tpu.memory_space<vmem>>, vector<1x32x8xf32>
    %222 = vector.shape_cast %221 : vector<1x32x8xf32> to vector<32x8xf32>
    %cst_173 = arith.constant dense<0.000000e+00> : vector<16x8xf32>
    %223 = tpu.matmul %220, %222, %cst_173 {dimension_numbers = #tpu.dot_dimension_numbers<[1], [0], [0], [1], [0, 0, 1, 1], [], []>} : vector<16x32xf32>, vector<32x8xf32>, vector<16x8xf32> -> vector<16x8xf32>
    %224 = arith.addf %219, %223 : vector<16x8xf32>
    %225 = vector.extract_strided_slice %205 {offsets = [64, 0], sizes = [16, 32], strides = [1, 1]} : vector<144x32xf32> to vector<16x32xf32>
    %c4_174 = arith.constant 4 : index
    %c0_175 = arith.constant 0 : index
    %c0_176 = arith.constant 0 : index
    %226 = vector.load %arg11[%c4_174, %c0_175, %c0_176] : memref<9x32x8xf32, #tpu.memory_space<vmem>>, vector<1x32x8xf32>
    %227 = vector.shape_cast %226 : vector<1x32x8xf32> to vector<32x8xf32>
    %cst_177 = arith.constant dense<0.000000e+00> : vector<16x8xf32>
    %228 = tpu.matmul %225, %227, %cst_177 {dimension_numbers = #tpu.dot_dimension_numbers<[1], [0], [0], [1], [0, 0, 1, 1], [], []>} : vector<16x32xf32>, vector<32x8xf32>, vector<16x8xf32> -> vector<16x8xf32>
    %229 = arith.addf %224, %228 : vector<16x8xf32>
    %230 = vector.extract_strided_slice %205 {offsets = [80, 0], sizes = [16, 32], strides = [1, 1]} : vector<144x32xf32> to vector<16x32xf32>
    %c5_178 = arith.constant 5 : index
    %c0_179 = arith.constant 0 : index
    %c0_180 = arith.constant 0 : index
    %231 = vector.load %arg11[%c5_178, %c0_179, %c0_180] : memref<9x32x8xf32, #tpu.memory_space<vmem>>, vector<1x32x8xf32>
    %232 = vector.shape_cast %231 : vector<1x32x8xf32> to vector<32x8xf32>
    %cst_181 = arith.constant dense<0.000000e+00> : vector<16x8xf32>
    %233 = tpu.matmul %230, %232, %cst_181 {dimension_numbers = #tpu.dot_dimension_numbers<[1], [0], [0], [1], [0, 0, 1, 1], [], []>} : vector<16x32xf32>, vector<32x8xf32>, vector<16x8xf32> -> vector<16x8xf32>
    %234 = arith.addf %229, %233 : vector<16x8xf32>
    %235 = vector.extract_strided_slice %205 {offsets = [96, 0], sizes = [16, 32], strides = [1, 1]} : vector<144x32xf32> to vector<16x32xf32>
    %c6_182 = arith.constant 6 : index
    %c0_183 = arith.constant 0 : index
    %c0_184 = arith.constant 0 : index
    %236 = vector.load %arg11[%c6_182, %c0_183, %c0_184] : memref<9x32x8xf32, #tpu.memory_space<vmem>>, vector<1x32x8xf32>
    %237 = vector.shape_cast %236 : vector<1x32x8xf32> to vector<32x8xf32>
    %cst_185 = arith.constant dense<0.000000e+00> : vector<16x8xf32>
    %238 = tpu.matmul %235, %237, %cst_185 {dimension_numbers = #tpu.dot_dimension_numbers<[1], [0], [0], [1], [0, 0, 1, 1], [], []>} : vector<16x32xf32>, vector<32x8xf32>, vector<16x8xf32> -> vector<16x8xf32>
    %239 = arith.addf %234, %238 : vector<16x8xf32>
    %240 = vector.extract_strided_slice %205 {offsets = [112, 0], sizes = [16, 32], strides = [1, 1]} : vector<144x32xf32> to vector<16x32xf32>
    %c7_186 = arith.constant 7 : index
    %c0_187 = arith.constant 0 : index
    %c0_188 = arith.constant 0 : index
    %241 = vector.load %arg11[%c7_186, %c0_187, %c0_188] : memref<9x32x8xf32, #tpu.memory_space<vmem>>, vector<1x32x8xf32>
    %242 = vector.shape_cast %241 : vector<1x32x8xf32> to vector<32x8xf32>
    %cst_189 = arith.constant dense<0.000000e+00> : vector<16x8xf32>
    %243 = tpu.matmul %240, %242, %cst_189 {dimension_numbers = #tpu.dot_dimension_numbers<[1], [0], [0], [1], [0, 0, 1, 1], [], []>} : vector<16x32xf32>, vector<32x8xf32>, vector<16x8xf32> -> vector<16x8xf32>
    %244 = arith.addf %239, %243 : vector<16x8xf32>
    %245 = vector.extract_strided_slice %205 {offsets = [128, 0], sizes = [16, 32], strides = [1, 1]} : vector<144x32xf32> to vector<16x32xf32>
    %c8_190 = arith.constant 8 : index
    %c0_191 = arith.constant 0 : index
    %c0_192 = arith.constant 0 : index
    %246 = vector.load %arg11[%c8_190, %c0_191, %c0_192] : memref<9x32x8xf32, #tpu.memory_space<vmem>>, vector<1x32x8xf32>
    %247 = vector.shape_cast %246 : vector<1x32x8xf32> to vector<32x8xf32>
    %cst_193 = arith.constant dense<0.000000e+00> : vector<16x8xf32>
    %248 = tpu.matmul %245, %247, %cst_193 {dimension_numbers = #tpu.dot_dimension_numbers<[1], [0], [0], [1], [0, 0, 1, 1], [], []>} : vector<16x32xf32>, vector<32x8xf32>, vector<16x8xf32> -> vector<16x8xf32>
    %249 = arith.addf %244, %248 : vector<16x8xf32>
    %cst_194 = arith.constant 0.000000e+00 : f32
    %250 = vector.broadcast %cst_194 : f32 to vector<16x8xf32>
    %251 = arith.maximumf %249, %250 : vector<16x8xf32>
    %c0_195 = arith.constant 0 : index
    %c0_196 = arith.constant 0 : index
    %252 = vector.load %arg12[%c0_195, %c0_196] : memref<8x32xf32, #tpu.memory_space<vmem>>, vector<8x32xf32>
    %cst_197 = arith.constant dense<0.000000e+00> : vector<16x32xf32>
    %253 = tpu.matmul %251, %252, %cst_197 {dimension_numbers = #tpu.dot_dimension_numbers<[1], [0], [0], [1], [0, 0, 1, 1], [], []>} : vector<16x8xf32>, vector<8x32xf32>, vector<16x32xf32> -> vector<16x32xf32>
    %254 = arith.addf %202, %253 : vector<16x32xf32>
    %cst_198 = arith.constant 0.000000e+00 : f32
    %255 = vector.broadcast %cst_198 : f32 to vector<16x32xf32>
    %256 = arith.maximumf %254, %255 : vector<16x32xf32>
    %c0_199 = arith.constant 0 : index
    %c0_200 = arith.constant 0 : index
    %257 = vector.load %arg13[%c0_199, %c0_200] : memref<32x8xf32, #tpu.memory_space<vmem>>, vector<32x8xf32>
    %cst_201 = arith.constant dense<0.000000e+00> : vector<16x8xf32>
    %258 = tpu.matmul %256, %257, %cst_201 {dimension_numbers = #tpu.dot_dimension_numbers<[1], [0], [0], [1], [0, 0, 1, 1], [], []>} : vector<16x32xf32>, vector<32x8xf32>, vector<16x8xf32> -> vector<16x8xf32>
    %c0_202 = arith.constant 0 : index
    %c0_203 = arith.constant 0 : index
    %259 = vector.load %arg14[%c0_202, %c0_203] : memref<1x8xf32, #tpu.memory_space<vmem>>, vector<1x8xf32>
    %260 = vector.broadcast %259 : vector<1x8xf32> to vector<16x8xf32>
    %261 = arith.addf %258, %260 : vector<16x8xf32>
    %c0_204 = arith.constant 0 : index
    %c0_205 = arith.constant 0 : index
    %262 = vector.load %arg15[%c0_204, %c0_205] : memref<16x8xf32, #tpu.memory_space<vmem>>, vector<16x8xf32>
    %cst_206 = arith.constant dense<0.000000e+00> : vector<16x16xf32>
    %263 = tpu.matmul %261, %262, %cst_206 {dimension_numbers = #tpu.dot_dimension_numbers<[1], [1], [0], [0], [0, 0, 1, 0], [], []>} : vector<16x8xf32>, vector<16x8xf32>, vector<16x16xf32> -> vector<16x16xf32>
    %c0_207 = arith.constant 0 : index
    %c0_208 = arith.constant 0 : index
    %264 = vector.load %arg16[%c0_207, %c0_208] : memref<1x16xf32, #tpu.memory_space<vmem>>, vector<1x16xf32>
    %cst_209 = arith.constant 2.000000e+00 : f32
    %265 = vector.broadcast %cst_209 : f32 to vector<16x16xf32>
    %266 = arith.mulf %265, %263 : vector<16x16xf32>
    %267 = vector.broadcast %264 : vector<1x16xf32> to vector<16x16xf32>
    %268 = arith.subf %267, %266 : vector<16x16xf32>
    %cst_210 = arith.constant dense<0x7F800000> : vector<16xf32>
    %269 = vector.multi_reduction <minimumf>, %268, %cst_210 [1] : vector<16x16xf32> to vector<16xf32>
    %270 = vector.shape_cast %269 : vector<16xf32> to vector<16x1xf32>
    %271 = tpu.iota {dimensions = array<i32: 1>} : vector<16x16xi32>
    %272 = vector.broadcast %270 : vector<16x1xf32> to vector<16x16xf32>
    %273 = arith.cmpf ole, %268, %272 : vector<16x16xf32>
    %c16_i32 = arith.constant 16 : i32
    %274 = vector.broadcast %c16_i32 : i32 to vector<16x16xi32>
    %275 = arith.select %273, %271, %274 : vector<16x16xi1>, vector<16x16xi32>
    %cst_211 = arith.constant dense<2147483647> : vector<16xi32>
    %276 = vector.multi_reduction <minsi>, %275, %cst_211 [1] : vector<16x16xi32> to vector<16xi32>
    %277 = vector.shape_cast %276 : vector<16xi32> to vector<16x1xi32>
    %278 = vector.broadcast %277 : vector<16x1xi32> to vector<16x16xi32>
    %279 = arith.cmpi eq, %271, %278 : vector<16x16xi32>
    %280 = arith.extui %279 : vector<16x16xi1> to vector<16x16xi32>
    %281 = arith.sitofp %280 : vector<16x16xi32> to vector<16x16xf32>
    %cst_212 = arith.constant dense<0.000000e+00> : vector<16x8xf32>
    %282 = tpu.matmul %281, %262, %cst_212 {dimension_numbers = #tpu.dot_dimension_numbers<[1], [0], [0], [1], [0, 0, 1, 1], [], []>} : vector<16x16xf32>, vector<16x8xf32>, vector<16x8xf32> -> vector<16x8xf32>
    %c0_213 = arith.constant 0 : index
    %c0_214 = arith.constant 0 : index
    %c0_215 = arith.constant 0 : index
    %283 = vector.load %arg28[%c0_213, %c0_214, %c0_215] : memref<1x16x8xf32, #tpu.memory_space<vmem>>, vector<1x16x8xf32>
    %284 = vector.shape_cast %283 : vector<1x16x8xf32> to vector<16x8xf32>
    %285 = vector.shape_cast %261 : vector<16x8xf32> to vector<1x16x8xf32>
    tpu.vector_store %arg28[%c0_213, %c0_214, %c0_215], %285 {strides = array<i32>} : memref<1x16x8xf32, #tpu.memory_space<vmem>>, vector<1x16x8xf32>,
    %c0_216 = arith.constant 0 : index
    %c0_217 = arith.constant 0 : index
    %c0_218 = arith.constant 0 : index
    %286 = vector.load %arg29[%c0_216, %c0_217, %c0_218] : memref<1x16x1xi32, #tpu.memory_space<vmem>>, vector<1x16x1xi32>
    %287 = vector.shape_cast %286 : vector<1x16x1xi32> to vector<16x1xi32>
    %288 = vector.shape_cast %277 : vector<16x1xi32> to vector<1x16x1xi32>
    tpu.vector_store %arg29[%c0_216, %c0_217, %c0_218], %288 {strides = array<i32>} : memref<1x16x1xi32, #tpu.memory_space<vmem>>, vector<1x16x1xi32>,
    %cst_219 = arith.constant dense<0.000000e+00> : vector<144x8xf32>
    %289 = tpu.matmul %0, %282, %cst_219 {dimension_numbers = #tpu.dot_dimension_numbers<[1], [0], [0], [1], [0, 0, 1, 1], [], []>} : vector<144x16xf32>, vector<16x8xf32>, vector<144x8xf32> -> vector<144x8xf32>
    %290 = vector.extract_strided_slice %289 {offsets = [0, 0], sizes = [16, 8], strides = [1, 1]} : vector<144x8xf32> to vector<16x8xf32>
    %c0_220 = arith.constant 0 : index
    %c0_221 = arith.constant 0 : index
    %c0_222 = arith.constant 0 : index
    %291 = vector.load %arg17[%c0_220, %c0_221, %c0_222] : memref<9x8x32xf32, #tpu.memory_space<vmem>>, vector<1x8x32xf32>
    %292 = vector.shape_cast %291 : vector<1x8x32xf32> to vector<8x32xf32>
    %cst_223 = arith.constant dense<0.000000e+00> : vector<16x32xf32>
    %293 = tpu.matmul %290, %292, %cst_223 {dimension_numbers = #tpu.dot_dimension_numbers<[1], [0], [0], [1], [0, 0, 1, 1], [], []>} : vector<16x8xf32>, vector<8x32xf32>, vector<16x32xf32> -> vector<16x32xf32>
    %294 = vector.extract_strided_slice %289 {offsets = [16, 0], sizes = [16, 8], strides = [1, 1]} : vector<144x8xf32> to vector<16x8xf32>
    %c1_224 = arith.constant 1 : index
    %c0_225 = arith.constant 0 : index
    %c0_226 = arith.constant 0 : index
    %295 = vector.load %arg17[%c1_224, %c0_225, %c0_226] : memref<9x8x32xf32, #tpu.memory_space<vmem>>, vector<1x8x32xf32>
    %296 = vector.shape_cast %295 : vector<1x8x32xf32> to vector<8x32xf32>
    %cst_227 = arith.constant dense<0.000000e+00> : vector<16x32xf32>
    %297 = tpu.matmul %294, %296, %cst_227 {dimension_numbers = #tpu.dot_dimension_numbers<[1], [0], [0], [1], [0, 0, 1, 1], [], []>} : vector<16x8xf32>, vector<8x32xf32>, vector<16x32xf32> -> vector<16x32xf32>
    %298 = arith.addf %293, %297 : vector<16x32xf32>
    %299 = vector.extract_strided_slice %289 {offsets = [32, 0], sizes = [16, 8], strides = [1, 1]} : vector<144x8xf32> to vector<16x8xf32>
    %c2_228 = arith.constant 2 : index
    %c0_229 = arith.constant 0 : index
    %c0_230 = arith.constant 0 : index
    %300 = vector.load %arg17[%c2_228, %c0_229, %c0_230] : memref<9x8x32xf32, #tpu.memory_space<vmem>>, vector<1x8x32xf32>
    %301 = vector.shape_cast %300 : vector<1x8x32xf32> to vector<8x32xf32>
    %cst_231 = arith.constant dense<0.000000e+00> : vector<16x32xf32>
    %302 = tpu.matmul %299, %301, %cst_231 {dimension_numbers = #tpu.dot_dimension_numbers<[1], [0], [0], [1], [0, 0, 1, 1], [], []>} : vector<16x8xf32>, vector<8x32xf32>, vector<16x32xf32> -> vector<16x32xf32>
    %303 = arith.addf %298, %302 : vector<16x32xf32>
    %304 = vector.extract_strided_slice %289 {offsets = [48, 0], sizes = [16, 8], strides = [1, 1]} : vector<144x8xf32> to vector<16x8xf32>
    %c3_232 = arith.constant 3 : index
    %c0_233 = arith.constant 0 : index
    %c0_234 = arith.constant 0 : index
    %305 = vector.load %arg17[%c3_232, %c0_233, %c0_234] : memref<9x8x32xf32, #tpu.memory_space<vmem>>, vector<1x8x32xf32>
    %306 = vector.shape_cast %305 : vector<1x8x32xf32> to vector<8x32xf32>
    %cst_235 = arith.constant dense<0.000000e+00> : vector<16x32xf32>
    %307 = tpu.matmul %304, %306, %cst_235 {dimension_numbers = #tpu.dot_dimension_numbers<[1], [0], [0], [1], [0, 0, 1, 1], [], []>} : vector<16x8xf32>, vector<8x32xf32>, vector<16x32xf32> -> vector<16x32xf32>
    %308 = arith.addf %303, %307 : vector<16x32xf32>
    %309 = vector.extract_strided_slice %289 {offsets = [64, 0], sizes = [16, 8], strides = [1, 1]} : vector<144x8xf32> to vector<16x8xf32>
    %c4_236 = arith.constant 4 : index
    %c0_237 = arith.constant 0 : index
    %c0_238 = arith.constant 0 : index
    %310 = vector.load %arg17[%c4_236, %c0_237, %c0_238] : memref<9x8x32xf32, #tpu.memory_space<vmem>>, vector<1x8x32xf32>
    %311 = vector.shape_cast %310 : vector<1x8x32xf32> to vector<8x32xf32>
    %cst_239 = arith.constant dense<0.000000e+00> : vector<16x32xf32>
    %312 = tpu.matmul %309, %311, %cst_239 {dimension_numbers = #tpu.dot_dimension_numbers<[1], [0], [0], [1], [0, 0, 1, 1], [], []>} : vector<16x8xf32>, vector<8x32xf32>, vector<16x32xf32> -> vector<16x32xf32>
    %313 = arith.addf %308, %312 : vector<16x32xf32>
    %314 = vector.extract_strided_slice %289 {offsets = [80, 0], sizes = [16, 8], strides = [1, 1]} : vector<144x8xf32> to vector<16x8xf32>
    %c5_240 = arith.constant 5 : index
    %c0_241 = arith.constant 0 : index
    %c0_242 = arith.constant 0 : index
    %315 = vector.load %arg17[%c5_240, %c0_241, %c0_242] : memref<9x8x32xf32, #tpu.memory_space<vmem>>, vector<1x8x32xf32>
    %316 = vector.shape_cast %315 : vector<1x8x32xf32> to vector<8x32xf32>
    %cst_243 = arith.constant dense<0.000000e+00> : vector<16x32xf32>
    %317 = tpu.matmul %314, %316, %cst_243 {dimension_numbers = #tpu.dot_dimension_numbers<[1], [0], [0], [1], [0, 0, 1, 1], [], []>} : vector<16x8xf32>, vector<8x32xf32>, vector<16x32xf32> -> vector<16x32xf32>
    %318 = arith.addf %313, %317 : vector<16x32xf32>
    %319 = vector.extract_strided_slice %289 {offsets = [96, 0], sizes = [16, 8], strides = [1, 1]} : vector<144x8xf32> to vector<16x8xf32>
    %c6_244 = arith.constant 6 : index
    %c0_245 = arith.constant 0 : index
    %c0_246 = arith.constant 0 : index
    %320 = vector.load %arg17[%c6_244, %c0_245, %c0_246] : memref<9x8x32xf32, #tpu.memory_space<vmem>>, vector<1x8x32xf32>
    %321 = vector.shape_cast %320 : vector<1x8x32xf32> to vector<8x32xf32>
    %cst_247 = arith.constant dense<0.000000e+00> : vector<16x32xf32>
    %322 = tpu.matmul %319, %321, %cst_247 {dimension_numbers = #tpu.dot_dimension_numbers<[1], [0], [0], [1], [0, 0, 1, 1], [], []>} : vector<16x8xf32>, vector<8x32xf32>, vector<16x32xf32> -> vector<16x32xf32>
    %323 = arith.addf %318, %322 : vector<16x32xf32>
    %324 = vector.extract_strided_slice %289 {offsets = [112, 0], sizes = [16, 8], strides = [1, 1]} : vector<144x8xf32> to vector<16x8xf32>
    %c7_248 = arith.constant 7 : index
    %c0_249 = arith.constant 0 : index
    %c0_250 = arith.constant 0 : index
    %325 = vector.load %arg17[%c7_248, %c0_249, %c0_250] : memref<9x8x32xf32, #tpu.memory_space<vmem>>, vector<1x8x32xf32>
    %326 = vector.shape_cast %325 : vector<1x8x32xf32> to vector<8x32xf32>
    %cst_251 = arith.constant dense<0.000000e+00> : vector<16x32xf32>
    %327 = tpu.matmul %324, %326, %cst_251 {dimension_numbers = #tpu.dot_dimension_numbers<[1], [0], [0], [1], [0, 0, 1, 1], [], []>} : vector<16x8xf32>, vector<8x32xf32>, vector<16x32xf32> -> vector<16x32xf32>
    %328 = arith.addf %323, %327 : vector<16x32xf32>
    %329 = vector.extract_strided_slice %289 {offsets = [128, 0], sizes = [16, 8], strides = [1, 1]} : vector<144x8xf32> to vector<16x8xf32>
    %c8_252 = arith.constant 8 : index
    %c0_253 = arith.constant 0 : index
    %c0_254 = arith.constant 0 : index
    %330 = vector.load %arg17[%c8_252, %c0_253, %c0_254] : memref<9x8x32xf32, #tpu.memory_space<vmem>>, vector<1x8x32xf32>
    %331 = vector.shape_cast %330 : vector<1x8x32xf32> to vector<8x32xf32>
    %cst_255 = arith.constant dense<0.000000e+00> : vector<16x32xf32>
    %332 = tpu.matmul %329, %331, %cst_255 {dimension_numbers = #tpu.dot_dimension_numbers<[1], [0], [0], [1], [0, 0, 1, 1], [], []>} : vector<16x8xf32>, vector<8x32xf32>, vector<16x32xf32> -> vector<16x32xf32>
    %333 = arith.addf %328, %332 : vector<16x32xf32>
    %c0_256 = arith.constant 0 : index
    %c0_257 = arith.constant 0 : index
    %334 = vector.load %arg18[%c0_256, %c0_257] : memref<1x32xf32, #tpu.memory_space<vmem>>, vector<1x32xf32>
    %335 = vector.broadcast %334 : vector<1x32xf32> to vector<16x32xf32>
    %336 = arith.addf %333, %335 : vector<16x32xf32>
    %cst_258 = arith.constant 0.000000e+00 : f32
    %337 = vector.broadcast %cst_258 : f32 to vector<16x32xf32>
    %338 = arith.maximumf %336, %337 : vector<16x32xf32>
    %cst_259 = arith.constant dense<0.000000e+00> : vector<144x32xf32>
    %339 = tpu.matmul %0, %338, %cst_259 {dimension_numbers = #tpu.dot_dimension_numbers<[1], [0], [0], [1], [0, 0, 1, 1], [], []>} : vector<144x16xf32>, vector<16x32xf32>, vector<144x32xf32> -> vector<144x32xf32>
    %340 = vector.extract_strided_slice %339 {offsets = [0, 0], sizes = [16, 32], strides = [1, 1]} : vector<144x32xf32> to vector<16x32xf32>
    %c0_260 = arith.constant 0 : index
    %c0_261 = arith.constant 0 : index
    %c0_262 = arith.constant 0 : index
    %341 = vector.load %arg19[%c0_260, %c0_261, %c0_262] : memref<9x32x8xf32, #tpu.memory_space<vmem>>, vector<1x32x8xf32>
    %342 = vector.shape_cast %341 : vector<1x32x8xf32> to vector<32x8xf32>
    %cst_263 = arith.constant dense<0.000000e+00> : vector<16x8xf32>
    %343 = tpu.matmul %340, %342, %cst_263 {dimension_numbers = #tpu.dot_dimension_numbers<[1], [0], [0], [1], [0, 0, 1, 1], [], []>} : vector<16x32xf32>, vector<32x8xf32>, vector<16x8xf32> -> vector<16x8xf32>
    %344 = vector.extract_strided_slice %339 {offsets = [16, 0], sizes = [16, 32], strides = [1, 1]} : vector<144x32xf32> to vector<16x32xf32>
    %c1_264 = arith.constant 1 : index
    %c0_265 = arith.constant 0 : index
    %c0_266 = arith.constant 0 : index
    %345 = vector.load %arg19[%c1_264, %c0_265, %c0_266] : memref<9x32x8xf32, #tpu.memory_space<vmem>>, vector<1x32x8xf32>
    %346 = vector.shape_cast %345 : vector<1x32x8xf32> to vector<32x8xf32>
    %cst_267 = arith.constant dense<0.000000e+00> : vector<16x8xf32>
    %347 = tpu.matmul %344, %346, %cst_267 {dimension_numbers = #tpu.dot_dimension_numbers<[1], [0], [0], [1], [0, 0, 1, 1], [], []>} : vector<16x32xf32>, vector<32x8xf32>, vector<16x8xf32> -> vector<16x8xf32>
    %348 = arith.addf %343, %347 : vector<16x8xf32>
    %349 = vector.extract_strided_slice %339 {offsets = [32, 0], sizes = [16, 32], strides = [1, 1]} : vector<144x32xf32> to vector<16x32xf32>
    %c2_268 = arith.constant 2 : index
    %c0_269 = arith.constant 0 : index
    %c0_270 = arith.constant 0 : index
    %350 = vector.load %arg19[%c2_268, %c0_269, %c0_270] : memref<9x32x8xf32, #tpu.memory_space<vmem>>, vector<1x32x8xf32>
    %351 = vector.shape_cast %350 : vector<1x32x8xf32> to vector<32x8xf32>
    %cst_271 = arith.constant dense<0.000000e+00> : vector<16x8xf32>
    %352 = tpu.matmul %349, %351, %cst_271 {dimension_numbers = #tpu.dot_dimension_numbers<[1], [0], [0], [1], [0, 0, 1, 1], [], []>} : vector<16x32xf32>, vector<32x8xf32>, vector<16x8xf32> -> vector<16x8xf32>
    %353 = arith.addf %348, %352 : vector<16x8xf32>
    %354 = vector.extract_strided_slice %339 {offsets = [48, 0], sizes = [16, 32], strides = [1, 1]} : vector<144x32xf32> to vector<16x32xf32>
    %c3_272 = arith.constant 3 : index
    %c0_273 = arith.constant 0 : index
    %c0_274 = arith.constant 0 : index
    %355 = vector.load %arg19[%c3_272, %c0_273, %c0_274] : memref<9x32x8xf32, #tpu.memory_space<vmem>>, vector<1x32x8xf32>
    %356 = vector.shape_cast %355 : vector<1x32x8xf32> to vector<32x8xf32>
    %cst_275 = arith.constant dense<0.000000e+00> : vector<16x8xf32>
    %357 = tpu.matmul %354, %356, %cst_275 {dimension_numbers = #tpu.dot_dimension_numbers<[1], [0], [0], [1], [0, 0, 1, 1], [], []>} : vector<16x32xf32>, vector<32x8xf32>, vector<16x8xf32> -> vector<16x8xf32>
    %358 = arith.addf %353, %357 : vector<16x8xf32>
    %359 = vector.extract_strided_slice %339 {offsets = [64, 0], sizes = [16, 32], strides = [1, 1]} : vector<144x32xf32> to vector<16x32xf32>
    %c4_276 = arith.constant 4 : index
    %c0_277 = arith.constant 0 : index
    %c0_278 = arith.constant 0 : index
    %360 = vector.load %arg19[%c4_276, %c0_277, %c0_278] : memref<9x32x8xf32, #tpu.memory_space<vmem>>, vector<1x32x8xf32>
    %361 = vector.shape_cast %360 : vector<1x32x8xf32> to vector<32x8xf32>
    %cst_279 = arith.constant dense<0.000000e+00> : vector<16x8xf32>
    %362 = tpu.matmul %359, %361, %cst_279 {dimension_numbers = #tpu.dot_dimension_numbers<[1], [0], [0], [1], [0, 0, 1, 1], [], []>} : vector<16x32xf32>, vector<32x8xf32>, vector<16x8xf32> -> vector<16x8xf32>
    %363 = arith.addf %358, %362 : vector<16x8xf32>
    %364 = vector.extract_strided_slice %339 {offsets = [80, 0], sizes = [16, 32], strides = [1, 1]} : vector<144x32xf32> to vector<16x32xf32>
    %c5_280 = arith.constant 5 : index
    %c0_281 = arith.constant 0 : index
    %c0_282 = arith.constant 0 : index
    %365 = vector.load %arg19[%c5_280, %c0_281, %c0_282] : memref<9x32x8xf32, #tpu.memory_space<vmem>>, vector<1x32x8xf32>
    %366 = vector.shape_cast %365 : vector<1x32x8xf32> to vector<32x8xf32>
    %cst_283 = arith.constant dense<0.000000e+00> : vector<16x8xf32>
    %367 = tpu.matmul %364, %366, %cst_283 {dimension_numbers = #tpu.dot_dimension_numbers<[1], [0], [0], [1], [0, 0, 1, 1], [], []>} : vector<16x32xf32>, vector<32x8xf32>, vector<16x8xf32> -> vector<16x8xf32>
    %368 = arith.addf %363, %367 : vector<16x8xf32>
    %369 = vector.extract_strided_slice %339 {offsets = [96, 0], sizes = [16, 32], strides = [1, 1]} : vector<144x32xf32> to vector<16x32xf32>
    %c6_284 = arith.constant 6 : index
    %c0_285 = arith.constant 0 : index
    %c0_286 = arith.constant 0 : index
    %370 = vector.load %arg19[%c6_284, %c0_285, %c0_286] : memref<9x32x8xf32, #tpu.memory_space<vmem>>, vector<1x32x8xf32>
    %371 = vector.shape_cast %370 : vector<1x32x8xf32> to vector<32x8xf32>
    %cst_287 = arith.constant dense<0.000000e+00> : vector<16x8xf32>
    %372 = tpu.matmul %369, %371, %cst_287 {dimension_numbers = #tpu.dot_dimension_numbers<[1], [0], [0], [1], [0, 0, 1, 1], [], []>} : vector<16x32xf32>, vector<32x8xf32>, vector<16x8xf32> -> vector<16x8xf32>
    %373 = arith.addf %368, %372 : vector<16x8xf32>
    %374 = vector.extract_strided_slice %339 {offsets = [112, 0], sizes = [16, 32], strides = [1, 1]} : vector<144x32xf32> to vector<16x32xf32>
    %c7_288 = arith.constant 7 : index
    %c0_289 = arith.constant 0 : index
    %c0_290 = arith.constant 0 : index
    %375 = vector.load %arg19[%c7_288, %c0_289, %c0_290] : memref<9x32x8xf32, #tpu.memory_space<vmem>>, vector<1x32x8xf32>
    %376 = vector.shape_cast %375 : vector<1x32x8xf32> to vector<32x8xf32>
    %cst_291 = arith.constant dense<0.000000e+00> : vector<16x8xf32>
    %377 = tpu.matmul %374, %376, %cst_291 {dimension_numbers = #tpu.dot_dimension_numbers<[1], [0], [0], [1], [0, 0, 1, 1], [], []>} : vector<16x32xf32>, vector<32x8xf32>, vector<16x8xf32> -> vector<16x8xf32>
    %378 = arith.addf %373, %377 : vector<16x8xf32>
    %379 = vector.extract_strided_slice %339 {offsets = [128, 0], sizes = [16, 32], strides = [1, 1]} : vector<144x32xf32> to vector<16x32xf32>
    %c8_292 = arith.constant 8 : index
    %c0_293 = arith.constant 0 : index
    %c0_294 = arith.constant 0 : index
    %380 = vector.load %arg19[%c8_292, %c0_293, %c0_294] : memref<9x32x8xf32, #tpu.memory_space<vmem>>, vector<1x32x8xf32>
    %381 = vector.shape_cast %380 : vector<1x32x8xf32> to vector<32x8xf32>
    %cst_295 = arith.constant dense<0.000000e+00> : vector<16x8xf32>
    %382 = tpu.matmul %379, %381, %cst_295 {dimension_numbers = #tpu.dot_dimension_numbers<[1], [0], [0], [1], [0, 0, 1, 1], [], []>} : vector<16x32xf32>, vector<32x8xf32>, vector<16x8xf32> -> vector<16x8xf32>
    %383 = arith.addf %378, %382 : vector<16x8xf32>
    %cst_296 = arith.constant 0.000000e+00 : f32
    %384 = vector.broadcast %cst_296 : f32 to vector<16x8xf32>
    %385 = arith.maximumf %383, %384 : vector<16x8xf32>
    %c0_297 = arith.constant 0 : index
    %c0_298 = arith.constant 0 : index
    %386 = vector.load %arg20[%c0_297, %c0_298] : memref<8x32xf32, #tpu.memory_space<vmem>>, vector<8x32xf32>
    %cst_299 = arith.constant dense<0.000000e+00> : vector<16x32xf32>
    %387 = tpu.matmul %385, %386, %cst_299 {dimension_numbers = #tpu.dot_dimension_numbers<[1], [0], [0], [1], [0, 0, 1, 1], [], []>} : vector<16x8xf32>, vector<8x32xf32>, vector<16x32xf32> -> vector<16x32xf32>
    %388 = arith.addf %336, %387 : vector<16x32xf32>
    %cst_300 = arith.constant 0.000000e+00 : f32
    %389 = vector.broadcast %cst_300 : f32 to vector<16x32xf32>
    %390 = arith.maximumf %388, %389 : vector<16x32xf32>
    %cst_301 = arith.constant dense<0.000000e+00> : vector<144x32xf32>
    %391 = tpu.matmul %0, %390, %cst_301 {dimension_numbers = #tpu.dot_dimension_numbers<[1], [0], [0], [1], [0, 0, 1, 1], [], []>} : vector<144x16xf32>, vector<16x32xf32>, vector<144x32xf32> -> vector<144x32xf32>
    %392 = vector.extract_strided_slice %391 {offsets = [0, 0], sizes = [16, 32], strides = [1, 1]} : vector<144x32xf32> to vector<16x32xf32>
    %c0_302 = arith.constant 0 : index
    %c0_303 = arith.constant 0 : index
    %c0_304 = arith.constant 0 : index
    %393 = vector.load %arg21[%c0_302, %c0_303, %c0_304] : memref<9x32x8xf32, #tpu.memory_space<vmem>>, vector<1x32x8xf32>
    %394 = vector.shape_cast %393 : vector<1x32x8xf32> to vector<32x8xf32>
    %cst_305 = arith.constant dense<0.000000e+00> : vector<16x8xf32>
    %395 = tpu.matmul %392, %394, %cst_305 {dimension_numbers = #tpu.dot_dimension_numbers<[1], [0], [0], [1], [0, 0, 1, 1], [], []>} : vector<16x32xf32>, vector<32x8xf32>, vector<16x8xf32> -> vector<16x8xf32>
    %396 = vector.extract_strided_slice %391 {offsets = [16, 0], sizes = [16, 32], strides = [1, 1]} : vector<144x32xf32> to vector<16x32xf32>
    %c1_306 = arith.constant 1 : index
    %c0_307 = arith.constant 0 : index
    %c0_308 = arith.constant 0 : index
    %397 = vector.load %arg21[%c1_306, %c0_307, %c0_308] : memref<9x32x8xf32, #tpu.memory_space<vmem>>, vector<1x32x8xf32>
    %398 = vector.shape_cast %397 : vector<1x32x8xf32> to vector<32x8xf32>
    %cst_309 = arith.constant dense<0.000000e+00> : vector<16x8xf32>
    %399 = tpu.matmul %396, %398, %cst_309 {dimension_numbers = #tpu.dot_dimension_numbers<[1], [0], [0], [1], [0, 0, 1, 1], [], []>} : vector<16x32xf32>, vector<32x8xf32>, vector<16x8xf32> -> vector<16x8xf32>
    %400 = arith.addf %395, %399 : vector<16x8xf32>
    %401 = vector.extract_strided_slice %391 {offsets = [32, 0], sizes = [16, 32], strides = [1, 1]} : vector<144x32xf32> to vector<16x32xf32>
    %c2_310 = arith.constant 2 : index
    %c0_311 = arith.constant 0 : index
    %c0_312 = arith.constant 0 : index
    %402 = vector.load %arg21[%c2_310, %c0_311, %c0_312] : memref<9x32x8xf32, #tpu.memory_space<vmem>>, vector<1x32x8xf32>
    %403 = vector.shape_cast %402 : vector<1x32x8xf32> to vector<32x8xf32>
    %cst_313 = arith.constant dense<0.000000e+00> : vector<16x8xf32>
    %404 = tpu.matmul %401, %403, %cst_313 {dimension_numbers = #tpu.dot_dimension_numbers<[1], [0], [0], [1], [0, 0, 1, 1], [], []>} : vector<16x32xf32>, vector<32x8xf32>, vector<16x8xf32> -> vector<16x8xf32>
    %405 = arith.addf %400, %404 : vector<16x8xf32>
    %406 = vector.extract_strided_slice %391 {offsets = [48, 0], sizes = [16, 32], strides = [1, 1]} : vector<144x32xf32> to vector<16x32xf32>
    %c3_314 = arith.constant 3 : index
    %c0_315 = arith.constant 0 : index
    %c0_316 = arith.constant 0 : index
    %407 = vector.load %arg21[%c3_314, %c0_315, %c0_316] : memref<9x32x8xf32, #tpu.memory_space<vmem>>, vector<1x32x8xf32>
    %408 = vector.shape_cast %407 : vector<1x32x8xf32> to vector<32x8xf32>
    %cst_317 = arith.constant dense<0.000000e+00> : vector<16x8xf32>
    %409 = tpu.matmul %406, %408, %cst_317 {dimension_numbers = #tpu.dot_dimension_numbers<[1], [0], [0], [1], [0, 0, 1, 1], [], []>} : vector<16x32xf32>, vector<32x8xf32>, vector<16x8xf32> -> vector<16x8xf32>
    %410 = arith.addf %405, %409 : vector<16x8xf32>
    %411 = vector.extract_strided_slice %391 {offsets = [64, 0], sizes = [16, 32], strides = [1, 1]} : vector<144x32xf32> to vector<16x32xf32>
    %c4_318 = arith.constant 4 : index
    %c0_319 = arith.constant 0 : index
    %c0_320 = arith.constant 0 : index
    %412 = vector.load %arg21[%c4_318, %c0_319, %c0_320] : memref<9x32x8xf32, #tpu.memory_space<vmem>>, vector<1x32x8xf32>
    %413 = vector.shape_cast %412 : vector<1x32x8xf32> to vector<32x8xf32>
    %cst_321 = arith.constant dense<0.000000e+00> : vector<16x8xf32>
    %414 = tpu.matmul %411, %413, %cst_321 {dimension_numbers = #tpu.dot_dimension_numbers<[1], [0], [0], [1], [0, 0, 1, 1], [], []>} : vector<16x32xf32>, vector<32x8xf32>, vector<16x8xf32> -> vector<16x8xf32>
    %415 = arith.addf %410, %414 : vector<16x8xf32>
    %416 = vector.extract_strided_slice %391 {offsets = [80, 0], sizes = [16, 32], strides = [1, 1]} : vector<144x32xf32> to vector<16x32xf32>
    %c5_322 = arith.constant 5 : index
    %c0_323 = arith.constant 0 : index
    %c0_324 = arith.constant 0 : index
    %417 = vector.load %arg21[%c5_322, %c0_323, %c0_324] : memref<9x32x8xf32, #tpu.memory_space<vmem>>, vector<1x32x8xf32>
    %418 = vector.shape_cast %417 : vector<1x32x8xf32> to vector<32x8xf32>
    %cst_325 = arith.constant dense<0.000000e+00> : vector<16x8xf32>
    %419 = tpu.matmul %416, %418, %cst_325 {dimension_numbers = #tpu.dot_dimension_numbers<[1], [0], [0], [1], [0, 0, 1, 1], [], []>} : vector<16x32xf32>, vector<32x8xf32>, vector<16x8xf32> -> vector<16x8xf32>
    %420 = arith.addf %415, %419 : vector<16x8xf32>
    %421 = vector.extract_strided_slice %391 {offsets = [96, 0], sizes = [16, 32], strides = [1, 1]} : vector<144x32xf32> to vector<16x32xf32>
    %c6_326 = arith.constant 6 : index
    %c0_327 = arith.constant 0 : index
    %c0_328 = arith.constant 0 : index
    %422 = vector.load %arg21[%c6_326, %c0_327, %c0_328] : memref<9x32x8xf32, #tpu.memory_space<vmem>>, vector<1x32x8xf32>
    %423 = vector.shape_cast %422 : vector<1x32x8xf32> to vector<32x8xf32>
    %cst_329 = arith.constant dense<0.000000e+00> : vector<16x8xf32>
    %424 = tpu.matmul %421, %423, %cst_329 {dimension_numbers = #tpu.dot_dimension_numbers<[1], [0], [0], [1], [0, 0, 1, 1], [], []>} : vector<16x32xf32>, vector<32x8xf32>, vector<16x8xf32> -> vector<16x8xf32>
    %425 = arith.addf %420, %424 : vector<16x8xf32>
    %426 = vector.extract_strided_slice %391 {offsets = [112, 0], sizes = [16, 32], strides = [1, 1]} : vector<144x32xf32> to vector<16x32xf32>
    %c7_330 = arith.constant 7 : index
    %c0_331 = arith.constant 0 : index
    %c0_332 = arith.constant 0 : index
    %427 = vector.load %arg21[%c7_330, %c0_331, %c0_332] : memref<9x32x8xf32, #tpu.memory_space<vmem>>, vector<1x32x8xf32>
    %428 = vector.shape_cast %427 : vector<1x32x8xf32> to vector<32x8xf32>
    %cst_333 = arith.constant dense<0.000000e+00> : vector<16x8xf32>
    %429 = tpu.matmul %426, %428, %cst_333 {dimension_numbers = #tpu.dot_dimension_numbers<[1], [0], [0], [1], [0, 0, 1, 1], [], []>} : vector<16x32xf32>, vector<32x8xf32>, vector<16x8xf32> -> vector<16x8xf32>
    %430 = arith.addf %425, %429 : vector<16x8xf32>
    %431 = vector.extract_strided_slice %391 {offsets = [128, 0], sizes = [16, 32], strides = [1, 1]} : vector<144x32xf32> to vector<16x32xf32>
    %c8_334 = arith.constant 8 : index
    %c0_335 = arith.constant 0 : index
    %c0_336 = arith.constant 0 : index
    %432 = vector.load %arg21[%c8_334, %c0_335, %c0_336] : memref<9x32x8xf32, #tpu.memory_space<vmem>>, vector<1x32x8xf32>
    %433 = vector.shape_cast %432 : vector<1x32x8xf32> to vector<32x8xf32>
    %cst_337 = arith.constant dense<0.000000e+00> : vector<16x8xf32>
    %434 = tpu.matmul %431, %433, %cst_337 {dimension_numbers = #tpu.dot_dimension_numbers<[1], [0], [0], [1], [0, 0, 1, 1], [], []>} : vector<16x32xf32>, vector<32x8xf32>, vector<16x8xf32> -> vector<16x8xf32>
    %435 = arith.addf %430, %434 : vector<16x8xf32>
    %cst_338 = arith.constant 0.000000e+00 : f32
    %436 = vector.broadcast %cst_338 : f32 to vector<16x8xf32>
    %437 = arith.maximumf %435, %436 : vector<16x8xf32>
    %c0_339 = arith.constant 0 : index
    %c0_340 = arith.constant 0 : index
    %438 = vector.load %arg22[%c0_339, %c0_340] : memref<8x32xf32, #tpu.memory_space<vmem>>, vector<8x32xf32>
    %cst_341 = arith.constant dense<0.000000e+00> : vector<16x32xf32>
    %439 = tpu.matmul %437, %438, %cst_341 {dimension_numbers = #tpu.dot_dimension_numbers<[1], [0], [0], [1], [0, 0, 1, 1], [], []>} : vector<16x8xf32>, vector<8x32xf32>, vector<16x32xf32> -> vector<16x32xf32>
    %440 = arith.addf %388, %439 : vector<16x32xf32>
    %cst_342 = arith.constant 0.000000e+00 : f32
    %441 = vector.broadcast %cst_342 : f32 to vector<16x32xf32>
    %442 = arith.maximumf %440, %441 : vector<16x32xf32>
    %cst_343 = arith.constant dense<0.000000e+00> : vector<144x32xf32>
    %443 = tpu.matmul %0, %442, %cst_343 {dimension_numbers = #tpu.dot_dimension_numbers<[1], [0], [0], [1], [0, 0, 1, 1], [], []>} : vector<144x16xf32>, vector<16x32xf32>, vector<144x32xf32> -> vector<144x32xf32>
    %444 = vector.extract_strided_slice %443 {offsets = [0, 0], sizes = [16, 32], strides = [1, 1]} : vector<144x32xf32> to vector<16x32xf32>
    %c0_344 = arith.constant 0 : index
    %c0_345 = arith.constant 0 : index
    %c0_346 = arith.constant 0 : index
    %445 = vector.load %arg23[%c0_344, %c0_345, %c0_346] : memref<9x32x64xf32, #tpu.memory_space<vmem>>, vector<1x32x64xf32>
    %446 = vector.shape_cast %445 : vector<1x32x64xf32> to vector<32x64xf32>
    %cst_347 = arith.constant dense<0.000000e+00> : vector<16x64xf32>
    %447 = tpu.matmul %444, %446, %cst_347 {dimension_numbers = #tpu.dot_dimension_numbers<[1], [0], [0], [1], [0, 0, 1, 1], [], []>} : vector<16x32xf32>, vector<32x64xf32>, vector<16x64xf32> -> vector<16x64xf32>
    %448 = vector.extract_strided_slice %443 {offsets = [16, 0], sizes = [16, 32], strides = [1, 1]} : vector<144x32xf32> to vector<16x32xf32>
    %c1_348 = arith.constant 1 : index
    %c0_349 = arith.constant 0 : index
    %c0_350 = arith.constant 0 : index
    %449 = vector.load %arg23[%c1_348, %c0_349, %c0_350] : memref<9x32x64xf32, #tpu.memory_space<vmem>>, vector<1x32x64xf32>
    %450 = vector.shape_cast %449 : vector<1x32x64xf32> to vector<32x64xf32>
    %cst_351 = arith.constant dense<0.000000e+00> : vector<16x64xf32>
    %451 = tpu.matmul %448, %450, %cst_351 {dimension_numbers = #tpu.dot_dimension_numbers<[1], [0], [0], [1], [0, 0, 1, 1], [], []>} : vector<16x32xf32>, vector<32x64xf32>, vector<16x64xf32> -> vector<16x64xf32>
    %452 = arith.addf %447, %451 : vector<16x64xf32>
    %453 = vector.extract_strided_slice %443 {offsets = [32, 0], sizes = [16, 32], strides = [1, 1]} : vector<144x32xf32> to vector<16x32xf32>
    %c2_352 = arith.constant 2 : index
    %c0_353 = arith.constant 0 : index
    %c0_354 = arith.constant 0 : index
    %454 = vector.load %arg23[%c2_352, %c0_353, %c0_354] : memref<9x32x64xf32, #tpu.memory_space<vmem>>, vector<1x32x64xf32>
    %455 = vector.shape_cast %454 : vector<1x32x64xf32> to vector<32x64xf32>
    %cst_355 = arith.constant dense<0.000000e+00> : vector<16x64xf32>
    %456 = tpu.matmul %453, %455, %cst_355 {dimension_numbers = #tpu.dot_dimension_numbers<[1], [0], [0], [1], [0, 0, 1, 1], [], []>} : vector<16x32xf32>, vector<32x64xf32>, vector<16x64xf32> -> vector<16x64xf32>
    %457 = arith.addf %452, %456 : vector<16x64xf32>
    %458 = vector.extract_strided_slice %443 {offsets = [48, 0], sizes = [16, 32], strides = [1, 1]} : vector<144x32xf32> to vector<16x32xf32>
    %c3_356 = arith.constant 3 : index
    %c0_357 = arith.constant 0 : index
    %c0_358 = arith.constant 0 : index
    %459 = vector.load %arg23[%c3_356, %c0_357, %c0_358] : memref<9x32x64xf32, #tpu.memory_space<vmem>>, vector<1x32x64xf32>
    %460 = vector.shape_cast %459 : vector<1x32x64xf32> to vector<32x64xf32>
    %cst_359 = arith.constant dense<0.000000e+00> : vector<16x64xf32>
    %461 = tpu.matmul %458, %460, %cst_359 {dimension_numbers = #tpu.dot_dimension_numbers<[1], [0], [0], [1], [0, 0, 1, 1], [], []>} : vector<16x32xf32>, vector<32x64xf32>, vector<16x64xf32> -> vector<16x64xf32>
    %462 = arith.addf %457, %461 : vector<16x64xf32>
    %463 = vector.extract_strided_slice %443 {offsets = [64, 0], sizes = [16, 32], strides = [1, 1]} : vector<144x32xf32> to vector<16x32xf32>
    %c4_360 = arith.constant 4 : index
    %c0_361 = arith.constant 0 : index
    %c0_362 = arith.constant 0 : index
    %464 = vector.load %arg23[%c4_360, %c0_361, %c0_362] : memref<9x32x64xf32, #tpu.memory_space<vmem>>, vector<1x32x64xf32>
    %465 = vector.shape_cast %464 : vector<1x32x64xf32> to vector<32x64xf32>
    %cst_363 = arith.constant dense<0.000000e+00> : vector<16x64xf32>
    %466 = tpu.matmul %463, %465, %cst_363 {dimension_numbers = #tpu.dot_dimension_numbers<[1], [0], [0], [1], [0, 0, 1, 1], [], []>} : vector<16x32xf32>, vector<32x64xf32>, vector<16x64xf32> -> vector<16x64xf32>
    %467 = arith.addf %462, %466 : vector<16x64xf32>
    %468 = vector.extract_strided_slice %443 {offsets = [80, 0], sizes = [16, 32], strides = [1, 1]} : vector<144x32xf32> to vector<16x32xf32>
    %c5_364 = arith.constant 5 : index
    %c0_365 = arith.constant 0 : index
    %c0_366 = arith.constant 0 : index
    %469 = vector.load %arg23[%c5_364, %c0_365, %c0_366] : memref<9x32x64xf32, #tpu.memory_space<vmem>>, vector<1x32x64xf32>
    %470 = vector.shape_cast %469 : vector<1x32x64xf32> to vector<32x64xf32>
    %cst_367 = arith.constant dense<0.000000e+00> : vector<16x64xf32>
    %471 = tpu.matmul %468, %470, %cst_367 {dimension_numbers = #tpu.dot_dimension_numbers<[1], [0], [0], [1], [0, 0, 1, 1], [], []>} : vector<16x32xf32>, vector<32x64xf32>, vector<16x64xf32> -> vector<16x64xf32>
    %472 = arith.addf %467, %471 : vector<16x64xf32>
    %473 = vector.extract_strided_slice %443 {offsets = [96, 0], sizes = [16, 32], strides = [1, 1]} : vector<144x32xf32> to vector<16x32xf32>
    %c6_368 = arith.constant 6 : index
    %c0_369 = arith.constant 0 : index
    %c0_370 = arith.constant 0 : index
    %474 = vector.load %arg23[%c6_368, %c0_369, %c0_370] : memref<9x32x64xf32, #tpu.memory_space<vmem>>, vector<1x32x64xf32>
    %475 = vector.shape_cast %474 : vector<1x32x64xf32> to vector<32x64xf32>
    %cst_371 = arith.constant dense<0.000000e+00> : vector<16x64xf32>
    %476 = tpu.matmul %473, %475, %cst_371 {dimension_numbers = #tpu.dot_dimension_numbers<[1], [0], [0], [1], [0, 0, 1, 1], [], []>} : vector<16x32xf32>, vector<32x64xf32>, vector<16x64xf32> -> vector<16x64xf32>
    %477 = arith.addf %472, %476 : vector<16x64xf32>
    %478 = vector.extract_strided_slice %443 {offsets = [112, 0], sizes = [16, 32], strides = [1, 1]} : vector<144x32xf32> to vector<16x32xf32>
    %c7_372 = arith.constant 7 : index
    %c0_373 = arith.constant 0 : index
    %c0_374 = arith.constant 0 : index
    %479 = vector.load %arg23[%c7_372, %c0_373, %c0_374] : memref<9x32x64xf32, #tpu.memory_space<vmem>>, vector<1x32x64xf32>
    %480 = vector.shape_cast %479 : vector<1x32x64xf32> to vector<32x64xf32>
    %cst_375 = arith.constant dense<0.000000e+00> : vector<16x64xf32>
    %481 = tpu.matmul %478, %480, %cst_375 {dimension_numbers = #tpu.dot_dimension_numbers<[1], [0], [0], [1], [0, 0, 1, 1], [], []>} : vector<16x32xf32>, vector<32x64xf32>, vector<16x64xf32> -> vector<16x64xf32>
    %482 = arith.addf %477, %481 : vector<16x64xf32>
    %483 = vector.extract_strided_slice %443 {offsets = [128, 0], sizes = [16, 32], strides = [1, 1]} : vector<144x32xf32> to vector<16x32xf32>
    %c8_376 = arith.constant 8 : index
    %c0_377 = arith.constant 0 : index
    %c0_378 = arith.constant 0 : index
    %484 = vector.load %arg23[%c8_376, %c0_377, %c0_378] : memref<9x32x64xf32, #tpu.memory_space<vmem>>, vector<1x32x64xf32>
    %485 = vector.shape_cast %484 : vector<1x32x64xf32> to vector<32x64xf32>
    %cst_379 = arith.constant dense<0.000000e+00> : vector<16x64xf32>
    %486 = tpu.matmul %483, %485, %cst_379 {dimension_numbers = #tpu.dot_dimension_numbers<[1], [0], [0], [1], [0, 0, 1, 1], [], []>} : vector<16x32xf32>, vector<32x64xf32>, vector<16x64xf32> -> vector<16x64xf32>
    %487 = arith.addf %482, %486 : vector<16x64xf32>
    %c0_380 = arith.constant 0 : index
    %c0_381 = arith.constant 0 : index
    %488 = vector.load %arg24[%c0_380, %c0_381] : memref<1x64xf32, #tpu.memory_space<vmem>>, vector<1x64xf32>
    %489 = vector.broadcast %488 : vector<1x64xf32> to vector<16x64xf32>
    %490 = arith.addf %487, %489 : vector<16x64xf32>
    %cst_382 = arith.constant 0.000000e+00 : f32
    %491 = vector.broadcast %cst_382 : f32 to vector<16x64xf32>
    %492 = arith.maximumf %490, %491 : vector<16x64xf32>
    %cst_383 = arith.constant dense<0.000000e+00> : vector<144x64xf32>
    %493 = tpu.matmul %0, %492, %cst_383 {dimension_numbers = #tpu.dot_dimension_numbers<[1], [0], [0], [1], [0, 0, 1, 1], [], []>} : vector<144x16xf32>, vector<16x64xf32>, vector<144x64xf32> -> vector<144x64xf32>
    %494 = vector.extract_strided_slice %493 {offsets = [0, 0], sizes = [16, 64], strides = [1, 1]} : vector<144x64xf32> to vector<16x64xf32>
    %c0_384 = arith.constant 0 : index
    %c0_385 = arith.constant 0 : index
    %c0_386 = arith.constant 0 : index
    %495 = vector.load %arg25[%c0_384, %c0_385, %c0_386] : memref<9x64x48xf32, #tpu.memory_space<vmem>>, vector<1x64x48xf32>
    %496 = vector.shape_cast %495 : vector<1x64x48xf32> to vector<64x48xf32>
    %cst_387 = arith.constant dense<0.000000e+00> : vector<16x48xf32>
    %497 = tpu.matmul %494, %496, %cst_387 {dimension_numbers = #tpu.dot_dimension_numbers<[1], [0], [0], [1], [0, 0, 1, 1], [], []>} : vector<16x64xf32>, vector<64x48xf32>, vector<16x48xf32> -> vector<16x48xf32>
    %498 = vector.extract_strided_slice %493 {offsets = [16, 0], sizes = [16, 64], strides = [1, 1]} : vector<144x64xf32> to vector<16x64xf32>
    %c1_388 = arith.constant 1 : index
    %c0_389 = arith.constant 0 : index
    %c0_390 = arith.constant 0 : index
    %499 = vector.load %arg25[%c1_388, %c0_389, %c0_390] : memref<9x64x48xf32, #tpu.memory_space<vmem>>, vector<1x64x48xf32>
    %500 = vector.shape_cast %499 : vector<1x64x48xf32> to vector<64x48xf32>
    %cst_391 = arith.constant dense<0.000000e+00> : vector<16x48xf32>
    %501 = tpu.matmul %498, %500, %cst_391 {dimension_numbers = #tpu.dot_dimension_numbers<[1], [0], [0], [1], [0, 0, 1, 1], [], []>} : vector<16x64xf32>, vector<64x48xf32>, vector<16x48xf32> -> vector<16x48xf32>
    %502 = arith.addf %497, %501 : vector<16x48xf32>
    %503 = vector.extract_strided_slice %493 {offsets = [32, 0], sizes = [16, 64], strides = [1, 1]} : vector<144x64xf32> to vector<16x64xf32>
    %c2_392 = arith.constant 2 : index
    %c0_393 = arith.constant 0 : index
    %c0_394 = arith.constant 0 : index
    %504 = vector.load %arg25[%c2_392, %c0_393, %c0_394] : memref<9x64x48xf32, #tpu.memory_space<vmem>>, vector<1x64x48xf32>
    %505 = vector.shape_cast %504 : vector<1x64x48xf32> to vector<64x48xf32>
    %cst_395 = arith.constant dense<0.000000e+00> : vector<16x48xf32>
    %506 = tpu.matmul %503, %505, %cst_395 {dimension_numbers = #tpu.dot_dimension_numbers<[1], [0], [0], [1], [0, 0, 1, 1], [], []>} : vector<16x64xf32>, vector<64x48xf32>, vector<16x48xf32> -> vector<16x48xf32>
    %507 = arith.addf %502, %506 : vector<16x48xf32>
    %508 = vector.extract_strided_slice %493 {offsets = [48, 0], sizes = [16, 64], strides = [1, 1]} : vector<144x64xf32> to vector<16x64xf32>
    %c3_396 = arith.constant 3 : index
    %c0_397 = arith.constant 0 : index
    %c0_398 = arith.constant 0 : index
    %509 = vector.load %arg25[%c3_396, %c0_397, %c0_398] : memref<9x64x48xf32, #tpu.memory_space<vmem>>, vector<1x64x48xf32>
    %510 = vector.shape_cast %509 : vector<1x64x48xf32> to vector<64x48xf32>
    %cst_399 = arith.constant dense<0.000000e+00> : vector<16x48xf32>
    %511 = tpu.matmul %508, %510, %cst_399 {dimension_numbers = #tpu.dot_dimension_numbers<[1], [0], [0], [1], [0, 0, 1, 1], [], []>} : vector<16x64xf32>, vector<64x48xf32>, vector<16x48xf32> -> vector<16x48xf32>
    %512 = arith.addf %507, %511 : vector<16x48xf32>
    %513 = vector.extract_strided_slice %493 {offsets = [64, 0], sizes = [16, 64], strides = [1, 1]} : vector<144x64xf32> to vector<16x64xf32>
    %c4_400 = arith.constant 4 : index
    %c0_401 = arith.constant 0 : index
    %c0_402 = arith.constant 0 : index
    %514 = vector.load %arg25[%c4_400, %c0_401, %c0_402] : memref<9x64x48xf32, #tpu.memory_space<vmem>>, vector<1x64x48xf32>
    %515 = vector.shape_cast %514 : vector<1x64x48xf32> to vector<64x48xf32>
    %cst_403 = arith.constant dense<0.000000e+00> : vector<16x48xf32>
    %516 = tpu.matmul %513, %515, %cst_403 {dimension_numbers = #tpu.dot_dimension_numbers<[1], [0], [0], [1], [0, 0, 1, 1], [], []>} : vector<16x64xf32>, vector<64x48xf32>, vector<16x48xf32> -> vector<16x48xf32>
    %517 = arith.addf %512, %516 : vector<16x48xf32>
    %518 = vector.extract_strided_slice %493 {offsets = [80, 0], sizes = [16, 64], strides = [1, 1]} : vector<144x64xf32> to vector<16x64xf32>
    %c5_404 = arith.constant 5 : index
    %c0_405 = arith.constant 0 : index
    %c0_406 = arith.constant 0 : index
    %519 = vector.load %arg25[%c5_404, %c0_405, %c0_406] : memref<9x64x48xf32, #tpu.memory_space<vmem>>, vector<1x64x48xf32>
    %520 = vector.shape_cast %519 : vector<1x64x48xf32> to vector<64x48xf32>
    %cst_407 = arith.constant dense<0.000000e+00> : vector<16x48xf32>
    %521 = tpu.matmul %518, %520, %cst_407 {dimension_numbers = #tpu.dot_dimension_numbers<[1], [0], [0], [1], [0, 0, 1, 1], [], []>} : vector<16x64xf32>, vector<64x48xf32>, vector<16x48xf32> -> vector<16x48xf32>
    %522 = arith.addf %517, %521 : vector<16x48xf32>
    %523 = vector.extract_strided_slice %493 {offsets = [96, 0], sizes = [16, 64], strides = [1, 1]} : vector<144x64xf32> to vector<16x64xf32>
    %c6_408 = arith.constant 6 : index
    %c0_409 = arith.constant 0 : index
    %c0_410 = arith.constant 0 : index
    %524 = vector.load %arg25[%c6_408, %c0_409, %c0_410] : memref<9x64x48xf32, #tpu.memory_space<vmem>>, vector<1x64x48xf32>
    %525 = vector.shape_cast %524 : vector<1x64x48xf32> to vector<64x48xf32>
    %cst_411 = arith.constant dense<0.000000e+00> : vector<16x48xf32>
    %526 = tpu.matmul %523, %525, %cst_411 {dimension_numbers = #tpu.dot_dimension_numbers<[1], [0], [0], [1], [0, 0, 1, 1], [], []>} : vector<16x64xf32>, vector<64x48xf32>, vector<16x48xf32> -> vector<16x48xf32>
    %527 = arith.addf %522, %526 : vector<16x48xf32>
    %528 = vector.extract_strided_slice %493 {offsets = [112, 0], sizes = [16, 64], strides = [1, 1]} : vector<144x64xf32> to vector<16x64xf32>
    %c7_412 = arith.constant 7 : index
    %c0_413 = arith.constant 0 : index
    %c0_414 = arith.constant 0 : index
    %529 = vector.load %arg25[%c7_412, %c0_413, %c0_414] : memref<9x64x48xf32, #tpu.memory_space<vmem>>, vector<1x64x48xf32>
    %530 = vector.shape_cast %529 : vector<1x64x48xf32> to vector<64x48xf32>
    %cst_415 = arith.constant dense<0.000000e+00> : vector<16x48xf32>
    %531 = tpu.matmul %528, %530, %cst_415 {dimension_numbers = #tpu.dot_dimension_numbers<[1], [0], [0], [1], [0, 0, 1, 1], [], []>} : vector<16x64xf32>, vector<64x48xf32>, vector<16x48xf32> -> vector<16x48xf32>
    %532 = arith.addf %527, %531 : vector<16x48xf32>
    %533 = vector.extract_strided_slice %493 {offsets = [128, 0], sizes = [16, 64], strides = [1, 1]} : vector<144x64xf32> to vector<16x64xf32>
    %c8_416 = arith.constant 8 : index
    %c0_417 = arith.constant 0 : index
    %c0_418 = arith.constant 0 : index
    %534 = vector.load %arg25[%c8_416, %c0_417, %c0_418] : memref<9x64x48xf32, #tpu.memory_space<vmem>>, vector<1x64x48xf32>
    %535 = vector.shape_cast %534 : vector<1x64x48xf32> to vector<64x48xf32>
    %cst_419 = arith.constant dense<0.000000e+00> : vector<16x48xf32>
    %536 = tpu.matmul %533, %535, %cst_419 {dimension_numbers = #tpu.dot_dimension_numbers<[1], [0], [0], [1], [0, 0, 1, 1], [], []>} : vector<16x64xf32>, vector<64x48xf32>, vector<16x48xf32> -> vector<16x48xf32>
    %537 = arith.addf %532, %536 : vector<16x48xf32>
    %c0_420 = arith.constant 0 : index
    %c0_421 = arith.constant 0 : index
    %538 = vector.load %arg26[%c0_420, %c0_421] : memref<1x48xf32, #tpu.memory_space<vmem>>, vector<1x48xf32>
    %539 = vector.broadcast %538 : vector<1x48xf32> to vector<16x48xf32>
    %540 = arith.addf %537, %539 : vector<16x48xf32>
    %c0_422 = arith.constant 0 : index
    %c0_423 = arith.constant 0 : index
    %c0_424 = arith.constant 0 : index
    %541 = vector.load %arg27[%c0_422, %c0_423, %c0_424] : memref<1x16x48xf32, #tpu.memory_space<vmem>>, vector<1x16x48xf32>
    %542 = vector.shape_cast %541 : vector<1x16x48xf32> to vector<16x48xf32>
    %543 = vector.shape_cast %540 : vector<16x48xf32> to vector<1x16x48xf32>
    tpu.vector_store %arg27[%c0_422, %c0_423, %c0_424], %543 {strides = array<i32>} : memref<1x16x48xf32, #tpu.memory_space<vmem>>, vector<1x16x48xf32>,
    return
  }
  func.func @transform_0(%arg0: i32) -> (i32, i32, i32) {
    %c0_i32 = arith.constant 0 : i32
    %c0_i32_0 = arith.constant 0 : i32
    %c0_i32_1 = arith.constant 0 : i32
    return %arg0, %c0_i32, %c0_i32_0 : i32, i32, i32
  }
  func.func @transform_1(%arg0: i32) -> (i32, i32) {
    %c0_i32 = arith.constant 0 : i32
    %c0_i32_0 = arith.constant 0 : i32
    %c0_i32_1 = arith.constant 0 : i32
    return %c0_i32, %c0_i32_0 : i32, i32
  }
  func.func @transform_2(%arg0: i32) -> (i32, i32, i32) {
    %c0_i32 = arith.constant 0 : i32
    %c0_i32_0 = arith.constant 0 : i32
    %c0_i32_1 = arith.constant 0 : i32
    %c0_i32_2 = arith.constant 0 : i32
    return %c0_i32, %c0_i32_0, %c0_i32_1 : i32, i32, i32
  }
  func.func @transform_3(%arg0: i32) -> (i32, i32) {
    %c0_i32 = arith.constant 0 : i32
    %c0_i32_0 = arith.constant 0 : i32
    %c0_i32_1 = arith.constant 0 : i32
    return %c0_i32, %c0_i32_0 : i32, i32
  }
  func.func @transform_4(%arg0: i32) -> (i32, i32, i32) {
    %c0_i32 = arith.constant 0 : i32
    %c0_i32_0 = arith.constant 0 : i32
    %c0_i32_1 = arith.constant 0 : i32
    %c0_i32_2 = arith.constant 0 : i32
    return %c0_i32, %c0_i32_0, %c0_i32_1 : i32, i32, i32
  }
  func.func @transform_5(%arg0: i32) -> (i32, i32) {
    %c0_i32 = arith.constant 0 : i32
    %c0_i32_0 = arith.constant 0 : i32
    %c0_i32_1 = arith.constant 0 : i32
    return %c0_i32, %c0_i32_0 : i32, i32
  }
  func.func @transform_6(%arg0: i32) -> (i32, i32, i32) {
    %c0_i32 = arith.constant 0 : i32
    %c0_i32_0 = arith.constant 0 : i32
    %c0_i32_1 = arith.constant 0 : i32
    %c0_i32_2 = arith.constant 0 : i32
    return %c0_i32, %c0_i32_0, %c0_i32_1 : i32, i32, i32
  }
  func.func @transform_7(%arg0: i32) -> (i32, i32) {
    %c0_i32 = arith.constant 0 : i32
    %c0_i32_0 = arith.constant 0 : i32
    %c0_i32_1 = arith.constant 0 : i32
    return %c0_i32, %c0_i32_0 : i32, i32
  }
  func.func @transform_8(%arg0: i32) -> (i32, i32, i32) {
    %c0_i32 = arith.constant 0 : i32
    %c0_i32_0 = arith.constant 0 : i32
    %c0_i32_1 = arith.constant 0 : i32
    %c0_i32_2 = arith.constant 0 : i32
    return %c0_i32, %c0_i32_0, %c0_i32_1 : i32, i32, i32
  }
  func.func @transform_9(%arg0: i32) -> (i32, i32) {
    %c0_i32 = arith.constant 0 : i32
    %c0_i32_0 = arith.constant 0 : i32
    %c0_i32_1 = arith.constant 0 : i32
    return %c0_i32, %c0_i32_0 : i32, i32
  }
  func.func @transform_10(%arg0: i32) -> (i32, i32, i32) {
    %c0_i32 = arith.constant 0 : i32
    %c0_i32_0 = arith.constant 0 : i32
    %c0_i32_1 = arith.constant 0 : i32
    %c0_i32_2 = arith.constant 0 : i32
    return %c0_i32, %c0_i32_0, %c0_i32_1 : i32, i32, i32
  }
  func.func @transform_11(%arg0: i32) -> (i32, i32) {
    %c0_i32 = arith.constant 0 : i32
    %c0_i32_0 = arith.constant 0 : i32
    %c0_i32_1 = arith.constant 0 : i32
    return %c0_i32, %c0_i32_0 : i32, i32
  }
  func.func @transform_12(%arg0: i32) -> (i32, i32) {
    %c0_i32 = arith.constant 0 : i32
    %c0_i32_0 = arith.constant 0 : i32
    %c0_i32_1 = arith.constant 0 : i32
    return %c0_i32, %c0_i32_0 : i32, i32
  }
  func.func @transform_13(%arg0: i32) -> (i32, i32) {
    %c0_i32 = arith.constant 0 : i32
    %c0_i32_0 = arith.constant 0 : i32
    %c0_i32_1 = arith.constant 0 : i32
    return %c0_i32, %c0_i32_0 : i32, i32
  }
  func.func @transform_14(%arg0: i32) -> (i32, i32) {
    %c0_i32 = arith.constant 0 : i32
    %c0_i32_0 = arith.constant 0 : i32
    %c0_i32_1 = arith.constant 0 : i32
    return %c0_i32, %c0_i32_0 : i32, i32
  }
  func.func @transform_15(%arg0: i32) -> (i32, i32) {
    %c0_i32 = arith.constant 0 : i32
    %c0_i32_0 = arith.constant 0 : i32
    %c0_i32_1 = arith.constant 0 : i32
    return %c0_i32, %c0_i32_0 : i32, i32
  }
  func.func @transform_16(%arg0: i32) -> (i32, i32, i32) {
    %c0_i32 = arith.constant 0 : i32
    %c0_i32_0 = arith.constant 0 : i32
    %c0_i32_1 = arith.constant 0 : i32
    %c0_i32_2 = arith.constant 0 : i32
    return %c0_i32, %c0_i32_0, %c0_i32_1 : i32, i32, i32
  }
  func.func @transform_17(%arg0: i32) -> (i32, i32) {
    %c0_i32 = arith.constant 0 : i32
    %c0_i32_0 = arith.constant 0 : i32
    %c0_i32_1 = arith.constant 0 : i32
    return %c0_i32, %c0_i32_0 : i32, i32
  }
  func.func @transform_18(%arg0: i32) -> (i32, i32, i32) {
    %c0_i32 = arith.constant 0 : i32
    %c0_i32_0 = arith.constant 0 : i32
    %c0_i32_1 = arith.constant 0 : i32
    %c0_i32_2 = arith.constant 0 : i32
    return %c0_i32, %c0_i32_0, %c0_i32_1 : i32, i32, i32
  }
  func.func @transform_19(%arg0: i32) -> (i32, i32) {
    %c0_i32 = arith.constant 0 : i32
    %c0_i32_0 = arith.constant 0 : i32
    %c0_i32_1 = arith.constant 0 : i32
    return %c0_i32, %c0_i32_0 : i32, i32
  }
  func.func @transform_20(%arg0: i32) -> (i32, i32, i32) {
    %c0_i32 = arith.constant 0 : i32
    %c0_i32_0 = arith.constant 0 : i32
    %c0_i32_1 = arith.constant 0 : i32
    %c0_i32_2 = arith.constant 0 : i32
    return %c0_i32, %c0_i32_0, %c0_i32_1 : i32, i32, i32
  }
  func.func @transform_21(%arg0: i32) -> (i32, i32) {
    %c0_i32 = arith.constant 0 : i32
    %c0_i32_0 = arith.constant 0 : i32
    %c0_i32_1 = arith.constant 0 : i32
    return %c0_i32, %c0_i32_0 : i32, i32
  }
  func.func @transform_22(%arg0: i32) -> (i32, i32, i32) {
    %c0_i32 = arith.constant 0 : i32
    %c0_i32_0 = arith.constant 0 : i32
    %c0_i32_1 = arith.constant 0 : i32
    %c0_i32_2 = arith.constant 0 : i32
    return %c0_i32, %c0_i32_0, %c0_i32_1 : i32, i32, i32
  }
  func.func @transform_23(%arg0: i32) -> (i32, i32) {
    %c0_i32 = arith.constant 0 : i32
    %c0_i32_0 = arith.constant 0 : i32
    %c0_i32_1 = arith.constant 0 : i32
    return %c0_i32, %c0_i32_0 : i32, i32
  }
  func.func @transform_24(%arg0: i32) -> (i32, i32, i32) {
    %c0_i32 = arith.constant 0 : i32
    %c0_i32_0 = arith.constant 0 : i32
    %c0_i32_1 = arith.constant 0 : i32
    %c0_i32_2 = arith.constant 0 : i32
    return %c0_i32, %c0_i32_0, %c0_i32_1 : i32, i32, i32
  }
  func.func @transform_25(%arg0: i32) -> (i32, i32) {
    %c0_i32 = arith.constant 0 : i32
    %c0_i32_0 = arith.constant 0 : i32
    %c0_i32_1 = arith.constant 0 : i32
    return %c0_i32, %c0_i32_0 : i32, i32
  }
  func.func @transform_26(%arg0: i32) -> (i32, i32, i32) {
    %c0_i32 = arith.constant 0 : i32
    %c0_i32_0 = arith.constant 0 : i32
    %c0_i32_1 = arith.constant 0 : i32
    return %arg0, %c0_i32, %c0_i32_0 : i32, i32, i32
  }
  func.func @transform_27(%arg0: i32) -> (i32, i32, i32) {
    %c0_i32 = arith.constant 0 : i32
    %c0_i32_0 = arith.constant 0 : i32
    %c0_i32_1 = arith.constant 0 : i32
    return %arg0, %c0_i32, %c0_i32_0 : i32, i32, i32
  }
  func.func @transform_28(%arg0: i32) -> (i32, i32, i32) {
    %c0_i32 = arith.constant 0 : i32
    %c0_i32_0 = arith.constant 0 : i32
    %c0_i32_1 = arith.constant 0 : i32
    return %arg0, %c0_i32, %c0_i32_0 : i32, i32, i32
  }
}

</mosaic_0001>

<bundles_post_ra>
// kernel: _vqvae_forward_impl.1
= control target key start
LH: loop header
LB: loop body
LE: loop exit
PB: predicated region body
PF: predicated region fallthrough
CT: control target
= control target key end

     0   :  { %s16915_s0 = inlined_call_operand.vmem [shape: f32[2,16,48], index: 0, kind: input, shape index: {}]   ;;  %s16916_s1 = inlined_call_operand.vmem [shape: f32[144,16], index: 1, kind: input, shape index: {}]   ;;  %s16917_s2 = inlined_call_operand.vmem [shape: f32[9,48,64], index: 2, kind: input, shape index: {}]   ;;  %s16918_s3 = inlined_call_operand.vmem [shape: f32[1,64], index: 3, kind: input, shape index: {}]   ;;  %s16919_s4 = inlined_call_operand.vmem [shape: f32[9,64,32], index: 4, kind: input, shape index: {}]   ;;  %s16920_s5 = inlined_call_operand.vmem [shape: f32[1,32], index: 5, kind: input, shape index: {}]   ;;  %s16921_s6 = inlined_call_operand.vmem [shape: f32[9,32,32], index: 6, kind: input, shape index: {}]   ;;  %s16922_s7 = inlined_call_operand.vmem [shape: f32[1,32], index: 7, kind: input, shape index: {}]   ;;  %s16923_s8 = inlined_call_operand.vmem [shape: f32[9,32,8], index: 8, kind: input, shape index: {}]   ;;  %s16924_s9 = inlined_call_operand.vmem [shape: f32[8,32], index: 9, kind: input, shape index: {}]   ;;  %s16925_s10 = inlined_call_operand.vmem [shape: f32[9,32,8], index: 10, kind: input, shape index: {}]   ;;  %s16926_s11 = inlined_call_operand.vmem [shape: f32[8,32], index: 11, kind: input, shape index: {}]   ;;  %s16927_s12 = inlined_call_operand.vmem [shape: f32[32,8], index: 12, kind: input, shape index: {}]   ;;  %s16928_s13 = inlined_call_operand.vmem [shape: f32[1,8], index: 13, kind: input, shape index: {}]   ;;  %s16929_s14 = inlined_call_operand.vmem [shape: f32[16,8], index: 14, kind: input, shape index: {}]   ;;  %s16930_s15 = inlined_call_operand.vmem [shape: f32[1,16], index: 15, kind: input, shape index: {}]   ;;  %s16931_s16 = inlined_call_operand.vmem [shape: f32[9,8,32], index: 16, kind: input, shape index: {}]   ;;  %s16932_s17 = inlined_call_operand.vmem [shape: f32[1,32], index: 17, kind: input, shape index: {}]   ;;  %s16933_s18 = inlined_call_operand.vmem [shape: f32[9,32,8], index: 18, kind: input, shape index: {}]   ;;  %s16934_s19 = inlined_call_operand.vmem [shape: f32[8,32], index: 19, kind: input, shape index: {}]   ;;  %s16935_s20 = inlined_call_operand.vmem [shape: f32[9,32,8], index: 20, kind: input, shape index: {}]   ;;  %s16936_s21 = inlined_call_operand.vmem [shape: f32[8,32], index: 21, kind: input, shape index: {}]   ;;  %s16937_s22 = inlined_call_operand.vmem [shape: f32[9,32,64], index: 22, kind: input, shape index: {}]   ;;  %s16938_s23 = inlined_call_operand.vmem [shape: f32[1,64], index: 23, kind: input, shape index: {}]   ;;  %s16939_s24 = inlined_call_operand.vmem [shape: f32[9,64,48], index: 24, kind: input, shape index: {}]   ;;  %s16940_s25 = inlined_call_operand.vmem [shape: f32[1,48], index: 25, kind: input, shape index: {}]   ;;  %s16941_s26 = inlined_call_operand.vmem [shape: f32[2,16,48], index: 26, kind: output, shape index: {0}]   ;;  %s16942_s27 = inlined_call_operand.vmem [shape: f32[2,16,8], index: 27, kind: output, shape index: {1}]   ;;  %s16943_s28 = inlined_call_operand.vmem [shape: s32[2,16,1], index: 28, kind: output, shape index: {2}]  }
   0x1   :  { %16953 = sst [smem:[#allocation2_spill]] %s16915_s0 }
   0x2   :  { %16954 = sst [smem:[#allocation3_spill]] %s16916_s1 }
   0x3   :  { %16955 = sst [smem:[#allocation4_spill]] %s16917_s2 }
   0x4   :  { %16956 = sst [smem:[#allocation5_spill]] %s16918_s3 }
   0x5   :  { %16957 = sst [smem:[#allocation6_spill]] %s16919_s4 }
   0x6   :  { %16958 = sst [smem:[#allocation7_spill]] %s16920_s5 }
   0x7   :  { %16959 = sst [smem:[#allocation8_spill]] %s16921_s6 }
   0x8   :  { %16960 = sst [smem:[#allocation9_spill]] %s16922_s7 }
   0x9   :  { %16961 = sst [smem:[#allocation10_spill]] %s16923_s8  ;;  %s14596_s8 = smov 0  }
   0xa   :  { %16962 = sst [smem:[#allocation11_spill]] %s16924_s9 }
   0xb   :  { %16963 = sst [smem:[#allocation12_spill]] %s16925_s10 }
   0xc   :  { %16964 = sst [smem:[#allocation13_spill]] %s16926_s11 }
   0xd   :  { %16965 = sst [smem:[#allocation14_spill]] %s16927_s12 }
   0xe LB: > { %s11298_s5 = sadd.s32 4294967295, %s14448_s8   ;;  %p11302_p0 = scmp.ge.s32.totalorder %s14448_s8, 1  ;;  %s14448_s8 = sphi %s14596_s8, %s39_s8  }
   0xf   : > { %p767_p1 = scmp.lt.s32.totalorder %s14448_s8, 3 }
  0x11   : > { %p768_p2 = pnand %p11302_p0, %p767_p1 }
  0x12   : > { %p851_p3 = scmp.lt.s32.totalorder (!%p768_p2), %s11298_s5, 1  ;;  %s16966_s3 = sld [smem:[#allocation3_spill]] (!%p768_p2) }
  0x13   : > { %771 = sbr.rel (%p768_p2) target bundleno = 6355 (0x18d3), region = 124  ;;  %s16967_s11 = sld [smem:[#allocation2_spill]] (!%p768_p2) }
  0x14   : > { %s16968_s12 = sld [smem:[#allocation4_spill]] (!%p768_p2) }
  0x15   : > { %s16969_s7 = sld [smem:[#allocation6_spill]] (!%p768_p2) }
  0x16   : > { %s16970_s1 = sld [smem:[#allocation5_spill]] (!%p768_p2) }
  0x17   : > { %s16971_s2 = sld [smem:[#allocation8_spill]] (!%p768_p2) }
  0x18   : > { %v14607_v0 = vld [vmem:[%s16966_s3] sm:$0xff]  ;;  %vm891_vm0 = vcmask 130048   ;;  %s16980_s5 = smov (!%p851_p3, %s11298_s5), 1  ;;  %v14626_v5 = vld [vmem:[%s16966_s3 + $0x8] sm:$0xff]  ;;  %v14634_v7 = vld [vmem:[%s16966_s3 + $0x10] sm:$0xff]  ;;  %vm1114_vm1 = vcmask 392192  }
  0x19   : > { %12912 = vmatprep.mubr.msk.f32.mxu0 %vm891_vm0, %v14607_v0  ;;  %s14611_s6 = sshll.u32 %s16980_s5, 4  ;;  %v14643_v8 = vld [vmem:[%s16966_s3 + $0x18] sm:$0xff]  ;;  %v14648_v9 = vld [vmem:[%s16966_s3 + $0x20] sm:$0xff]  ;;  %v14657_v10 = vld [vmem:[%s16966_s3 + $0x28] sm:$0xff]  ;;  %vm2090_vm2 = vcmask 523264   ;;  %s16972_s5 = sld [smem:[#allocation7_spill]] }
  0x1a   : > { %s855_s29 = scalar_lea.vmem %s16967_s11, %s14611_s6  ;;  %v11334_v3 = vld [vmem:[%s16968_s12 + $0x58] sm:$0xff]  ;;  %v11333_v4 = vld [vmem:[%s16968_s12 + $0x50] sm:$0xff]  ;;  %v11332_v6 = vld [vmem:[%s16968_s12 + $0x48] sm:$0xff]  ;;  %vm3072_vm3 = vcmask 261120   ;;  %s16973_s4 = sld [smem:[#allocation10_spill]]  ;;  %vm4807_vm4 = vcmask 64512  }
  0x1b   : > { %v890_v1 = vld [vmem:[%s855_s29 + $0x8] sm:$0xff]  ;;  %v889_v2 = vld [vmem:[%s855_s29] sm:$0xff]  ;;  %12939 = vmatprep.subr.mxu1 %v11334_v3  ;;  %v14662_v11 = vld [vmem:[%s16966_s3 + $0x30] sm:$0xff]  ;;  %s16974_s30 = sld [smem:[#allocation9_spill]]  ;;  %vm6246_vm9 = vcmask 7168   ;;  %s860_s0 = scalar_lea.vmem %s16941_s26, %s14611_s6 }
  0x1c   : > { %12908 = vmatprep.subr.mxu0 %v890_v1  ;;  %12940 = vmatpush3.msra.mxu1 %v11334_v3  ;;  %v14671_v12 = vld [vmem:[%s16966_s3 + $0x38] sm:$0xff]  ;;  %v14676_v13 = vld [vmem:[%s16966_s3 + $0x40] sm:$0xff]  ;;  %v14685_v14 = vld [vmem:[%s16966_s3 + $0x48] sm:$0xff]  ;;  %s16975_s10 = sld [smem:[#allocation11_spill]] }
  0x1d   : > { %12909 = vmatpush3.msra.mxu0 %v890_v1  ;;  %12941 = vmatprep.subr.mxu1 %v11333_v4  ;;  %v14690_v15 = vld [vmem:[%s16966_s3 + $0x50] sm:$0xff]  ;;  %v14699_v16 = vld [vmem:[%s16966_s3 + $0x58] sm:$0xff]  ;;  %v14704_v17 = vld [vmem:[%s16966_s3 + $0x60] sm:$0xff]  ;;  %s16976_s29 = sld [smem:[#allocation12_spill]] }
  0x1e   : > { %12910 = vmatprep.subr.mxu0 %v889_v2  ;;  %12942 = vmatpush3.msra.mxu1 %v11333_v4  ;;  %v14713_v18 = vld [vmem:[%s16966_s3 + $0x68] sm:$0xff]  ;;  %v14718_v19 = vld [vmem:[%s16966_s3 + $0x70] sm:$0xff]  ;;  %v14727_v20 = vld [vmem:[%s16966_s3 + $0x78] sm:$0xff] }
  0x1f   : > { %12911 = vmatpush3.msra.mxu0 %v889_v2  ;;  %12943 = vmatprep.subr.mxu1 %v11332_v6  ;;  %v14732_v21 = vld [vmem:[%s16966_s3 + $0x80] sm:$0xff]  ;;  %v14741_v22 = vld [vmem:[%s16966_s3 + $0x88] sm:$0xff]  ;;  %v11330_v24 = vld [vmem:[%s16968_s12 + $0x38] sm:$0xff] }
  0x20   : > { %12913 = vmatmul.mubr.msk.f32.vlgmr.msra.gmra.mxu0 %vm891_vm0, %v14626_v5  ;;  %12944 = vmatpush3.msra.mxu1 %v11332_v6  ;;  %v11331_v23 = vld [vmem:[%s16968_s12 + $0x40] sm:$0xff]  ;;  %v11329_v25 = vld [vmem:[%s16968_s12 + $0x30] sm:$0xff]  ;;  %v1106_v26 = vld [vmem:[%s16968_s12 + $0x28] sm:$0xff] }
  0x21   : > { %12915 = vmatprep.mubr.msk.f32.mxu0 %vm891_vm0, %v14634_v7  ;;  %12945 = vmatprep.subr.mxu1 %v11331_v23  ;;  %v11352_v27 = vld [vmem:[%s16968_s12 + $0xb8] sm:$0xff]  ;;  %v11351_v28 = vld [vmem:[%s16968_s12 + $0xb0] sm:$0xff]  ;;  %v11350_v29 = vld [vmem:[%s16968_s12 + $0xa8] sm:$0xff] }
  0x22   : > { %12946 = vmatpush3.msra.mxu1 %v11331_v23  ;;  %12984 = vmatprep.subr.mxu0 %v11352_v27  ;;  %v11349_v30 = vld [vmem:[%s16968_s12 + $0xa0] sm:$0xff]  ;;  %v11348_v31 = vld [vmem:[%s16968_s12 + $0x98] sm:$0xff]  ;;  %v11347_v32 = vld [vmem:[%s16968_s12 + $0x90] sm:$0xff] }
  0x23   : > { %12947 = vmatprep.subr.mxu1 %v11330_v24  ;;  %12985 = vmatpush3.msra.mxu0 %v11352_v27  ;;  %v11368_v33 = vld [vmem:[%s16968_s12 + $0x118] sm:$0xff]  ;;  %v1105_v38 = vld [vmem:[%s16968_s12 + $0x20] sm:$0xff]  ;;  %v1103_v42 = vld [vmem:[%s16968_s12 + $0x10] sm:$0xff] }
  0x24   : > { %12916 = vmatmul.mubr.msk.f32.gmra.mxu0 %vm891_vm0, %v14643_v8  ;;  %12948 = vmatpush3.msra.mxu1 %v11330_v24  ;;  %v1104_v40 = vld [vmem:[%s16968_s12 + $0x18] sm:$0xff]  ;;  %v1102_v44 = vld [vmem:[%s16968_s12 + $0x8] sm:$0xff]  ;;  %v1101_v46 = vld [vmem:[%s16968_s12] sm:$0xff] }
  0x25   : > { %12918 = vmatprep.mubr.msk.f32.mxu0 %vm891_vm0, %v14648_v9  ;;  %12949 = vmatprep.subr.mxu1 %v11329_v25  ;;  %v11367_v47 = vld [vmem:[%s16968_s12 + $0x110] sm:$0xff]  ;;  %v11344_v49 = vld [vmem:[%s16968_s12 + $0x88] sm:$0xff]  ;;  %v11343_v50 = vld [vmem:[%s16968_s12 + $0x80] sm:$0xff] }
  0x26   : > { %12950 = vmatpush3.msra.mxu1 %v11329_v25  ;;  %12986 = vmatprep.subr.mxu0 %v11351_v28  ;;  %v11366_v51 = vld [vmem:[%s16968_s12 + $0x108] sm:$0xff]  ;;  %v11342_v53 = vld [vmem:[%s16968_s12 + $0x78] sm:$0xff]  ;;  %v11365_v54 = vld [vmem:[%s16968_s12 + $0x100] sm:$0xff] }
  0x27   : > { %12954 = vmatprep.subr.mxu1 %v1106_v26  ;;  %12987 = vmatpush3.msra.mxu0 %v11351_v28  ;;  %v11341_v55 = vld [vmem:[%s16968_s12 + $0x70] sm:$0xff]  ;;  %v11364_v57 = vld [vmem:[%s16968_s12 + $0xf8] sm:$0xff]  ;;  %v11340_v58 = vld [vmem:[%s16968_s12 + $0x68] sm:$0xff] }
  0x28   : > { %12919 = vmatmul.mubr.msk.f32.gmra.mxu0 %vm891_vm0, %v14657_v10  ;;  %12988 = vmatprep.subr.mxu0 %v11350_v29  ;;  %v11363_v59 = vld [vmem:[%s16968_s12 + $0xf0] sm:$0xff]  ;;  %v11339_v60 = vld [vmem:[%s16968_s12 + $0x60] sm:$0xff]  ;;  %v11360_v62 = vld [vmem:[%s16968_s12 + $0xe8] sm:$0xff] }
  0x29   : > { %12921 = vmatprep.mubr.msk.f32.mxu0 %vm891_vm0, %v14662_v11  ;;  %12989 = vmatpush3.msra.mxu0 %v11350_v29  ;;  %v11359_v63 = vld [vmem:[%s16968_s12 + $0xe0] sm:$0xff]  ;;  %v11384_v1 = vld [vmem:[%s16968_s12 + $0x178] sm:$0xff]  ;;  %v11383_v3 = vld [vmem:[%s16968_s12 + $0x170] sm:$0xff] }
  0x2a   : > { %12990 = vmatprep.subr.mxu0 %v11349_v30  ;;  %v11358_v2 = vld [vmem:[%s16968_s12 + $0xd8] sm:$0xff]  ;;  %v11357_v6 = vld [vmem:[%s16968_s12 + $0xd0] sm:$0xff]  ;;  %v11382_v23 = vld [vmem:[%s16968_s12 + $0x168] sm:$0xff] }
  0x2b   : > { %12991 = vmatpush3.msra.mxu0 %v11349_v30  ;;  %v11356_v24 = vld [vmem:[%s16968_s12 + $0xc8] sm:$0xff]  ;;  %v11355_v27 = vld [vmem:[%s16968_s12 + $0xc0] sm:$0xff]  ;;  %v11380_v28 = vld [vmem:[%s16968_s12 + $0x158] sm:$0xff] }
  0x2c   : > { %12922 = vmatmul.mubr.msk.f32.gmra.mxu0 %vm891_vm0, %v14671_v12  ;;  %12992 = vmatprep.subr.mxu0 %v11348_v31  ;;  %v11376_v29 = vld [vmem:[%s16968_s12 + $0x148] sm:$0xff] }
  0x2d   : > { %12924 = vmatprep.mubr.msk.f32.mxu0 %vm891_vm0, %v14676_v13  ;;  %12993 = vmatpush3.msra.mxu0 %v11348_v31  ;;  %v11375_v31 = vld [vmem:[%s16968_s12 + $0x140] sm:$0xff] }
  0x2e   : > { %12994 = vmatprep.subr.mxu0 %v11347_v32 }
  0x2f   : > { %12995 = vmatpush3.msra.mxu0 %v11347_v32  ;;  %v11379_v32 = vld [vmem:[%s16968_s12 + $0x150] sm:$0xff] }
  0x30   : > { %12925 = vmatmul.mubr.msk.f32.gmra.mxu0 %vm891_vm0, %v14685_v14  ;;  %13014 = vmatprep.subr.mxu0 %v11368_v33 }
  0x31   : > { %12927 = vmatprep.mubr.msk.f32.mxu0 %vm891_vm0, %v14690_v15 }
  0x34   : > { %12928 = vmatmul.mubr.msk.f32.gmra.mxu0 %vm891_vm0, %v14699_v16 }
  0x35   : > { %12930 = vmatprep.mubr.msk.f32.mxu0 %vm891_vm0, %v14704_v17 }
  0x38   : > { %12931 = vmatmul.mubr.msk.f32.gmra.mxu0 %vm891_vm0, %v14713_v18 }
  0x39   : > { %12933 = vmatprep.mubr.msk.f32.mxu0 %vm891_vm0, %v14718_v19 }
  0x3c   : > { %12934 = vmatmul.mubr.msk.f32.gmra.mxu0 %vm891_vm0, %v14727_v20 }
  0x3d   : > { %12936 = vmatprep.mubr.msk.f32.mxu0 %vm891_vm0, %v14732_v21 }
  0x40   : > { %12937 = vmatmul.mubr.msk.f32.gmra.mxu0 %vm891_vm0, %v14741_v22 }
  0xe0   : > { %v12914_v34 = vpop.f32.mrf.mxu0 }
  0xe2   : > { %v1012_v35 = vpop.f32.mrf.mxu0 }
  0xe4   : > { %v12917_v36 = vpop.f32.mrf.mxu0 }
  0xe6   : > { %v1022_v37 = vpop.f32.mrf.mxu0 }
  0xe7   : > { %12951 = vmatprep.mubr.msk.f32.mxu1 %vm1114_vm1, %v1022_v37 }
  0xe8   : > { %12952 = vmatmul.mubr.msk.f32.vlgmr.msra.gmra.mxu1 %vm1114_vm1, %v12917_v36  ;;  %v14783_v39 = vpop.f32.mrf.mxu0  ;;  %v11372_v36 = vld [vmem:[%s16968_s12 + $0x128] sm:$0xff] }
  0xe9   : > { %12955 = vmatpush3.msra.mxu1 %v1106_v26  ;;  %12966 = vmatprep.mubr.msk.f32.mxu1 %vm1114_vm1, %v1012_v35  ;;  %v11381_v26 = vld [vmem:[%s16968_s12 + $0x160] sm:$0xff]  ;;  %v11373_v35 = vld [vmem:[%s16968_s12 + $0x130] sm:$0xff] }
  0xea   : > { %12956 = vmatprep.subr.mxu1 %v1105_v38  ;;  %v1032_v41 = vpop.f32.mrf.mxu0 }
  0xeb   : > { %12957 = vmatpush3.msra.mxu1 %v1105_v38  ;;  %v11371_v38 = vld [vmem:[%s16968_s12 + $0x120] sm:$0xff] }
  0xec   : > { %12958 = vmatprep.subr.mxu1 %v1104_v40  ;;  %v12923_v43 = vpop.f32.mrf.mxu0 }
  0xed   : > { %12959 = vmatpush3.msra.mxu1 %v1104_v40 }
  0xee   : > { %12960 = vmatprep.subr.mxu1 %v1103_v42  ;;  %v1042_v45 = vpop.f32.mrf.mxu0 }
  0xef   : > { %12961 = vmatpush3.msra.mxu1 %v1103_v42  ;;  %12996 = vmatprep.mubr.msk.f32.mxu0 %vm1114_vm1, %v1042_v45  ;;  %v11389_v42 = vld [vmem:[%s16968_s12 + $0x190] sm:$0xff]  ;;  %v11421_v45 = vld [vmem:[%s16969_s7 + $0x78] sm:$0xff] }
  0xf0   : > { %12962 = vmatprep.subr.mxu1 %v1102_v44  ;;  %12997 = vmatmul.mubr.msk.f32.vlgmr.msra.gmra.mxu0 %vm1114_vm1, %v12923_v43  ;;  %v14803_v48 = vpop.f32.mrf.mxu0  ;;  %v11388_v43 = vld [vmem:[%s16968_s12 + $0x188] sm:$0xff] }
  0xf1   : > { %12963 = vmatpush3.msra.mxu1 %v1102_v44  ;;  %13015 = vmatpush3.msra.mxu0 %v11368_v33  ;;  %v11374_v33 = vld [vmem:[%s16968_s12 + $0x138] sm:$0xff]  ;;  %v11387_v44 = vld [vmem:[%s16968_s12 + $0x180] sm:$0xff] }
  0xf2   : > { %12964 = vmatprep.subr.mxu1 %v1101_v46  ;;  %13016 = vmatprep.subr.mxu0 %v11367_v47  ;;  %v1052_v52 = vpop.f32.mrf.mxu0 }
  0xf3   : > { %12965 = vmatpush3.msra.mxu1 %v1101_v46  ;;  %13017 = vmatpush3.msra.mxu0 %v11367_v47  ;;  %v11420_v46 = vld [vmem:[%s16969_s7 + $0x70] sm:$0xff]  ;;  %v11419_v47 = vld [vmem:[%s16969_s7 + $0x68] sm:$0xff] }
  0xf4   : > { %12967 = vmatmul.mubr.msk.f32.vlgmr.msra.gmra.mxu1 %vm1114_vm1, %v12914_v34  ;;  %12969 = vmatprep.subr.mxu1 %v11344_v49  ;;  %v12929_v56 = vpop.f32.mrf.mxu0 }
  0xf5   : > { %12970 = vmatpush3.msra.mxu1 %v11344_v49  ;;  %12981 = vmatprep.mubr.msk.f32.mxu1 %vm1114_vm1, %v1032_v41  ;;  %v11391_v41 = vld [vmem:[%s16968_s12 + $0x1a0] sm:$0xff]  ;;  %v11417_v49 = vld [vmem:[%s16969_s7 + $0x58] sm:$0xff] }
  0xf6   : > { %12971 = vmatprep.subr.mxu1 %v11343_v50  ;;  %13018 = vmatprep.subr.mxu0 %v11366_v51  ;;  %v1062_v61 = vpop.f32.mrf.mxu0 }
  0xf7   : > { %12972 = vmatpush3.msra.mxu1 %v11343_v50  ;;  %13019 = vmatpush3.msra.mxu0 %v11366_v51 }
  0xf8   : > { %12973 = vmatprep.subr.mxu1 %v11342_v53  ;;  %13020 = vmatprep.subr.mxu0 %v11365_v54  ;;  %v12932_v4 = vpop.f32.mrf.mxu0 }
  0xf9   : > { %12974 = vmatpush3.msra.mxu1 %v11342_v53  ;;  %13021 = vmatpush3.msra.mxu0 %v11365_v54 }
  0xfa   : > { %12975 = vmatprep.subr.mxu1 %v11341_v55  ;;  %13022 = vmatprep.subr.mxu0 %v11364_v57  ;;  %v1072_v25 = vpop.f32.mrf.mxu0 }
  0xfb   : > { %12976 = vmatpush3.msra.mxu1 %v11341_v55  ;;  %13023 = vmatpush3.msra.mxu0 %v11364_v57 }
  0xfc   : > { %12977 = vmatprep.subr.mxu1 %v11340_v58  ;;  %13024 = vmatprep.subr.mxu0 %v11363_v59  ;;  %v12935_v30 = vpop.f32.mrf.mxu0 }
  0xfd   : > { %12978 = vmatpush3.msra.mxu1 %v11340_v58  ;;  %13025 = vmatpush3.msra.mxu0 %v11363_v59 }
  0xfe   : > { %12979 = vmatprep.subr.mxu1 %v11339_v60  ;;  %13026 = vmatprep.mubr.msk.f32.mxu0 %vm1114_vm1, %v1062_v61  ;;  %v1082_v34 = vpop.f32.mrf.mxu0 }
  0xff   : > { %12980 = vmatpush3.msra.mxu1 %v11339_v60  ;;  %13027 = vmatmul.mubr.msk.f32.vlgmr.msra.gmra.mxu0 %vm1114_vm1, %v12929_v56 }
 0x100   : > { %12982 = vmatmul.mubr.msk.f32.vlgmr.msra.gmra.mxu1 %vm1114_vm1, %v14783_v39  ;;  %12999 = vmatprep.subr.mxu1 %v11360_v62  ;;  %v12938_v37 = vpop.f32.mrf.mxu0  ;;  %v11392_v39 = vld [vmem:[%s16968_s12 + $0x1a8] sm:$0xff] }
 0x101   : > { %13000 = vmatpush3.msra.mxu1 %v11360_v62  ;;  %13011 = vmatprep.mubr.msk.f32.mxu1 %vm1114_vm1, %v1052_v52 }
 0x102   : > { %13001 = vmatprep.subr.mxu1 %v11359_v63  ;;  %13044 = vmatprep.subr.mxu0 %v11384_v1  ;;  %v1092_v40 = vpop.f32.mrf.mxu0 }
 0x103   : > { %13002 = vmatpush3.msra.mxu1 %v11359_v63  ;;  %13045 = vmatpush3.msra.mxu0 %v11384_v1 }
 0x104   : > { %13003 = vmatprep.subr.mxu1 %v11358_v2  ;;  %13046 = vmatprep.subr.mxu0 %v11383_v3 }
 0x105   : > { %13004 = vmatpush3.msra.mxu1 %v11358_v2  ;;  %13047 = vmatpush3.msra.mxu0 %v11383_v3 }
 0x106   : > { %13005 = vmatprep.subr.mxu1 %v11357_v6  ;;  %13048 = vmatprep.subr.mxu0 %v11382_v23 }
 0x107   : > { %13006 = vmatpush3.msra.mxu1 %v11357_v6  ;;  %13049 = vmatpush3.msra.mxu0 %v11382_v23 }
 0x108   : > { %13007 = vmatprep.subr.mxu1 %v11356_v24  ;;  %13050 = vmatprep.subr.mxu0 %v11381_v26 }
 0x109   : > { %13008 = vmatpush3.msra.mxu1 %v11356_v24  ;;  %13051 = vmatpush3.msra.mxu0 %v11381_v26 }
 0x10a   : > { %13009 = vmatprep.subr.mxu1 %v11355_v27  ;;  %13052 = vmatprep.subr.mxu0 %v11380_v28 }
 0x10b   : > { %13010 = vmatpush3.msra.mxu1 %v11355_v27  ;;  %13053 = vmatpush3.msra.mxu0 %v11380_v28 }
 0x10c   : > { %13012 = vmatmul.mubr.msk.f32.vlgmr.msra.gmra.mxu1 %vm1114_vm1, %v14803_v48  ;;  %13029 = vmatprep.subr.mxu1 %v11376_v29  ;;  %v11418_v48 = vld [vmem:[%s16969_s7 + $0x60] sm:$0xff] }
 0x10d   : > { %13030 = vmatpush3.msra.mxu1 %v11376_v29  ;;  %13041 = vmatprep.mubr.msk.f32.mxu1 %vm1114_vm1, %v1072_v25 }
 0x10e   : > { %13031 = vmatprep.subr.mxu1 %v11375_v31  ;;  %13054 = vmatprep.subr.mxu0 %v11379_v32 }
 0x10f   : > { %13032 = vmatpush3.msra.mxu1 %v11375_v31  ;;  %13055 = vmatpush3.msra.mxu0 %v11379_v32 }
 0x110   : > { %13033 = vmatprep.subr.mxu1 %v11374_v33  ;;  %13056 = vmatprep.mubr.msk.f32.mxu0 %vm1114_vm1, %v1082_v34  ;;  %v11395_v34 = vld [vmem:[%s16970_s1] ss:$0 sm:$0xff]  ;;  %s16977_s1 = sld [smem:[#allocation13_spill]] }
 0x111   : > { %13034 = vmatpush3.msra.mxu1 %v11374_v33  ;;  %13057 = vmatmul.mubr.msk.f32.vlgmr.msra.gmra.mxu0 %vm1114_vm1, %v12935_v30 }
 0x112   : > { %13035 = vmatprep.subr.mxu1 %v11373_v35  ;;  %13078 = vmatprep.mubr.msk.f32.mxu0 %vm891_vm0, %v14607_v0  ;;  %v11390_v0 = vld [vmem:[%s16968_s12 + $0x198] sm:$0xff] }
 0x113   : > { %13036 = vmatpush3.msra.mxu1 %v11373_v35 }
 0x114   : > { %13037 = vmatprep.subr.mxu1 %v11372_v36 }
 0x115   : > { %13038 = vmatpush3.msra.mxu1 %v11372_v36 }
 0x116   : > { %13039 = vmatprep.subr.mxu1 %v11371_v38 }
 0x117   : > { %13040 = vmatpush3.msra.mxu1 %v11371_v38 }
 0x118   : > { %13042 = vmatmul.mubr.msk.f32.vlgmr.msra.gmra.mxu1 %vm1114_vm1, %v12932_v4  ;;  %13059 = vmatprep.subr.mxu1 %v11392_v39 }
 0x119   : > { %13060 = vmatpush3.msra.mxu1 %v11392_v39  ;;  %13071 = vmatprep.mubr.msk.f32.mxu1 %vm1114_vm1, %v1092_v40 }
 0x11a   : > { %13061 = vmatprep.subr.mxu1 %v11391_v41 }
 0x11b   : > { %13062 = vmatpush3.msra.mxu1 %v11391_v41 }
 0x11c   : > { %13063 = vmatprep.subr.mxu1 %v11390_v0 }
 0x11d   : > { %13064 = vmatpush3.msra.mxu1 %v11390_v0 }
 0x11e   : > { %13065 = vmatprep.subr.mxu1 %v11389_v42 }
 0x11f   : > { %13066 = vmatpush3.msra.mxu1 %v11389_v42  ;;  %v2080_v42 = vld [vmem:[%s16969_s7 + $0x38] sm:$0xff] }
 0x120   : > { %13067 = vmatprep.subr.mxu1 %v11388_v43 }
 0x121   : > { %13068 = vmatpush3.msra.mxu1 %v11388_v43  ;;  %v2079_v43 = vld [vmem:[%s16969_s7 + $0x30] sm:$0xff] }
 0x122   : > { %13069 = vmatprep.subr.mxu1 %v11387_v44 }
 0x123   : > { %13070 = vmatpush3.msra.mxu1 %v11387_v44  ;;  %v2078_v44 = vld [vmem:[%s16969_s7 + $0x28] sm:$0xff] }
 0x124   : > { %13072 = vmatmul.mubr.msk.f32.vlgmr.msra.gmra.mxu1 %vm1114_vm1, %v12938_v37  ;;  %13105 = vmatprep.subr.mxu1 %v11421_v45 }
 0x125   : > { %13106 = vmatpush3.msra.mxu1 %v11421_v45  ;;  %v2077_v45 = vld [vmem:[%s16969_s7 + $0x20] sm:$0xff] }
 0x126   : > { %13107 = vmatprep.subr.mxu1 %v11420_v46 }
 0x127   : > { %13108 = vmatpush3.msra.mxu1 %v11420_v46 }
 0x128   : > { %13109 = vmatprep.subr.mxu1 %v11419_v47 }
 0x129   : > { %13110 = vmatpush3.msra.mxu1 %v11419_v47  ;;  %v11431_v47 = vld [vmem:[%s16969_s7 + $0xa8] sm:$0xff] }
 0x12a   : > { %13111 = vmatprep.subr.mxu1 %v11418_v48 }
 0x12b   : > { %13112 = vmatpush3.msra.mxu1 %v11418_v48  ;;  %v11439_v48 = vld [vmem:[%s16969_s7 + $0xd8] sm:$0xff] }
 0x12c   : > { %13113 = vmatprep.subr.mxu1 %v11417_v49 }
 0x12d   : > { %13114 = vmatpush3.msra.mxu1 %v11417_v49 }
 0x1a8   : > { %v12953_v50 = vpop.f32.mrf.mxu1 }
 0x1aa   : > { %v1187_v51 = vpop.f32.mrf.mxu1 }
 0x1b0   : > { %v12998_v57 = vpop.f32.mrf.mxu0 }
 0x1b2   : > { %v1446_v62 = vpop.f32.mrf.mxu0 }
 0x1b4   : > { %v12968_v52 = vpop.f32.mrf.mxu1 }
 0x1b5   : > { %v1274_v55 = vadd.f32 %v12968_v52, %v12953_v50  ;;  %v11430_v50 = vld [vmem:[%s16969_s7 + $0xa0] sm:$0xff]  ;;  %v11429_v52 = vld [vmem:[%s16969_s7 + $0x98] sm:$0xff] }
 0x1b6   : > { %v1268_v53 = vpop.f32.mrf.mxu1 }
 0x1b7   : > { %v1269_v58 = vadd.f32 %v1268_v53, %v1187_v51  ;;  %v11438_v51 = vld [vmem:[%s16969_s7 + $0xd0] sm:$0xff] }
 0x1bf   : > { %v13028_v2 = vpop.f32.mrf.mxu0 }
 0x1c0   : > { %v12983_v54 = vpop.f32.mrf.mxu1 }
 0x1c1   : > { %v1366_v59 = vadd.f32 %v12983_v54, %v1274_v55  ;;  %v1626_v24 = vpop.f32.mrf.mxu0  ;;  %v11437_v54 = vld [vmem:[%s16969_s7 + $0xc8] sm:$0xff]  ;;  %v11428_v55 = vld [vmem:[%s16969_s7 + $0x90] sm:$0xff] }
 0x1c2   : > { %v1356_v56 = vpop.f32.mrf.mxu1 }
 0x1c3   : > { %v1365_v61 = vadd.f32 %v1356_v56, %v1269_v58  ;;  %v1456_v63 = vadd.f32 %v12998_v57, %v1366_v59  ;;  %v11436_v56 = vld [vmem:[%s16969_s7 + $0xc0] sm:$0xff]  ;;  %v11427_v57 = vld [vmem:[%s16969_s7 + $0x88] sm:$0xff] }
 0x1c4   : > { %v11426_v59 = vld [vmem:[%s16969_s7 + $0x80] sm:$0xff] }
 0x1c5   : > { %v1455_v3 = vadd.f32 %v1446_v62, %v1365_v61  ;;  %v11453_v61 = vld [vmem:[%s16969_s7 + $0x138] sm:$0xff]  ;;  %v11452_v62 = vld [vmem:[%s16969_s7 + $0x130] sm:$0xff] }
 0x1cc   : > { %v13013_v60 = vpop.f32.mrf.mxu1 }
 0x1cd   : > { %v1546_v4 = vadd.f32 %v13013_v60, %v1456_v63  ;;  %v11463_v60 = vld [vmem:[%s16969_s7 + $0x178] sm:$0xff]  ;;  %v11462_v63 = vld [vmem:[%s16969_s7 + $0x170] sm:$0xff] }
 0x1ce   : > { %v1536_v1 = vpop.f32.mrf.mxu1 }
 0x1cf   : > { %v1545_v23 = vadd.f32 %v1536_v1, %v1455_v3  ;;  %v1636_v25 = vadd.f32 %v13028_v2, %v1546_v4  ;;  %v11451_v1 = vld [vmem:[%s16969_s7 + $0x128] sm:$0xff]  ;;  %v11450_v4 = vld [vmem:[%s16969_s7 + $0x120] sm:$0xff] }
 0x1d0   : > { %v11461_v2 = vld [vmem:[%s16969_s7 + $0x168] sm:$0xff] }
 0x1d1   : > { %v13058_v27 = vpop.f32.mrf.mxu0  ;;  %v1635_v28 = vadd.f32 %v1626_v24, %v1545_v23  ;;  %v11449_v23 = vld [vmem:[%s16969_s7 + $0x118] sm:$0xff] }
 0x1d2   : > { %v11459_v24 = vld [vmem:[%s16969_s7 + $0x158] sm:$0xff] }
 0x1d3   : > { %v1806_v31 = vpop.f32.mrf.mxu0 }
 0x1d8   : > { %v13043_v6 = vpop.f32.mrf.mxu1 }
 0x1d9   : > { %v1726_v29 = vadd.f32 %v13043_v6, %v1636_v25  ;;  %v11460_v6 = vld [vmem:[%s16969_s7 + $0x160] sm:$0xff] }
 0x1da   : > { %v1716_v26 = vpop.f32.mrf.mxu1 }
 0x1db   : > { %v1725_v30 = vadd.f32 %v1716_v26, %v1635_v28  ;;  %v1816_v32 = vadd.f32 %v13058_v27, %v1726_v29  ;;  %v11448_v26 = vld [vmem:[%s16969_s7 + $0x110] sm:$0xff]  ;;  %v11447_v28 = vld [vmem:[%s16969_s7 + $0x108] sm:$0xff] }
 0x1dc   : > { %v11458_v27 = vld [vmem:[%s16969_s7 + $0x150] sm:$0xff] }
 0x1dd   : > { %v1815_v35 = vadd.f32 %v1806_v31, %v1725_v30  ;;  %v11457_v30 = vld [vmem:[%s16969_s7 + $0x148] sm:$0xff]  ;;  %v11446_v31 = vld [vmem:[%s16969_s7 + $0x100] sm:$0xff] }
 0x1e4   : > { %v13073_v33 = vpop.f32.mrf.mxu1 }
 0x1e5   : > { %v1906_v36 = vadd.f32 %v13073_v33, %v1816_v32  ;;  %v11456_v32 = vld [vmem:[%s16969_s7 + $0x140] sm:$0xff]  ;;  %v11473_v33 = vld [vmem:[%s16969_s7 + $0x1b8] sm:$0xff] }
 0x1e6   : > { %v1896_v37 = vpop.f32.mrf.mxu1 }
 0x1e7   : > { %v1915_v38 = vadd.f32 %v11395_v34, %v1906_v36  ;;  %v1905_v39 = vadd.f32 %v1896_v37, %v1815_v35  ;;  %v11472_v35 = vld [vmem:[%s16969_s7 + $0x1b0] sm:$0xff]  ;;  %v11483_v36 = vld [vmem:[%s16969_s7 + $0x1f8] sm:$0xff] }
 0x1e9   : > { %v1917_v40 = vmax.f32 %v1915_v38, 0.0  ;;  %v1914_v41 = vadd.f32 %v11395_v34, %v1905_v39  ;;  %v11471_v38 = vld [vmem:[%s16969_s7 + $0x1a8] sm:$0xff]  ;;  %v11482_v39 = vld [vmem:[%s16969_s7 + $0x1f0] sm:$0xff] }
 0x1eb   : > { %13074 = vmatprep.subr.mxu0 %v1917_v40  ;;  %v1916_v0 = vmax.f32 %v1914_v41, 0.0  ;;  %v11481_v41 = vld [vmem:[%s16969_s7 + $0x1e8] sm:$0xff] }
 0x1ec   : > { %13075 = vmatpush3.msra.mxu0 %v1917_v40  ;;  %v11470_v40 = vld [vmem:[%s16969_s7 + $0x1a0] sm:$0xff] }
 0x1ed   : > { %13076 = vmatprep.subr.mxu0 %v1916_v0 }
 0x1ee   : > { %13077 = vmatpush3.msra.mxu0 %v1916_v0 }
 0x1ef   : > { %13079 = vmatmul.mubr.msk.f32.vlgmr.msra.gmra.mxu0 %vm891_vm0, %v14626_v5  ;;  %13124 = vmatprep.subr.mxu0 %v2080_v42  ;;  %v2076_v5 = vld [vmem:[%s16969_s7 + $0x18] sm:$0xff] }
 0x1f0   : > { %13081 = vmatprep.mubr.msk.f32.mxu0 %vm891_vm0, %v14634_v7  ;;  %13125 = vmatpush3.msra.mxu0 %v2080_v42  ;;  %v2075_v7 = vld [vmem:[%s16969_s7 + $0x10] sm:$0xff]  ;;  %v11469_v42 = vld [vmem:[%s16969_s7 + $0x198] sm:$0xff] }
 0x1f1   : > { %13126 = vmatprep.subr.mxu0 %v2079_v43 }
 0x1f2   : > { %13127 = vmatpush3.msra.mxu0 %v2079_v43  ;;  %v11480_v43 = vld [vmem:[%s16969_s7 + $0x1e0] sm:$0xff] }
 0x1f3   : > { %13082 = vmatmul.mubr.msk.f32.gmra.mxu0 %vm891_vm0, %v14643_v8  ;;  %13128 = vmatprep.subr.mxu0 %v2078_v44  ;;  %v2074_v8 = vld [vmem:[%s16969_s7 + $0x8] sm:$0xff] }
 0x1f4   : > { %13084 = vmatprep.mubr.msk.f32.mxu0 %vm891_vm0, %v14648_v9  ;;  %13129 = vmatpush3.msra.mxu0 %v2078_v44  ;;  %v11416_v9 = vld [vmem:[%s16969_s7 + $0x50] sm:$0xff] }
 0x1f5   : > { %13130 = vmatprep.subr.mxu0 %v2077_v45  ;;  %13115 = vmatprep.subr.mxu1 %v11416_v9  ;;  %v11468_v44 = vld [vmem:[%s16969_s7 + $0x190] sm:$0xff] }
 0x1f6   : > { %13131 = vmatpush3.msra.mxu0 %v2077_v45  ;;  %13116 = vmatpush3.msra.mxu1 %v11416_v9  ;;  %v11479_v45 = vld [vmem:[%s16969_s7 + $0x1d8] sm:$0xff]  ;;  %v11466_v9 = vld [vmem:[%s16969_s7 + $0x180] sm:$0xff] }
 0x1f7   : > { %13085 = vmatmul.mubr.msk.f32.gmra.mxu0 %vm891_vm0, %v14657_v10  ;;  %13132 = vmatprep.subr.mxu0 %v2076_v5  ;;  %v2073_v10 = vld [vmem:[%s16969_s7] sm:$0xff] }
 0x1f8   : > { %13087 = vmatprep.mubr.msk.f32.mxu0 %vm891_vm0, %v14662_v11  ;;  %13133 = vmatpush3.msra.mxu0 %v2076_v5  ;;  %v11415_v11 = vld [vmem:[%s16969_s7 + $0x48] sm:$0xff] }
 0x1f9   : > { %13134 = vmatprep.subr.mxu0 %v2075_v7  ;;  %13117 = vmatprep.subr.mxu1 %v11415_v11 }
 0x1fa   : > { %13135 = vmatpush3.msra.mxu0 %v2075_v7  ;;  %13118 = vmatpush3.msra.mxu1 %v11415_v11  ;;  %v11467_v7 = vld [vmem:[%s16969_s7 + $0x188] sm:$0xff] }
 0x1fb   : > { %13088 = vmatmul.mubr.msk.f32.gmra.mxu0 %vm891_vm0, %v14671_v12  ;;  %13136 = vmatprep.subr.mxu0 %v2074_v8  ;;  %v11414_v12 = vld [vmem:[%s16969_s7 + $0x40] sm:$0xff]  ;;  %v11477_v11 = vld [vmem:[%s16969_s7 + $0x1c8] sm:$0xff] }
 0x1fc   : > { %13090 = vmatprep.mubr.msk.f32.mxu0 %vm891_vm0, %v14676_v13  ;;  %13137 = vmatpush3.msra.mxu0 %v2074_v8  ;;  %v11433_v13 = vld [vmem:[%s16969_s7 + $0xb8] sm:$0xff]  ;;  %v11478_v8 = vld [vmem:[%s16969_s7 + $0x1d0] sm:$0xff] }
 0x1fd   : > { %13138 = vmatprep.subr.mxu0 %v2073_v10  ;;  %13119 = vmatprep.subr.mxu1 %v11414_v12 }
 0x1fe   : > { %13139 = vmatpush3.msra.mxu0 %v2073_v10  ;;  %13120 = vmatpush3.msra.mxu1 %v11414_v12 }
 0x1ff   : > { %13091 = vmatmul.mubr.msk.f32.gmra.mxu0 %vm891_vm0, %v14685_v14  ;;  %13143 = vmatprep.subr.mxu1 %v11433_v13  ;;  %v11443_v14 = vld [vmem:[%s16969_s7 + $0xf8] sm:$0xff] }
 0x200   : > { %13093 = vmatprep.mubr.msk.f32.mxu0 %vm891_vm0, %v14690_v15  ;;  %13162 = vmatprep.subr.mxu0 %v11443_v14 }
 0x203   : > { %13094 = vmatmul.mubr.msk.f32.gmra.mxu0 %vm891_vm0, %v14699_v16 }
 0x204   : > { %13096 = vmatprep.mubr.msk.f32.mxu0 %vm891_vm0, %v14704_v17  ;;  %v11442_v17 = vld [vmem:[%s16969_s7 + $0xf0] sm:$0xff] }
 0x207   : > { %13097 = vmatmul.mubr.msk.f32.gmra.mxu0 %vm891_vm0, %v14713_v18 }
 0x208   : > { %13099 = vmatprep.mubr.msk.f32.mxu0 %vm891_vm0, %v14718_v19  ;;  %v11441_v19 = vld [vmem:[%s16969_s7 + $0xe8] sm:$0xff] }
 0x20b   : > { %13100 = vmatmul.mubr.msk.f32.gmra.mxu0 %vm891_vm0, %v14727_v20 }
 0x20c   : > { %13102 = vmatprep.mubr.msk.f32.mxu0 %vm891_vm0, %v14732_v21  ;;  %v11432_v21 = vld [vmem:[%s16969_s7 + $0xb0] sm:$0xff] }
 0x20f   : > { %13103 = vmatmul.mubr.msk.f32.gmra.mxu0 %vm891_vm0, %v14741_v22  ;;  %v11440_v22 = vld [vmem:[%s16969_s7 + $0xe0] sm:$0xff] }
 0x2af   : > { %v13080_v15 = vpop.f32.mrf.mxu0 }
 0x2b1   : > { %v1984_v16 = vpop.f32.mrf.mxu0 }
 0x2b2   : > { %13140 = vmatprep.mubr.msk.f32.mxu0 %vm2090_vm2, %v1984_v16 }
 0x2b3   : > { %v13083_v18 = vpop.f32.mrf.mxu0  ;;  %13141 = vmatmul.mubr.msk.f32.vlgmr.msra.gmra.mxu0 %vm2090_vm2, %v13080_v15  ;;  %v11492_v15 = vld [vmem:[%s16969_s7 + $0x230] sm:$0xff] }
 0x2b4   : > { %13163 = vmatpush3.msra.mxu0 %v11443_v14  ;;  %v11493_v14 = vld [vmem:[%s16969_s7 + $0x238] sm:$0xff] }
 0x2b5   : > { %v1994_v20 = vpop.f32.mrf.mxu0  ;;  %13164 = vmatprep.subr.mxu0 %v11442_v17 }
 0x2b6   : > { %13121 = vmatprep.mubr.msk.f32.mxu1 %vm2090_vm2, %v1994_v20  ;;  %13165 = vmatpush3.msra.mxu0 %v11442_v17  ;;  %v11491_v17 = vld [vmem:[%s16969_s7 + $0x228] sm:$0xff]  ;;  %v11489_v20 = vld [vmem:[%s16969_s7 + $0x218] sm:$0xff] }
 0x2b7   : > { %13122 = vmatmul.mubr.msk.f32.vlgmr.msra.gmra.mxu1 %vm2090_vm2, %v13083_v18  ;;  %13166 = vmatprep.subr.mxu0 %v11441_v19  ;;  %v13086_v46 = vpop.f32.mrf.mxu0  ;;  %v11490_v18 = vld [vmem:[%s16969_s7 + $0x220] sm:$0xff] }
 0x2b8   : > { %13144 = vmatpush3.msra.mxu1 %v11433_v13  ;;  %13167 = vmatpush3.msra.mxu0 %v11441_v19  ;;  %v11476_v13 = vld [vmem:[%s16969_s7 + $0x1c0] sm:$0xff] }
 0x2b9   : > { %13145 = vmatprep.subr.mxu1 %v11432_v21  ;;  %13168 = vmatprep.subr.mxu0 %v11440_v22  ;;  %v2004_v49 = vpop.f32.mrf.mxu0  ;;  %v15185_v19 = vld [vmem:[%s16966_s3] sm:$0xff] }
 0x2ba   : > { %13146 = vmatpush3.msra.mxu1 %v11432_v21  ;;  %13169 = vmatpush3.msra.mxu0 %v11440_v22  ;;  %v11488_v21 = vld [vmem:[%s16969_s7 + $0x210] sm:$0xff]  ;;  %v11487_v22 = vld [vmem:[%s16969_s7 + $0x208] sm:$0xff] }
 0x2bb   : > { %13147 = vmatprep.subr.mxu1 %v11431_v47  ;;  %13170 = vmatprep.subr.mxu0 %v11439_v48  ;;  %v13089_v53 = vpop.f32.mrf.mxu0 }
 0x2bc   : > { %13148 = vmatpush3.msra.mxu1 %v11431_v47  ;;  %13171 = vmatpush3.msra.mxu0 %v11439_v48  ;;  %v11518_v47 = vld [vmem:[%s16971_s2 + $0x38] sm:$0xff] }
 0x2bd   : > { %13149 = vmatprep.subr.mxu1 %v11430_v50  ;;  %13172 = vmatprep.subr.mxu0 %v11438_v51  ;;  %v2014_v58 = vpop.f32.mrf.mxu0 }
 0x2be   : > { %13150 = vmatpush3.msra.mxu1 %v11430_v50  ;;  %13173 = vmatpush3.msra.mxu0 %v11438_v51 }
 0x2bf   : > { %13151 = vmatprep.subr.mxu1 %v11429_v52  ;;  %13159 = vmatprep.mubr.msk.f32.mxu1 %vm2090_vm2, %v2004_v49  ;;  %v13092_v3 = vpop.f32.mrf.mxu0 }
 0x2c0   : > { %13152 = vmatpush3.msra.mxu1 %v11429_v52  ;;  %13174 = vmatprep.subr.mxu0 %v11437_v54 }
 0x2c1   : > { %13153 = vmatprep.subr.mxu1 %v11428_v55  ;;  %13175 = vmatpush3.msra.mxu0 %v11437_v54  ;;  %v2024_v25 = vpop.f32.mrf.mxu0 }
 0x2c2   : > { %13154 = vmatpush3.msra.mxu1 %v11428_v55  ;;  %13176 = vmatprep.subr.mxu0 %v11436_v56 }
 0x2c3   : > { %13155 = vmatprep.subr.mxu1 %v11427_v57  ;;  %13177 = vmatpush3.msra.mxu0 %v11436_v56  ;;  %v13095_v29 = vpop.f32.mrf.mxu0 }
 0x2c4   : > { %13156 = vmatpush3.msra.mxu1 %v11427_v57  ;;  %13178 = vmatprep.mubr.msk.f32.mxu0 %vm2090_vm2, %v2014_v58 }
 0x2c5   : > { %13157 = vmatprep.subr.mxu1 %v11426_v59  ;;  %13179 = vmatmul.mubr.msk.f32.vlgmr.msra.gmra.mxu0 %vm2090_vm2, %v13089_v53  ;;  %v2034_v34 = vpop.f32.mrf.mxu0 }
 0x2c6   : > { %13158 = vmatpush3.msra.mxu1 %v11426_v59  ;;  %13200 = vmatprep.subr.mxu0 %v11463_v60 }
 0x2c7   : > { %13160 = vmatmul.mubr.msk.f32.vlgmr.msra.gmra.mxu1 %vm2090_vm2, %v13086_v46  ;;  %13181 = vmatprep.subr.mxu1 %v11453_v61  ;;  %v13098_v37 = vpop.f32.mrf.mxu0  ;;  %v11486_v46 = vld [vmem:[%s16969_s7 + $0x200] sm:$0xff] }
 0x2c8   : > { %13182 = vmatpush3.msra.mxu1 %v11453_v61  ;;  %13201 = vmatpush3.msra.mxu0 %v11463_v60 }
 0x2c9   : > { %13183 = vmatprep.subr.mxu1 %v11452_v62  ;;  %13202 = vmatprep.subr.mxu0 %v11462_v63  ;;  %v2044_v0 = vpop.f32.mrf.mxu0 }
 0x2ca   : > { %13184 = vmatpush3.msra.mxu1 %v11452_v62  ;;  %13203 = vmatpush3.msra.mxu0 %v11462_v63 }
 0x2cb   : > { %13185 = vmatprep.subr.mxu1 %v11451_v1  ;;  %13204 = vmatprep.subr.mxu0 %v11461_v2  ;;  %v13101_v5 = vpop.f32.mrf.mxu0 }
 0x2cc   : > { %13186 = vmatpush3.msra.mxu1 %v11451_v1  ;;  %13205 = vmatpush3.msra.mxu0 %v11461_v2 }
 0x2cd   : > { %13187 = vmatprep.subr.mxu1 %v11450_v4  ;;  %13206 = vmatprep.subr.mxu0 %v11460_v6  ;;  %v2054_v10 = vpop.f32.mrf.mxu0 }
 0x2ce   : > { %13188 = vmatpush3.msra.mxu1 %v11450_v4  ;;  %13207 = vmatpush3.msra.mxu0 %v11460_v6 }
 0x2cf   : > { %13189 = vmatprep.subr.mxu1 %v11449_v23  ;;  %13208 = vmatprep.subr.mxu0 %v11459_v24  ;;  %v13104_v12 = vpop.f32.mrf.mxu0 }
 0x2d0   : > { %13190 = vmatpush3.msra.mxu1 %v11449_v23  ;;  %13209 = vmatpush3.msra.mxu0 %v11459_v24 }
 0x2d1   : > { %13191 = vmatprep.subr.mxu1 %v11448_v26  ;;  %13210 = vmatprep.subr.mxu0 %v11458_v27  ;;  %v2064_v16 = vpop.f32.mrf.mxu0 }
 0x2d2   : > { %13192 = vmatpush3.msra.mxu1 %v11448_v26  ;;  %13211 = vmatpush3.msra.mxu0 %v11458_v27 }
 0x2d3   : > { %13193 = vmatprep.subr.mxu1 %v11447_v28  ;;  %13197 = vmatprep.mubr.msk.f32.mxu1 %vm2090_vm2, %v2024_v25 }
 0x2d4   : > { %13194 = vmatpush3.msra.mxu1 %v11447_v28  ;;  %13212 = vmatprep.subr.mxu0 %v11457_v30 }
 0x2d5   : > { %13195 = vmatprep.subr.mxu1 %v11446_v31  ;;  %13213 = vmatpush3.msra.mxu0 %v11457_v30 }
 0x2d6   : > { %13196 = vmatpush3.msra.mxu1 %v11446_v31  ;;  %13214 = vmatprep.subr.mxu0 %v11456_v32 }
 0x2d7   : > { %13198 = vmatmul.mubr.msk.f32.vlgmr.msra.gmra.mxu1 %vm2090_vm2, %v13092_v3  ;;  %13219 = vmatprep.subr.mxu1 %v11473_v33 }
 0x2d8   : > { %13215 = vmatpush3.msra.mxu0 %v11456_v32  ;;  %13216 = vmatprep.mubr.msk.f32.mxu0 %vm2090_vm2, %v2034_v34  ;;  %v11496_v32 = vld [vmem:[%s16972_s5] ss:$0 sm:$0xff]  ;;  %s865_s5 = scalar_lea.vmem %s16942_s27, %s14611_s6 }
 0x2d9   : > { %13220 = vmatpush3.msra.mxu1 %v11473_v33  ;;  %13217 = vmatmul.mubr.msk.f32.vlgmr.msra.gmra.mxu0 %vm2090_vm2, %v13095_v29 }
 0x2da   : > { %13221 = vmatprep.subr.mxu1 %v11472_v35  ;;  %13238 = vmatprep.subr.mxu0 %v11483_v36 }
 0x2db   : > { %13222 = vmatpush3.msra.mxu1 %v11472_v35  ;;  %13239 = vmatpush3.msra.mxu0 %v11483_v36 }
 0x2dc   : > { %13223 = vmatprep.subr.mxu1 %v11471_v38  ;;  %13240 = vmatprep.subr.mxu0 %v11482_v39 }
 0x2dd   : > { %13224 = vmatpush3.msra.mxu1 %v11471_v38  ;;  %13241 = vmatpush3.msra.mxu0 %v11482_v39 }
 0x2de   : > { %13225 = vmatprep.subr.mxu1 %v11470_v40  ;;  %13242 = vmatprep.subr.mxu0 %v11481_v41 }
 0x2df   : > { %13226 = vmatpush3.msra.mxu1 %v11470_v40  ;;  %13243 = vmatpush3.msra.mxu0 %v11481_v41  ;;  %v15211_v41 = vld [vmem:[%s16966_s3 + $0x8] sm:$0xff] }
 0x2e0   : > { %13227 = vmatprep.subr.mxu1 %v11469_v42  ;;  %13244 = vmatprep.subr.mxu0 %v11480_v43 }
 0x2e1   : > { %13228 = vmatpush3.msra.mxu1 %v11469_v42  ;;  %13245 = vmatpush3.msra.mxu0 %v11480_v43  ;;  %v15225_v42 = vld [vmem:[%s16966_s3 + $0x18] sm:$0xff]  ;;  %v15232_v43 = vld [vmem:[%s16966_s3 + $0x20] sm:$0xff] }
 0x2e2   : > { %13229 = vmatprep.subr.mxu1 %v11468_v44  ;;  %13246 = vmatprep.subr.mxu0 %v11479_v45 }
 0x2e3   : > { %13230 = vmatpush3.msra.mxu1 %v11468_v44  ;;  %13247 = vmatpush3.msra.mxu0 %v11479_v45  ;;  %v15239_v44 = vld [vmem:[%s16966_s3 + $0x28] sm:$0xff]  ;;  %v15246_v45 = vld [vmem:[%s16966_s3 + $0x30] sm:$0xff] }
 0x2e4   : > { %13231 = vmatprep.subr.mxu1 %v11467_v7  ;;  %13248 = vmatprep.subr.mxu0 %v11478_v8 }
 0x2e5   : > { %13232 = vmatpush3.msra.mxu1 %v11467_v7  ;;  %13249 = vmatpush3.msra.mxu0 %v11478_v8  ;;  %v15260_v7 = vld [vmem:[%s16966_s3 + $0x40] sm:$0xff]  ;;  %v15267_v8 = vld [vmem:[%s16966_s3 + $0x48] sm:$0xff] }
 0x2e6   : > { %13233 = vmatprep.subr.mxu1 %v11466_v9  ;;  %13235 = vmatprep.mubr.msk.f32.mxu1 %vm2090_vm2, %v2044_v0  ;;  %v15218_v0 = vld [vmem:[%s16966_s3 + $0x10] sm:$0xff] }
 0x2e7   : > { %13250 = vmatprep.subr.mxu0 %v11477_v11  ;;  %13234 = vmatpush3.msra.mxu1 %v11466_v9  ;;  %v15274_v9 = vld [vmem:[%s16966_s3 + $0x50] sm:$0xff] }
 0x2e8   : > { %13251 = vmatpush3.msra.mxu0 %v11477_v11  ;;  %13236 = vmatmul.mubr.msk.f32.vlgmr.msra.gmra.mxu1 %vm2090_vm2, %v13098_v37  ;;  %v15288_v11 = vld [vmem:[%s16966_s3 + $0x60] sm:$0xff] }
 0x2e9   : > { %13252 = vmatprep.subr.mxu0 %v11476_v13  ;;  %13257 = vmatprep.subr.mxu1 %v11493_v14 }
 0x2ea   : > { %13253 = vmatpush3.msra.mxu0 %v11476_v13  ;;  %13254 = vmatprep.mubr.msk.f32.mxu0 %vm2090_vm2, %v2054_v10  ;;  %v15281_v10 = vld [vmem:[%s16966_s3 + $0x58] sm:$0xff]  ;;  %v15302_v13 = vld [vmem:[%s16966_s3 + $0x70] sm:$0xff] }
 0x2eb   : > { %13258 = vmatpush3.msra.mxu1 %v11493_v14  ;;  %13255 = vmatmul.mubr.msk.f32.vlgmr.msra.gmra.mxu0 %vm2090_vm2, %v13101_v5  ;;  %v15253_v5 = vld [vmem:[%s16966_s3 + $0x38] sm:$0xff] }
 0x2ec   : > { %13259 = vmatprep.subr.mxu1 %v11492_v15  ;;  %13273 = vmatprep.mubr.msk.f32.mxu1 %vm2090_vm2, %v2064_v16  ;;  %v15309_v14 = vld [vmem:[%s16966_s3 + $0x78] sm:$0xff]  ;;  %v15323_v16 = vld [vmem:[%s16966_s3 + $0x88] sm:$0xff] }
 0x2ed   : > { %13260 = vmatpush3.msra.mxu1 %v11492_v15  ;;  %13280 = vmatprep.mubr.msk.f32.mxu0 %vm891_vm0, %v15185_v19  ;;  %v15316_v15 = vld [vmem:[%s16966_s3 + $0x80] sm:$0xff] }
 0x2ee   : > { %13261 = vmatprep.subr.mxu1 %v11491_v17 }
 0x2ef   : > { %13262 = vmatpush3.msra.mxu1 %v11491_v17  ;;  %v11517_v17 = vld [vmem:[%s16971_s2 + $0x30] sm:$0xff] }
 0x2f0   : > { %13263 = vmatprep.subr.mxu1 %v11490_v18 }
 0x2f1   : > { %13264 = vmatpush3.msra.mxu1 %v11490_v18  ;;  %v11516_v18 = vld [vmem:[%s16971_s2 + $0x28] sm:$0xff] }
 0x2f2   : > { %13265 = vmatprep.subr.mxu1 %v11489_v20 }
 0x2f3   : > { %13266 = vmatpush3.msra.mxu1 %v11489_v20  ;;  %v11515_v20 = vld [vmem:[%s16971_s2 + $0x20] sm:$0xff] }
 0x2f4   : > { %13267 = vmatprep.subr.mxu1 %v11488_v21 }
 0x2f5   : > { %13268 = vmatpush3.msra.mxu1 %v11488_v21  ;;  %v3066_v21 = vld [vmem:[%s16971_s2 + $0x18] sm:$0xff] }
 0x2f6   : > { %13269 = vmatprep.subr.mxu1 %v11487_v22 }
 0x2f7   : > { %13270 = vmatpush3.msra.mxu1 %v11487_v22  ;;  %v11538_v22 = vld [vmem:[%s16971_s2 + $0x98] sm:$0xff] }
 0x2f8   : > { %13271 = vmatprep.subr.mxu1 %v11486_v46 }
 0x2f9   : > { %13272 = vmatpush3.msra.mxu1 %v11486_v46  ;;  %v11537_v46 = vld [vmem:[%s16971_s2 + $0x90] sm:$0xff] }
 0x2fa   : > { %13274 = vmatmul.mubr.msk.f32.vlgmr.msra.gmra.mxu1 %vm2090_vm2, %v13104_v12  ;;  %13307 = vmatprep.subr.mxu1 %v11518_v47  ;;  %v15295_v12 = vld [vmem:[%s16966_s3 + $0x68] sm:$0xff] }
 0x2fb   : > { %13308 = vmatpush3.msra.mxu1 %v11518_v47  ;;  %v11536_v47 = vld [vmem:[%s16971_s2 + $0x88] sm:$0xff] }
 0x2fc   : > { %13309 = vmatprep.subr.mxu1 %v11517_v17 }
 0x2fd   : > { %13310 = vmatpush3.msra.mxu1 %v11517_v17  ;;  %v11556_v17 = vld [vmem:[%s16971_s2 + $0xf8] sm:$0xff] }
 0x2fe   : > { %13311 = vmatprep.subr.mxu1 %v11516_v18 }
 0x2ff   : > { %13312 = vmatpush3.msra.mxu1 %v11516_v18 }
 0x300   : > { %13313 = vmatprep.subr.mxu1 %v11515_v20 }
 0x301   : > { %13314 = vmatpush3.msra.mxu1 %v11515_v20  ;;  %v11555_v20 = vld [vmem:[%s16971_s2 + $0xf0] sm:$0xff] }
 0x302   : > { %13318 = vmatprep.subr.mxu1 %v3066_v21 }
 0x373   : > { %v13142_v49 = vpop.f32.mrf.mxu0 }
 0x375   : > { %v2244_v52 = vpop.f32.mrf.mxu0 }
 0x377   : > { %v13123_v48 = vpop.f32.mrf.mxu1 }
 0x378   : > { %v2250_v53 = vadd.f32 %v13142_v49, %v13123_v48  ;;  %v11535_v48 = vld [vmem:[%s16971_s2 + $0x80] sm:$0xff]  ;;  %v11550_v49 = vld [vmem:[%s16971_s2 + $0xd8] sm:$0xff] }
 0x379   : > { %v2163_v50 = vpop.f32.mrf.mxu1 }
 0x37a   : > { %v2245_v56 = vadd.f32 %v2244_v52, %v2163_v50 }
 0x385   : > { %v13180_v55 = vpop.f32.mrf.mxu0 }
 0x387   : > { %v13161_v51 = vpop.f32.mrf.mxu1  ;;  %v2426_v60 = vpop.f32.mrf.mxu0 }
 0x388   : > { %v2344_v57 = vadd.f32 %v13161_v51, %v2250_v53 }
 0x389   : > { %v2334_v54 = vpop.f32.mrf.mxu1 }
 0x38a   : > { %v2343_v59 = vadd.f32 %v2334_v54, %v2245_v56  ;;  %v2436_v61 = vadd.f32 %v13180_v55, %v2344_v57  ;;  %v3065_v54 = vld [vmem:[%s16971_s2 + $0x10] sm:$0xff]  ;;  %v3064_v56 = vld [vmem:[%s16971_s2 + $0x8] sm:$0xff] }
 0x38c   : > { %v2435_v1 = vadd.f32 %v2426_v60, %v2343_v59  ;;  %v11526_v60 = vld [vmem:[%s16971_s2 + $0x58] sm:$0xff] }
 0x397   : > { %v13199_v58 = vpop.f32.mrf.mxu1 }
 0x398   : > { %v2528_v2 = vadd.f32 %v13199_v58, %v2436_v61  ;;  %v3063_v58 = vld [vmem:[%s16971_s2] sm:$0xff] }
 0x399   : > { %v2518_v62 = vpop.f32.mrf.mxu1  ;;  %v13218_v63 = vpop.f32.mrf.mxu0 }
 0x39a   : > { %v2527_v4 = vadd.f32 %v2518_v62, %v2435_v1  ;;  %v2620_v23 = vadd.f32 %v13218_v63, %v2528_v2  ;;  %v11525_v62 = vld [vmem:[%s16971_s2 + $0x50] sm:$0xff]  ;;  %v11524_v1 = vld [vmem:[%s16971_s2 + $0x48] sm:$0xff] }
 0x39b   : > { %v2610_v6 = vpop.f32.mrf.mxu0 }
 0x39c   : > { %v2619_v26 = vadd.f32 %v2610_v6, %v2527_v4  ;;  %v11549_v4 = vld [vmem:[%s16971_s2 + $0xd0] sm:$0xff] }
 0x3a8   : > { %v13237_v3 = vpop.f32.mrf.mxu1 }
 0x3a9   : > { %v2712_v27 = vadd.f32 %v13237_v3, %v2620_v23  ;;  %v11523_v3 = vld [vmem:[%s16971_s2 + $0x40] sm:$0xff]  ;;  %v11532_v23 = vld [vmem:[%s16971_s2 + $0x78] sm:$0xff] }
 0x3aa   : > { %v2702_v24 = vpop.f32.mrf.mxu1 }
 0x3ab   : > { %v13256_v25 = vpop.f32.mrf.mxu0  ;;  %v2711_v28 = vadd.f32 %v2702_v24, %v2619_v26  ;;  %v11548_v26 = vld [vmem:[%s16971_s2 + $0xc8] sm:$0xff] }
 0x3ac   : > { %v2804_v30 = vadd.f32 %v13256_v25, %v2712_v27  ;;  %v11531_v25 = vld [vmem:[%s16971_s2 + $0x70] sm:$0xff] }
 0x3ad   : > { %v2794_v29 = vpop.f32.mrf.mxu0 }
 0x3ae   : > { %v2803_v33 = vadd.f32 %v2794_v29, %v2711_v28  ;;  %v11530_v28 = vld [vmem:[%s16971_s2 + $0x68] sm:$0xff]  ;;  %v11547_v29 = vld [vmem:[%s16971_s2 + $0xc0] sm:$0xff] }
 0x3ba   : > { %v13275_v31 = vpop.f32.mrf.mxu1 }
 0x3bb   : > { %v2896_v34 = vadd.f32 %v13275_v31, %v2804_v30  ;;  %v11529_v31 = vld [vmem:[%s16971_s2 + $0x60] sm:$0xff] }
 0x3bc   : > { %v2886_v35 = vpop.f32.mrf.mxu1 }
 0x3bd   : > { %v2905_v36 = vadd.f32 %v11496_v32, %v2896_v34  ;;  %v2895_v37 = vadd.f32 %v2886_v35, %v2803_v33  ;;  %v11543_v34 = vld [vmem:[%s16971_s2 + $0xb0] sm:$0xff]  ;;  %v11562_v35 = vld [vmem:[%s16971_s2 + $0x118] sm:$0xff] }
 0x3bf   : > { %v2907_v38 = vmax.f32 %v2905_v36, 0.0  ;;  %v2904_v39 = vadd.f32 %v11496_v32, %v2895_v37  ;;  %v11544_v32 = vld [vmem:[%s16971_s2 + $0xb8] sm:$0xff]  ;;  %v11542_v36 = vld [vmem:[%s16971_s2 + $0xa8] sm:$0xff] }
 0x3c1   : > { %13276 = vmatprep.subr.mxu0 %v2907_v38  ;;  %v2906_v40 = vmax.f32 %v2904_v39, 0.0  ;;  %v11541_v39 = vld [vmem:[%s16971_s2 + $0xa0] sm:$0xff] }
 0x3c2   : > { %13277 = vmatpush3.msra.mxu0 %v2907_v38  ;;  %v11561_v38 = vld [vmem:[%s16971_s2 + $0x110] sm:$0xff] }
 0x3c3   : > { %13278 = vmatprep.subr.mxu0 %v2906_v40 }
 0x3c4   : > { %13279 = vmatpush3.msra.mxu0 %v2906_v40  ;;  %v11560_v40 = vld [vmem:[%s16971_s2 + $0x108] sm:$0xff] }
 0x3c5   : > { %13281 = vmatmul.mubr.msk.f32.vlgmr.msra.gmra.mxu0 %vm891_vm0, %v15211_v41  ;;  %13351 = vmatprep.subr.mxu0 %v11538_v22 }
 0x3c6   : > { %13283 = vmatprep.mubr.msk.f32.mxu0 %vm891_vm0, %v15218_v0  ;;  %13352 = vmatpush3.msra.mxu0 %v11538_v22 }
 0x3c7   : > { %13353 = vmatprep.subr.mxu0 %v11537_v46 }
 0x3c8   : > { %13354 = vmatpush3.msra.mxu0 %v11537_v46  ;;  %v11554_v46 = vld [vmem:[%s16971_s2 + $0xe8] sm:$0xff] }
 0x3c9   : > { %13284 = vmatmul.mubr.msk.f32.gmra.mxu0 %vm891_vm0, %v15225_v42  ;;  %13355 = vmatprep.subr.mxu0 %v11536_v47 }
 0x3ca   : > { %13286 = vmatprep.mubr.msk.f32.mxu0 %vm891_vm0, %v15232_v43  ;;  %13356 = vmatpush3.msra.mxu0 %v11536_v47  ;;  %v11553_v47 = vld [vmem:[%s16971_s2 + $0xe0] sm:$0xff] }
 0x3cb   : > { %13357 = vmatprep.subr.mxu0 %v11535_v48 }
 0x3cc   : > { %13358 = vmatpush3.msra.mxu0 %v11535_v48  ;;  %v11587_v48 = vld [vmem:[%s16973_s4 + $0x38] sm:$0xff] }
 0x3cd   : > { %13287 = vmatmul.mubr.msk.f32.gmra.mxu0 %vm891_vm0, %v15239_v44  ;;  %13373 = vmatprep.subr.mxu0 %v11550_v49 }
 0x3ce   : > { %13289 = vmatprep.mubr.msk.f32.mxu0 %vm891_vm0, %v15246_v45 }
 0x3d1   : > { %13290 = vmatmul.mubr.msk.f32.gmra.mxu0 %vm891_vm0, %v15253_v5 }
 0x3d2   : > { %13292 = vmatprep.mubr.msk.f32.mxu0 %vm891_vm0, %v15260_v7 }
 0x3d5   : > { %13293 = vmatmul.mubr.msk.f32.gmra.mxu0 %vm891_vm0, %v15267_v8 }
 0x3d6   : > { %13295 = vmatprep.mubr.msk.f32.mxu0 %vm891_vm0, %v15274_v9 }
 0x3d9   : > { %13296 = vmatmul.mubr.msk.f32.gmra.mxu0 %vm891_vm0, %v15281_v10 }
 0x3da   : > { %13298 = vmatprep.mubr.msk.f32.mxu0 %vm891_vm0, %v15288_v11 }
 0x3dd   : > { %13299 = vmatmul.mubr.msk.f32.gmra.mxu0 %vm891_vm0, %v15295_v12 }
 0x3de   : > { %13301 = vmatprep.mubr.msk.f32.mxu0 %vm891_vm0, %v15302_v13 }
 0x3e1   : > { %13302 = vmatmul.mubr.msk.f32.gmra.mxu0 %vm891_vm0, %v15309_v14 }
 0x3e2   : > { %13304 = vmatprep.mubr.msk.f32.mxu0 %vm891_vm0, %v15316_v15 }
 0x3e5   : > { %13305 = vmatmul.mubr.msk.f32.gmra.mxu0 %vm891_vm0, %v15323_v16 }
 0x485   : > { %v13282_v50 = vpop.f32.mrf.mxu0 }
 0x487   : > { %v2974_v51 = vpop.f32.mrf.mxu0 }
 0x489   : > { %v13285_v52 = vpop.f32.mrf.mxu0 }
 0x48b   : > { %v2984_v53 = vpop.f32.mrf.mxu0 }
 0x48c   : > { %13315 = vmatprep.mubr.msk.f32.mxu1 %vm3072_vm3, %v2984_v53 }
 0x48d   : > { %13316 = vmatmul.mubr.msk.f32.vlgmr.msra.gmra.mxu1 %vm3072_vm3, %v13285_v52  ;;  %v13288_v55 = vpop.f32.mrf.mxu0 }
 0x48e   : > { %13319 = vmatpush3.msra.mxu1 %v3066_v21  ;;  %13326 = vmatprep.mubr.msk.f32.mxu1 %vm3072_vm3, %v2974_v51  ;;  %v11559_v21 = vld [vmem:[%s16971_s2 + $0x100] sm:$0xff] }
 0x48f   : > { %13320 = vmatprep.subr.mxu1 %v3065_v54  ;;  %v2994_v57 = vpop.f32.mrf.mxu0 }
 0x490   : > { %13321 = vmatpush3.msra.mxu1 %v3065_v54 }
 0x491   : > { %13322 = vmatprep.subr.mxu1 %v3064_v56  ;;  %v13291_v59 = vpop.f32.mrf.mxu0 }
 0x492   : > { %13323 = vmatpush3.msra.mxu1 %v3064_v56 }
 0x493   : > { %13324 = vmatprep.subr.mxu1 %v3063_v58  ;;  %v3004_v61 = vpop.f32.mrf.mxu0 }
 0x494   : > { %13325 = vmatpush3.msra.mxu1 %v3063_v58 }
 0x495   : > { %13327 = vmatmul.mubr.msk.f32.vlgmr.msra.gmra.mxu1 %vm3072_vm3, %v13282_v50  ;;  %13329 = vmatprep.subr.mxu1 %v11526_v60  ;;  %v13294_v63 = vpop.f32.mrf.mxu0 }
 0x496   : > { %13330 = vmatpush3.msra.mxu1 %v11526_v60  ;;  %13337 = vmatprep.mubr.msk.f32.mxu1 %vm3072_vm3, %v2994_v57 }
 0x497   : > { %13331 = vmatprep.subr.mxu1 %v11525_v62  ;;  %v3014_v2 = vpop.f32.mrf.mxu0 }
 0x498   : > { %13332 = vmatpush3.msra.mxu1 %v11525_v62  ;;  %13359 = vmatprep.mubr.msk.f32.mxu0 %vm3072_vm3, %v3014_v2 }
 0x499   : > { %13333 = vmatprep.subr.mxu1 %v11524_v1  ;;  %v13297_v6 = vpop.f32.mrf.mxu0  ;;  %13360 = vmatmul.mubr.msk.f32.vlgmr.msra.gmra.mxu0 %vm3072_vm3, %v13294_v63 }
 0x49a   : > { %13334 = vmatpush3.msra.mxu1 %v11524_v1  ;;  %13374 = vmatpush3.msra.mxu0 %v11550_v49 }
 0x49b   : > { %13335 = vmatprep.subr.mxu1 %v11523_v3  ;;  %v3024_v24 = vpop.f32.mrf.mxu0  ;;  %13375 = vmatprep.subr.mxu0 %v11549_v4 }
 0x49c   : > { %13336 = vmatpush3.msra.mxu1 %v11523_v3  ;;  %13376 = vmatpush3.msra.mxu0 %v11549_v4 }
 0x49d   : > { %13338 = vmatmul.mubr.msk.f32.vlgmr.msra.gmra.mxu1 %vm3072_vm3, %v13288_v55  ;;  %13340 = vmatprep.subr.mxu1 %v11532_v23  ;;  %v13300_v27 = vpop.f32.mrf.mxu0 }
 0x49e   : > { %13341 = vmatpush3.msra.mxu1 %v11532_v23  ;;  %13348 = vmatprep.mubr.msk.f32.mxu1 %vm3072_vm3, %v3004_v61 }
 0x49f   : > { %13342 = vmatprep.subr.mxu1 %v11531_v25  ;;  %13377 = vmatprep.subr.mxu0 %v11548_v26  ;;  %v3034_v30 = vpop.f32.mrf.mxu0 }
 0x4a0   : > { %13343 = vmatpush3.msra.mxu1 %v11531_v25  ;;  %13378 = vmatpush3.msra.mxu0 %v11548_v26 }
 0x4a1   : > { %13344 = vmatprep.subr.mxu1 %v11530_v28  ;;  %13379 = vmatprep.subr.mxu0 %v11547_v29  ;;  %v13303_v33 = vpop.f32.mrf.mxu0 }
 0x4a2   : > { %13345 = vmatpush3.msra.mxu1 %v11530_v28  ;;  %13380 = vmatpush3.msra.mxu0 %v11547_v29 }
 0x4a3   : > { %13346 = vmatprep.subr.mxu1 %v11529_v31  ;;  %13381 = vmatprep.mubr.msk.f32.mxu0 %vm3072_vm3, %v3034_v30  ;;  %v3044_v37 = vpop.f32.mrf.mxu0 }
 0x4a4   : > { %13347 = vmatpush3.msra.mxu1 %v11529_v31  ;;  %13382 = vmatmul.mubr.msk.f32.vlgmr.msra.gmra.mxu0 %vm3072_vm3, %v13300_v27 }
 0x4a5   : > { %13349 = vmatmul.mubr.msk.f32.vlgmr.msra.gmra.mxu1 %vm3072_vm3, %v13291_v59  ;;  %13362 = vmatprep.subr.mxu1 %v11544_v32  ;;  %v13306_v18 = vpop.f32.mrf.mxu0 }
 0x4a6   : > { %13363 = vmatpush3.msra.mxu1 %v11544_v32  ;;  %13370 = vmatprep.mubr.msk.f32.mxu1 %vm3072_vm3, %v3024_v24  ;;  %v11565_v32 = vld [vmem:[%s16974_s30] ss:$0 sm:$0xff]  ;;  %s16978_s30 = sld [smem:[#allocation14_spill]] }
 0x4a7   : > { %13364 = vmatprep.subr.mxu1 %v11543_v34  ;;  %13395 = vmatprep.subr.mxu0 %v11562_v35  ;;  %v3054_v22 = vpop.f32.mrf.mxu0 }
 0x4a8   : > { %13365 = vmatpush3.msra.mxu1 %v11543_v34  ;;  %13396 = vmatpush3.msra.mxu0 %v11562_v35 }
 0x4a9   : > { %13366 = vmatprep.subr.mxu1 %v11542_v36  ;;  %13397 = vmatprep.subr.mxu0 %v11561_v38 }
 0x4aa   : > { %13367 = vmatpush3.msra.mxu1 %v11542_v36  ;;  %13398 = vmatpush3.msra.mxu0 %v11561_v38 }
 0x4ab   : > { %13368 = vmatprep.subr.mxu1 %v11541_v39  ;;  %13399 = vmatprep.subr.mxu0 %v11560_v40 }
 0x4ac   : > { %13369 = vmatpush3.msra.mxu1 %v11541_v39  ;;  %13400 = vmatpush3.msra.mxu0 %v11560_v40 }
 0x4ad   : > { %13371 = vmatmul.mubr.msk.f32.vlgmr.msra.gmra.mxu1 %vm3072_vm3, %v13297_v6  ;;  %13384 = vmatprep.subr.mxu1 %v11556_v17 }
 0x4ae   : > { %13385 = vmatpush3.msra.mxu1 %v11556_v17  ;;  %13392 = vmatprep.mubr.msk.f32.mxu1 %vm3072_vm3, %v3044_v37 }
 0x4af   : > { %13386 = vmatprep.subr.mxu1 %v11555_v20  ;;  %13401 = vmatprep.subr.mxu0 %v11559_v21 }
 0x4b0   : > { %13387 = vmatpush3.msra.mxu1 %v11555_v20  ;;  %13402 = vmatpush3.msra.mxu0 %v11559_v21  ;;  %v11585_v20 = vld [vmem:[%s16973_s4 + $0x28] sm:$0xff]  ;;  %v11584_v21 = vld [vmem:[%s16973_s4 + $0x20] sm:$0xff] }
 0x4b1   : > { %13388 = vmatprep.subr.mxu1 %v11554_v46  ;;  %13403 = vmatprep.mubr.msk.f32.mxu0 %vm3072_vm3, %v3054_v22  ;;  %v4020_v22 = vld [vmem:[%s16973_s4 + $0x18] sm:$0xff] }
 0x4b2   : > { %13389 = vmatpush3.msra.mxu1 %v11554_v46  ;;  %13404 = vmatmul.mubr.msk.f32.vlgmr.msra.gmra.mxu0 %vm3072_vm3, %v13306_v18  ;;  %v11586_v18 = vld [vmem:[%s16973_s4 + $0x30] sm:$0xff]  ;;  %v11607_v46 = vld [vmem:[%s16973_s4 + $0x98] sm:$0xff] }
 0x4b3   : > { %13390 = vmatprep.subr.mxu1 %v11553_v47  ;;  %13437 = vmatprep.subr.mxu0 %v11587_v48 }
 0x4b4   : > { %13391 = vmatpush3.msra.mxu1 %v11553_v47  ;;  %13438 = vmatpush3.msra.mxu0 %v11587_v48  ;;  %v11606_v47 = vld [vmem:[%s16973_s4 + $0x90] sm:$0xff]  ;;  %v11605_v48 = vld [vmem:[%s16973_s4 + $0x88] sm:$0xff] }
 0x4b5   : > { %13393 = vmatmul.mubr.msk.f32.vlgmr.msra.gmra.mxu1 %vm3072_vm3, %v13303_v33  ;;  %13439 = vmatprep.subr.mxu0 %v11586_v18 }
 0x4b6   : > { %13410 = vmatprep.mubr.msk.f32.mxu1 %vm891_vm0, %v15185_v19  ;;  %13440 = vmatpush3.msra.mxu0 %v11586_v18  ;;  %v11610_v18 = vld [vmem:[%s16973_s4 + $0xa0] sm:$0xff] }
 0x4b7   : > { %13441 = vmatprep.subr.mxu0 %v11585_v20 }
 0x4b8   : > { %13442 = vmatpush3.msra.mxu0 %v11585_v20  ;;  %v11629_v20 = vld [vmem:[%s16973_s4 + $0x108] sm:$0xff] }
 0x4b9   : > { %13443 = vmatprep.subr.mxu0 %v11584_v21 }
 0x4ba   : > { %13444 = vmatpush3.msra.mxu0 %v11584_v21  ;;  %v11625_v21 = vld [vmem:[%s16973_s4 + $0xf8] sm:$0xff] }
 0x4bb   : > { %13448 = vmatprep.subr.mxu0 %v4020_v22 }
 0x54d   : > { %v13317_v49 = vpop.f32.mrf.mxu1 }
 0x54f   : > { %v3145_v50 = vpop.f32.mrf.mxu1 }
 0x555   : > { %v13328_v51 = vpop.f32.mrf.mxu1 }
 0x556   : > { %v3232_v56 = vadd.f32 %v13328_v51, %v13317_v49  ;;  %v11604_v49 = vld [vmem:[%s16973_s4 + $0x80] sm:$0xff] }
 0x557   : > { %v3226_v52 = vpop.f32.mrf.mxu1 }
 0x558   : > { %v3227_v57 = vadd.f32 %v3226_v52, %v3145_v50  ;;  %v11619_v50 = vld [vmem:[%s16973_s4 + $0xd8] sm:$0xff] }
 0x559   : > { %v13361_v59 = vpop.f32.mrf.mxu0 }
 0x55b   : > { %v3488_v1 = vpop.f32.mrf.mxu0 }
 0x55d   : > { %v13339_v53 = vpop.f32.mrf.mxu1 }
 0x55e   : > { %v3322_v58 = vadd.f32 %v13339_v53, %v3232_v56 }
 0x55f   : > { %v3312_v54 = vpop.f32.mrf.mxu1 }
 0x560   : > { %v3321_v61 = vadd.f32 %v3312_v54, %v3227_v57  ;;  %v4018_v57 = vld [vmem:[%s16973_s4 + $0x8] sm:$0xff] }
 0x564   : > { %v13383_v4 = vpop.f32.mrf.mxu0 }
 0x565   : > { %v13350_v55 = vpop.f32.mrf.mxu1 }
 0x566   : > { %v3410_v62 = vadd.f32 %v13350_v55, %v3322_v58  ;;  %v3664_v26 = vpop.f32.mrf.mxu0  ;;  %v4019_v55 = vld [vmem:[%s16973_s4 + $0x10] sm:$0xff] }
 0x567   : > { %v3400_v60 = vpop.f32.mrf.mxu1 }
 0x568   : > { %v3409_v63 = vadd.f32 %v3400_v60, %v3321_v61  ;;  %v3498_v3 = vadd.f32 %v13361_v59, %v3410_v62  ;;  %v4017_v59 = vld [vmem:[%s16973_s4] sm:$0xff]  ;;  %v11595_v61 = vld [vmem:[%s16973_s4 + $0x58] sm:$0xff] }
 0x56a   : > { %v3497_v24 = vadd.f32 %v3488_v1, %v3409_v63  ;;  %v11594_v63 = vld [vmem:[%s16973_s4 + $0x50] sm:$0xff] }
 0x56d   : > { %v13372_v2 = vpop.f32.mrf.mxu1 }
 0x56e   : > { %v3586_v23 = vadd.f32 %v13372_v2, %v3498_v3  ;;  %v11593_v2 = vld [vmem:[%s16973_s4 + $0x48] sm:$0xff] }
 0x56f   : > { %v3576_v6 = vpop.f32.mrf.mxu1 }
 0x570   : > { %v3585_v25 = vadd.f32 %v3576_v6, %v3497_v24  ;;  %v3674_v27 = vadd.f32 %v13383_v4, %v3586_v23  ;;  %v11592_v4 = vld [vmem:[%s16973_s4 + $0x40] sm:$0xff]  ;;  %v11618_v6 = vld [vmem:[%s16973_s4 + $0xd0] sm:$0xff]  ;;  %v11601_v24 = vld [vmem:[%s16973_s4 + $0x78] sm:$0xff] }
 0x572   : > { %v13405_v28 = vpop.f32.mrf.mxu0  ;;  %v3673_v31 = vadd.f32 %v3664_v26, %v3585_v25  ;;  %v11600_v26 = vld [vmem:[%s16973_s4 + $0x70] sm:$0xff] }
 0x574   : > { %v3840_v36 = vpop.f32.mrf.mxu0 }
 0x575   : > { %v13394_v29 = vpop.f32.mrf.mxu1 }
 0x576   : > { %v3762_v30 = vadd.f32 %v13394_v29, %v3674_v27  ;;  %v11617_v27 = vld [vmem:[%s16973_s4 + $0xc8] sm:$0xff] }
 0x577   : > { %v3752_v33 = vpop.f32.mrf.mxu1  ;;  %v11599_v29 = vld [vmem:[%s16973_s4 + $0x68] sm:$0xff] }
 0x578   : > { %v3850_v34 = vadd.f32 %v13405_v28, %v3762_v30  ;;  %v3761_v35 = vadd.f32 %v3752_v33, %v3673_v31  ;;  %v11616_v30 = vld [vmem:[%s16973_s4 + $0xc0] sm:$0xff]  ;;  %v11613_v33 = vld [vmem:[%s16973_s4 + $0xb8] sm:$0xff] }
 0x57a   : > { %v15458_v37 = vadd.f32 %v11565_v32, %v3850_v34  ;;  %v3849_v38 = vadd.f32 %v3840_v36, %v3761_v35  ;;  %v11612_v35 = vld [vmem:[%s16973_s4 + $0xb0] sm:$0xff]  ;;  %v11631_v36 = vld [vmem:[%s16973_s4 + $0x118] sm:$0xff] }
 0x57c   : > { %v15460_v39 = vadd.f32 %v11565_v32, %v3849_v38  ;;  %v3861_v40 = vmax.f32 %v15458_v37, 0.0  ;;  %v11598_v32 = vld [vmem:[%s16973_s4 + $0x60] sm:$0xff]  ;;  %v11611_v38 = vld [vmem:[%s16973_s4 + $0xa8] sm:$0xff] }
 0x57e   : > { %13406 = vmatprep.subr.mxu1 %v3861_v40  ;;  %v3860_v17 = vmax.f32 %v15460_v39, 0.0 }
 0x57f   : > { %13407 = vmatpush3.msra.mxu1 %v3861_v40 }
 0x580   : > { %13408 = vmatprep.subr.mxu1 %v3860_v17 }
 0x581   : > { %13409 = vmatpush3.msra.mxu1 %v3860_v17  ;;  %v11630_v17 = vld [vmem:[%s16973_s4 + $0x110] sm:$0xff] }
 0x582   : > { %13411 = vmatmul.mubr.msk.f32.vlgmr.msra.gmra.mxu1 %vm891_vm0, %v15211_v41  ;;  %13481 = vmatprep.subr.mxu1 %v11607_v46 }
 0x583   : > { %13413 = vmatprep.mubr.msk.f32.mxu1 %vm891_vm0, %v15218_v0  ;;  %13482 = vmatpush3.msra.mxu1 %v11607_v46  ;;  %v11624_v46 = vld [vmem:[%s16973_s4 + $0xf0] sm:$0xff] }
 0x584   : > { %13483 = vmatprep.subr.mxu1 %v11606_v47 }
 0x585   : > { %13484 = vmatpush3.msra.mxu1 %v11606_v47  ;;  %v11628_v47 = vld [vmem:[%s16973_s4 + $0x100] sm:$0xff] }
 0x586   : > { %13414 = vmatmul.mubr.msk.f32.gmra.mxu1 %vm891_vm0, %v15225_v42  ;;  %13485 = vmatprep.subr.mxu1 %v11605_v48 }
 0x587   : > { %13416 = vmatprep.mubr.msk.f32.mxu1 %vm891_vm0, %v15232_v43  ;;  %13486 = vmatpush3.msra.mxu1 %v11605_v48 }
 0x588   : > { %13487 = vmatprep.subr.mxu1 %v11604_v49 }
 0x589   : > { %13488 = vmatpush3.msra.mxu1 %v11604_v49  ;;  %v11623_v49 = vld [vmem:[%s16973_s4 + $0xe8] sm:$0xff] }
 0x58a   : > { %13417 = vmatmul.mubr.msk.f32.gmra.mxu1 %vm891_vm0, %v15239_v44  ;;  %13503 = vmatprep.subr.mxu1 %v11619_v50 }
 0x58b   : > { %13419 = vmatprep.mubr.msk.f32.mxu1 %vm891_vm0, %v15246_v45 }
 0x58e   : > { %13420 = vmatmul.mubr.msk.f32.gmra.mxu1 %vm891_vm0, %v15253_v5 }
 0x58f   : > { %13422 = vmatprep.mubr.msk.f32.mxu1 %vm891_vm0, %v15260_v7 }
 0x592   : > { %13423 = vmatmul.mubr.msk.f32.gmra.mxu1 %vm891_vm0, %v15267_v8 }
 0x593   : > { %13425 = vmatprep.mubr.msk.f32.mxu1 %vm891_vm0, %v15274_v9 }
 0x596   : > { %13426 = vmatmul.mubr.msk.f32.gmra.mxu1 %vm891_vm0, %v15281_v10 }
 0x597   : > { %13428 = vmatprep.mubr.msk.f32.mxu1 %vm891_vm0, %v15288_v11 }
 0x59a   : > { %13429 = vmatmul.mubr.msk.f32.gmra.mxu1 %vm891_vm0, %v15295_v12 }
 0x59b   : > { %13431 = vmatprep.mubr.msk.f32.mxu1 %vm891_vm0, %v15302_v13 }
 0x59e   : > { %13432 = vmatmul.mubr.msk.f32.gmra.mxu1 %vm891_vm0, %v15309_v14 }
 0x59f   : > { %13434 = vmatprep.mubr.msk.f32.mxu1 %vm891_vm0, %v15316_v15 }
 0x5a2   : > { %13435 = vmatmul.mubr.msk.f32.gmra.mxu1 %vm891_vm0, %v15323_v16 }
 0x642   : > { %v13412_v51 = vpop.f32.mrf.mxu1 }
 0x644   : > { %v3928_v52 = vpop.f32.mrf.mxu1 }
 0x646   : > { %v13415_v53 = vpop.f32.mrf.mxu1 }
 0x648   : > { %v3938_v54 = vpop.f32.mrf.mxu1 }
 0x649   : > { %13445 = vmatprep.mubr.msk.f32.mxu0 %vm3072_vm3, %v3938_v54 }
 0x64a   : > { %13446 = vmatmul.mubr.msk.f32.vlgmr.msra.gmra.mxu0 %vm3072_vm3, %v13415_v53  ;;  %v13418_v56 = vpop.f32.mrf.mxu1 }
 0x64b   : > { %13449 = vmatpush3.msra.mxu0 %v4020_v22  ;;  %13456 = vmatprep.mubr.msk.f32.mxu0 %vm3072_vm3, %v3928_v52 }
 0x64c   : > { %13450 = vmatprep.subr.mxu0 %v4019_v55  ;;  %v3948_v58 = vpop.f32.mrf.mxu1 }
 0x64d   : > { %13451 = vmatpush3.msra.mxu0 %v4019_v55 }
 0x64e   : > { %13452 = vmatprep.subr.mxu0 %v4018_v57  ;;  %v13421_v60 = vpop.f32.mrf.mxu1 }
 0x64f   : > { %13453 = vmatpush3.msra.mxu0 %v4018_v57 }
 0x650   : > { %13454 = vmatprep.subr.mxu0 %v4017_v59  ;;  %v3958_v62 = vpop.f32.mrf.mxu1 }
 0x651   : > { %13455 = vmatpush3.msra.mxu0 %v4017_v59 }
 0x652   : > { %13457 = vmatmul.mubr.msk.f32.vlgmr.msra.gmra.mxu0 %vm3072_vm3, %v13412_v51  ;;  %13459 = vmatprep.subr.mxu0 %v11595_v61  ;;  %v13424_v1 = vpop.f32.mrf.mxu1  ;;  %v4806_v51 = vld [vmem:[%s16975_s10] sm:$0xff] }
 0x653   : > { %13460 = vmatpush3.msra.mxu0 %v11595_v61  ;;  %13467 = vmatprep.mubr.msk.f32.mxu0 %vm3072_vm3, %v3948_v58 }
 0x654   : > { %13461 = vmatprep.subr.mxu0 %v11594_v63  ;;  %v3968_v3 = vpop.f32.mrf.mxu1 }
 0x655   : > { %13462 = vmatpush3.msra.mxu0 %v11594_v63  ;;  %13489 = vmatprep.mubr.msk.f32.mxu1 %vm3072_vm3, %v3968_v3 }
 0x656   : > { %13463 = vmatprep.subr.mxu0 %v11593_v2  ;;  %v13427_v23 = vpop.f32.mrf.mxu1  ;;  %13490 = vmatmul.mubr.msk.f32.vlgmr.msra.gmra.mxu1 %vm3072_vm3, %v13424_v1 }
 0x657   : > { %13464 = vmatpush3.msra.mxu0 %v11593_v2  ;;  %13504 = vmatpush3.msra.mxu1 %v11619_v50  ;;  %v11622_v50 = vld [vmem:[%s16973_s4 + $0xe0] sm:$0xff] }
 0x658   : > { %13465 = vmatprep.subr.mxu0 %v11592_v4  ;;  %v3978_v25 = vpop.f32.mrf.mxu1  ;;  %13505 = vmatprep.subr.mxu1 %v11618_v6 }
 0x659   : > { %13466 = vmatpush3.msra.mxu0 %v11592_v4  ;;  %13506 = vmatpush3.msra.mxu1 %v11618_v6 }
 0x65a   : > { %13468 = vmatmul.mubr.msk.f32.vlgmr.msra.gmra.mxu0 %vm3072_vm3, %v13418_v56  ;;  %13470 = vmatprep.subr.mxu0 %v11601_v24  ;;  %v13430_v28 = vpop.f32.mrf.mxu1 }
 0x65b   : > { %13471 = vmatpush3.msra.mxu0 %v11601_v24  ;;  %13478 = vmatprep.mubr.msk.f32.mxu0 %vm3072_vm3, %v3958_v62 }
 0x65c   : > { %13472 = vmatprep.subr.mxu0 %v11600_v26  ;;  %13507 = vmatprep.subr.mxu1 %v11617_v27  ;;  %v3988_v31 = vpop.f32.mrf.mxu1 }
 0x65d   : > { %13473 = vmatpush3.msra.mxu0 %v11600_v26  ;;  %13508 = vmatpush3.msra.mxu1 %v11617_v27 }
 0x65e   : > { %13474 = vmatprep.subr.mxu0 %v11599_v29  ;;  %13509 = vmatprep.subr.mxu1 %v11616_v30  ;;  %v13433_v34 = vpop.f32.mrf.mxu1 }
 0x65f   : > { %13475 = vmatpush3.msra.mxu0 %v11599_v29  ;;  %13510 = vmatpush3.msra.mxu1 %v11616_v30 }
 0x660   : > { %13476 = vmatprep.subr.mxu0 %v11598_v32  ;;  %13511 = vmatprep.mubr.msk.f32.mxu1 %vm3072_vm3, %v3988_v31  ;;  %v3998_v40 = vpop.f32.mrf.mxu1 }
 0x661   : > { %13477 = vmatpush3.msra.mxu0 %v11598_v32  ;;  %13512 = vmatmul.mubr.msk.f32.vlgmr.msra.gmra.mxu1 %vm3072_vm3, %v13430_v28 }
 0x662   : > { %13479 = vmatmul.mubr.msk.f32.vlgmr.msra.gmra.mxu0 %vm3072_vm3, %v13421_v60  ;;  %13492 = vmatprep.subr.mxu0 %v11613_v33  ;;  %v13436_v22 = vpop.f32.mrf.mxu1 }
 0x663   : > { %13493 = vmatpush3.msra.mxu0 %v11613_v33  ;;  %13500 = vmatprep.mubr.msk.f32.mxu0 %vm3072_vm3, %v3978_v25 }
 0x664   : > { %13494 = vmatprep.subr.mxu0 %v11612_v35  ;;  %13525 = vmatprep.subr.mxu1 %v11631_v36  ;;  %v4008_v48 = vpop.f32.mrf.mxu1 }
 0x665   : > { %13495 = vmatpush3.msra.mxu0 %v11612_v35  ;;  %13526 = vmatpush3.msra.mxu1 %v11631_v36 }
 0x666   : > { %13496 = vmatprep.subr.mxu0 %v11611_v38  ;;  %13527 = vmatprep.subr.mxu1 %v11630_v17 }
 0x667   : > { %13497 = vmatpush3.msra.mxu0 %v11611_v38  ;;  %13528 = vmatpush3.msra.mxu1 %v11630_v17 }
 0x668   : > { %13498 = vmatprep.subr.mxu0 %v11610_v18  ;;  %13529 = vmatprep.subr.mxu1 %v11629_v20 }
 0x669   : > { %13499 = vmatpush3.msra.mxu0 %v11610_v18  ;;  %13530 = vmatpush3.msra.mxu1 %v11629_v20  ;;  %v11657_v20 = vld [vmem:[%s16976_s29 + $0x38] sm:$0xff] }
 0x66a   : > { %13501 = vmatmul.mubr.msk.f32.vlgmr.msra.gmra.mxu0 %vm3072_vm3, %v13427_v23  ;;  %13514 = vmatprep.subr.mxu0 %v11625_v21 }
 0x66b   : > { %13515 = vmatpush3.msra.mxu0 %v11625_v21  ;;  %13522 = vmatprep.mubr.msk.f32.mxu0 %vm3072_vm3, %v3998_v40 }
 0x66c   : > { %13516 = vmatprep.subr.mxu0 %v11624_v46  ;;  %13531 = vmatprep.subr.mxu1 %v11628_v47 }
 0x66d   : > { %13517 = vmatpush3.msra.mxu0 %v11624_v46  ;;  %13532 = vmatpush3.msra.mxu1 %v11628_v47 }
 0x66e   : > { %13518 = vmatprep.subr.mxu0 %v11623_v49  ;;  %13533 = vmatprep.mubr.msk.f32.mxu1 %vm3072_vm3, %v4008_v48 }
 0x66f   : > { %13519 = vmatpush3.msra.mxu0 %v11623_v49  ;;  %13534 = vmatmul.mubr.msk.f32.vlgmr.msra.gmra.mxu1 %vm3072_vm3, %v13436_v22 }
 0x670   : > { %13520 = vmatprep.subr.mxu0 %v11622_v50  ;;  %13545 = vmatprep.mubr.msk.f32.mxu1 %vm891_vm0, %v15185_v19 }
 0x671   : > { %13521 = vmatpush3.msra.mxu0 %v11622_v50  ;;  %v11665_v50 = vld [vmem:[%s16976_s29 + $0x58] sm:$0xff] }
 0x672   : > { %13523 = vmatmul.mubr.msk.f32.vlgmr.msra.gmra.mxu0 %vm3072_vm3, %v13433_v34  ;;  %13536 = vmatprep.subr.mxu0 %v4806_v51 }
 0x673   : > { %13537 = vmatpush3.msra.mxu0 %v4806_v51 }
 0x674   : > { %13572 = vmatprep.subr.mxu0 %v11657_v20 }
 0x70a   : > { %v13447_v52 = vpop.f32.mrf.mxu0 }
 0x70c   : > { %v4098_v53 = vpop.f32.mrf.mxu0 }
 0x712   : > { %v13458_v54 = vpop.f32.mrf.mxu0 }
 0x713   : > { %v4185_v59 = vadd.f32 %v13458_v54, %v13447_v52  ;;  %v11664_v52 = vld [vmem:[%s16976_s29 + $0x50] sm:$0xff]  ;;  %v11663_v54 = vld [vmem:[%s16976_s29 + $0x48] sm:$0xff] }
 0x714   : > { %v4179_v55 = vpop.f32.mrf.mxu0 }
 0x715   : > { %v4180_v60 = vadd.f32 %v4179_v55, %v4098_v53 }
 0x716   : > { %v13491_v19 = vpop.f32.mrf.mxu1 }
 0x718   : > { %v4441_v3 = vpop.f32.mrf.mxu1 }
 0x71a   : > { %v13469_v56 = vpop.f32.mrf.mxu0 }
 0x71b   : > { %v4275_v61 = vadd.f32 %v13469_v56, %v4185_v59  ;;  %v11662_v56 = vld [vmem:[%s16976_s29 + $0x40] sm:$0xff]  ;;  %v11671_v59 = vld [vmem:[%s16976_s29 + $0x78] sm:$0xff] }
 0x71c   : > { %v4265_v57 = vpop.f32.mrf.mxu0 }
 0x71d   : > { %v4274_v63 = vadd.f32 %v4265_v57, %v4180_v60  ;;  %v11688_v57 = vld [vmem:[%s16976_s29 + $0xd0] sm:$0xff] }
 0x721   : > { %v13513_v23 = vpop.f32.mrf.mxu1 }
 0x722   : > { %v13480_v58 = vpop.f32.mrf.mxu0 }
 0x723   : > { %v4363_v1 = vadd.f32 %v13480_v58, %v4275_v61  ;;  %v4617_v28 = vpop.f32.mrf.mxu1  ;;  %v11670_v61 = vld [vmem:[%s16976_s29 + $0x70] sm:$0xff] }
 0x724   : > { %v4353_v62 = vpop.f32.mrf.mxu0 }
 0x725   : > { %v4362_v2 = vadd.f32 %v4353_v62, %v4274_v63  ;;  %v4451_v6 = vadd.f32 %v13491_v19, %v4363_v1  ;;  %v11687_v19 = vld [vmem:[%s16976_s29 + $0xc8] sm:$0xff]  ;;  %v11686_v1 = vld [vmem:[%s16976_s29 + $0xc0] sm:$0xff] }
 0x726   : > { %v11669_v63 = vld [vmem:[%s16976_s29 + $0x68] sm:$0xff] }
 0x727   : > { %v4450_v26 = vadd.f32 %v4441_v3, %v4362_v2  ;;  %v11668_v3 = vld [vmem:[%s16976_s29 + $0x60] sm:$0xff] }
 0x72a   : > { %v13502_v4 = vpop.f32.mrf.mxu0 }
 0x72b   : > { %v4539_v25 = vadd.f32 %v13502_v4, %v4451_v6  ;;  %v11683_v4 = vld [vmem:[%s16976_s29 + $0xb8] sm:$0xff] }
 0x72c   : > { %v4529_v24 = vpop.f32.mrf.mxu0 }
 0x72d   : > { %v4538_v27 = vadd.f32 %v4529_v24, %v4450_v26  ;;  %v4627_v29 = vadd.f32 %v13513_v23, %v4539_v25  ;;  %v11682_v23 = vld [vmem:[%s16976_s29 + $0xb0] sm:$0xff]  ;;  %v11701_v24 = vld [vmem:[%s16976_s29 + $0x118] sm:$0xff]  ;;  %v11681_v25 = vld [vmem:[%s16976_s29 + $0xa8] sm:$0xff] }
 0x72f   : > { %v13535_v30 = vpop.f32.mrf.mxu1  ;;  %v4626_v33 = vadd.f32 %v4617_v28, %v4538_v27  ;;  %v11700_v27 = vld [vmem:[%s16976_s29 + $0x110] sm:$0xff]  ;;  %v11680_v28 = vld [vmem:[%s16976_s29 + $0xa0] sm:$0xff] }
 0x731   : > { %v4793_v36 = vpop.f32.mrf.mxu1 }
 0x732   : > { %v13524_v31 = vpop.f32.mrf.mxu0 }
 0x733   : > { %v4715_v32 = vadd.f32 %v13524_v31, %v4627_v29  ;;  %v11699_v29 = vld [vmem:[%s16976_s29 + $0x108] sm:$0xff] }
 0x734   : > { %v4705_v34 = vpop.f32.mrf.mxu0 }
 0x735   : > { %v4714_v35 = vadd.f32 %v4705_v34, %v4626_v33  ;;  %v4803_v38 = vadd.f32 %v13535_v30, %v4715_v32  ;;  %v11695_v30 = vld [vmem:[%s16976_s29 + $0xf8] sm:$0xff]  ;;  %v11694_v32 = vld [vmem:[%s16976_s29 + $0xf0] sm:$0xff]  ;;  %v11698_v33 = vld [vmem:[%s16976_s29 + $0x100] sm:$0xff] }
 0x737   : > { %v4802_v40 = vadd.f32 %v4793_v36, %v4714_v35  ;;  %v4805_v18 = vmax.f32 %v4803_v38, 0.0  ;;  %v11693_v35 = vld [vmem:[%s16976_s29 + $0xe8] sm:$0xff]  ;;  %v11692_v36 = vld [vmem:[%s16976_s29 + $0xe0] sm:$0xff] }
 0x738   : > { %v5837_v38 = vld [vmem:[%s16977_s1] sm:$0xff]  ;;  %s870_s1 = scalar_lea.vmem %s16943_s28, %s14611_s6 }
 0x739   : > { %v4804_v17 = vmax.f32 %v4802_v40, 0.0 }
 0x73b   : > { %13538 = vmatprep.mubr.msk.f32.mxu0 %vm4807_vm4, %v4804_v17 }
 0x73c   : > { %13539 = vmatmul.mubr.msk.f32.vlgmr.msra.gmra.mxu0 %vm4807_vm4, %v4805_v18 }
 0x73d   : > { %13573 = vmatpush3.msra.mxu0 %v11657_v20 }
 0x7fc   : > { %v13540_v21 = vpop.f32.mrf.mxu0 }
 0x7fd   : > { %v15632_v22 = vadd.f32 %v13540_v21, %v15458_v37  ;;  %v5048_v37 = vld [vmem:[%s16976_s29] sm:$0xff] }
 0x7fe   : > { %v4880_v46 = vpop.f32.mrf.mxu0 }
 0x7ff   : > { %v4892_v47 = vmax.f32 %v15632_v22, 0.0  ;;  %v15636_v48 = vadd.f32 %v4880_v46, %v15460_v39 }
 0x801   : > { %v4891_v49 = vmax.f32 %v15636_v48, 0.0  ;;  %13541 = vmatprep.subr.mxu1 %v4892_v47 }
 0x802   : > { %13542 = vmatpush3.msra.mxu1 %v4892_v47 }
 0x803   : > { %13543 = vmatprep.subr.mxu1 %v4891_v49 }
 0x804   : > { %13544 = vmatpush3.msra.mxu1 %v4891_v49 }
 0x805   : > { %13546 = vmatmul.mubr.msk.f32.vlgmr.msra.gmra.mxu1 %vm891_vm0, %v15211_v41  ;;  %v11656_v41 = vld [vmem:[%s16976_s29 + $0x30] sm:$0xff] }
 0x806   : > { %13548 = vmatprep.mubr.msk.f32.mxu1 %vm891_vm0, %v15218_v0  ;;  %13574 = vmatprep.subr.mxu0 %v11656_v41  ;;  %v11655_v0 = vld [vmem:[%s16976_s29 + $0x28] sm:$0xff] }
 0x807   : > { %13575 = vmatpush3.msra.mxu0 %v11656_v41 }
 0x808   : > { %13576 = vmatprep.subr.mxu0 %v11655_v0 }
 0x809   : > { %13549 = vmatmul.mubr.msk.f32.gmra.mxu1 %vm891_vm0, %v15225_v42  ;;  %13577 = vmatpush3.msra.mxu0 %v11655_v0  ;;  %v11654_v42 = vld [vmem:[%s16976_s29 + $0x20] sm:$0xff] }
 0x80a   : > { %13551 = vmatprep.mubr.msk.f32.mxu1 %vm891_vm0, %v15232_v43  ;;  %13578 = vmatprep.subr.mxu0 %v11654_v42  ;;  %v5051_v43 = vld [vmem:[%s16976_s29 + $0x18] sm:$0xff] }
 0x80b   : > { %13579 = vmatpush3.msra.mxu0 %v11654_v42 }
 0x80c   : > { %13583 = vmatprep.subr.mxu0 %v5051_v43 }
 0x80d   : > { %13552 = vmatmul.mubr.msk.f32.gmra.mxu1 %vm891_vm0, %v15239_v44  ;;  %v11677_v44 = vld [vmem:[%s16976_s29 + $0x98] sm:$0xff] }
 0x80e   : > { %13554 = vmatprep.mubr.msk.f32.mxu1 %vm891_vm0, %v15246_v45  ;;  %13616 = vmatprep.subr.mxu1 %v11677_v44  ;;  %v11676_v45 = vld [vmem:[%s16976_s29 + $0x90] sm:$0xff] }
 0x80f   : > { %13617 = vmatpush3.msra.mxu1 %v11677_v44 }
 0x810   : > { %13618 = vmatprep.subr.mxu1 %v11676_v45 }
 0x811   : > { %13555 = vmatmul.mubr.msk.f32.gmra.mxu1 %vm891_vm0, %v15253_v5  ;;  %v11675_v5 = vld [vmem:[%s16976_s29 + $0x88] sm:$0xff] }
 0x812   : > { %13557 = vmatprep.mubr.msk.f32.mxu1 %vm891_vm0, %v15260_v7  ;;  %13619 = vmatpush3.msra.mxu1 %v11676_v45  ;;  %v11674_v7 = vld [vmem:[%s16976_s29 + $0x80] sm:$0xff] }
 0x813   : > { %13620 = vmatprep.subr.mxu1 %v11675_v5 }
 0x814   : > { %13621 = vmatpush3.msra.mxu1 %v11675_v5 }
 0x815   : > { %13558 = vmatmul.mubr.msk.f32.gmra.mxu1 %vm891_vm0, %v15267_v8  ;;  %13622 = vmatprep.subr.mxu1 %v11674_v7  ;;  %v11689_v8 = vld [vmem:[%s16976_s29 + $0xd8] sm:$0xff] }
 0x816   : > { %13560 = vmatprep.mubr.msk.f32.mxu1 %vm891_vm0, %v15274_v9  ;;  %13623 = vmatpush3.msra.mxu1 %v11674_v7 }
 0x817   : > { %13638 = vmatprep.subr.mxu1 %v11689_v8 }
 0x819   : > { %13561 = vmatmul.mubr.msk.f32.gmra.mxu1 %vm891_vm0, %v15281_v10 }
 0x81a   : > { %13563 = vmatprep.mubr.msk.f32.mxu1 %vm891_vm0, %v15288_v11 }
 0x81d   : > { %13564 = vmatmul.mubr.msk.f32.gmra.mxu1 %vm891_vm0, %v15295_v12 }
 0x81e   : > { %13566 = vmatprep.mubr.msk.f32.mxu1 %vm891_vm0, %v15302_v13  ;;  %v5050_v13 = vld [vmem:[%s16976_s29 + $0x10] sm:$0xff] }
 0x821   : > { %13567 = vmatmul.mubr.msk.f32.gmra.mxu1 %vm891_vm0, %v15309_v14 }
 0x822   : > { %13569 = vmatprep.mubr.msk.f32.mxu1 %vm891_vm0, %v15316_v15  ;;  %v5049_v15 = vld [vmem:[%s16976_s29 + $0x8] sm:$0xff] }
 0x825   : > { %13570 = vmatmul.mubr.msk.f32.gmra.mxu1 %vm891_vm0, %v15323_v16 }
 0x8c5   : > { %v13547_v9 = vpop.f32.mrf.mxu1 }
 0x8c7   : > { %v4959_v10 = vpop.f32.mrf.mxu1 }
 0x8c9   : > { %v13550_v11 = vpop.f32.mrf.mxu1 }
 0x8cb   : > { %v4969_v12 = vpop.f32.mrf.mxu1 }
 0x8cc   : > { %13580 = vmatprep.mubr.msk.f32.mxu0 %vm3072_vm3, %v4969_v12 }
 0x8cd   : > { %13581 = vmatmul.mubr.msk.f32.vlgmr.msra.gmra.mxu0 %vm3072_vm3, %v13550_v11  ;;  %v13553_v14 = vpop.f32.mrf.mxu1 }
 0x8ce   : > { %13584 = vmatpush3.msra.mxu0 %v5051_v43  ;;  %13591 = vmatprep.mubr.msk.f32.mxu0 %vm3072_vm3, %v4959_v10 }
 0x8cf   : > { %13585 = vmatprep.subr.mxu0 %v5050_v13  ;;  %v4979_v16 = vpop.f32.mrf.mxu1 }
 0x8d0   : > { %13586 = vmatpush3.msra.mxu0 %v5050_v13 }
 0x8d1   : > { %13587 = vmatprep.subr.mxu0 %v5049_v15  ;;  %v13556_v39 = vpop.f32.mrf.mxu1 }
 0x8d2   : > { %13588 = vmatpush3.msra.mxu0 %v5049_v15 }
 0x8d3   : > { %13589 = vmatprep.subr.mxu0 %v5048_v37  ;;  %v4989_v51 = vpop.f32.mrf.mxu1 }
 0x8d4   : > { %13590 = vmatpush3.msra.mxu0 %v5048_v37 }
 0x8d5   : > { %13592 = vmatmul.mubr.msk.f32.vlgmr.msra.gmra.mxu0 %vm3072_vm3, %v13547_v9  ;;  %13594 = vmatprep.subr.mxu0 %v11665_v50  ;;  %v13559_v53 = vpop.f32.mrf.mxu1 }
 0x8d6   : > { %13595 = vmatpush3.msra.mxu0 %v11665_v50  ;;  %13602 = vmatprep.mubr.msk.f32.mxu0 %vm3072_vm3, %v4979_v16 }
 0x8d7   : > { %13596 = vmatprep.subr.mxu0 %v11664_v52  ;;  %v4999_v55 = vpop.f32.mrf.mxu1 }
 0x8d8   : > { %13597 = vmatpush3.msra.mxu0 %v11664_v52  ;;  %13624 = vmatprep.mubr.msk.f32.mxu1 %vm3072_vm3, %v4999_v55 }
 0x8d9   : > { %13598 = vmatprep.subr.mxu0 %v11663_v54  ;;  %v13562_v58 = vpop.f32.mrf.mxu1  ;;  %13625 = vmatmul.mubr.msk.f32.vlgmr.msra.gmra.mxu1 %vm3072_vm3, %v13559_v53 }
 0x8da   : > { %13599 = vmatpush3.msra.mxu0 %v11663_v54  ;;  %13639 = vmatpush3.msra.mxu1 %v11689_v8 }
 0x8db   : > { %13600 = vmatprep.subr.mxu0 %v11662_v56  ;;  %v5009_v60 = vpop.f32.mrf.mxu1  ;;  %13640 = vmatprep.subr.mxu1 %v11688_v57 }
 0x8dc   : > { %13601 = vmatpush3.msra.mxu0 %v11662_v56  ;;  %13641 = vmatpush3.msra.mxu1 %v11688_v57 }
 0x8dd   : > { %13603 = vmatmul.mubr.msk.f32.vlgmr.msra.gmra.mxu0 %vm3072_vm3, %v13553_v14  ;;  %13605 = vmatprep.subr.mxu0 %v11671_v59  ;;  %v13565_v62 = vpop.f32.mrf.mxu1 }
 0x8de   : > { %13606 = vmatpush3.msra.mxu0 %v11671_v59  ;;  %13613 = vmatprep.mubr.msk.f32.mxu0 %vm3072_vm3, %v4989_v51  ;;  %v5926_v59 = vld [vmem:[%s16978_s30 + $0x18] sm:$0xff] }
 0x8df   : > { %13607 = vmatprep.subr.mxu0 %v11670_v61  ;;  %13642 = vmatprep.subr.mxu1 %v11687_v19  ;;  %v5019_v2 = vpop.f32.mrf.mxu1 }
 0x8e0   : > { %13608 = vmatpush3.msra.mxu0 %v11670_v61  ;;  %13643 = vmatpush3.msra.mxu1 %v11687_v19  ;;  %v5924_v61 = vld [vmem:[%s16978_s30 + $0x8] sm:$0xff]  ;;  %v5923_v19 = vld [vmem:[%s16978_s30] sm:$0xff] }
 0x8e1   : > { %13609 = vmatprep.subr.mxu0 %v11669_v63  ;;  %13644 = vmatprep.subr.mxu1 %v11686_v1  ;;  %v13568_v6 = vpop.f32.mrf.mxu1 }
 0x8e2   : > { %13610 = vmatpush3.msra.mxu0 %v11669_v63  ;;  %13645 = vmatpush3.msra.mxu1 %v11686_v1 }
 0x8e3   : > { %13611 = vmatprep.subr.mxu0 %v11668_v3  ;;  %13646 = vmatprep.mubr.msk.f32.mxu1 %vm3072_vm3, %v5019_v2  ;;  %v5029_v26 = vpop.f32.mrf.mxu1 }
 0x8e4   : > { %13612 = vmatpush3.msra.mxu0 %v11668_v3  ;;  %13647 = vmatmul.mubr.msk.f32.vlgmr.msra.gmra.mxu1 %vm3072_vm3, %v13565_v62  ;;  %v6016_v62 = vld [vmem:[%s16929_s14 + $0x8] sm:$0xff] }
 0x8e5   : > { %13614 = vmatmul.mubr.msk.f32.vlgmr.msra.gmra.mxu0 %vm3072_vm3, %v13556_v39  ;;  %13627 = vmatprep.subr.mxu0 %v11683_v4  ;;  %v13571_v31 = vpop.f32.mrf.mxu1 }
 0x8e6   : > { %13628 = vmatpush3.msra.mxu0 %v11683_v4  ;;  %13635 = vmatprep.mubr.msk.f32.mxu0 %vm3072_vm3, %v5009_v60  ;;  %v5925_v60 = vld [vmem:[%s16978_s30 + $0x10] sm:$0xff] }
 0x8e7   : > { %13629 = vmatprep.subr.mxu0 %v11682_v23  ;;  %13660 = vmatprep.subr.mxu1 %v11701_v24  ;;  %v5039_v34 = vpop.f32.mrf.mxu1 }
 0x8e8   : > { %13630 = vmatpush3.msra.mxu0 %v11682_v23  ;;  %13661 = vmatpush3.msra.mxu1 %v11701_v24  ;;  %v6015_v23 = vld [vmem:[%s16929_s14] sm:$0xff] }
 0x8e9   : > { %13631 = vmatprep.subr.mxu0 %v11681_v25  ;;  %13662 = vmatprep.subr.mxu1 %v11700_v27 }
 0x8ea   : > { %13632 = vmatpush3.msra.mxu0 %v11681_v25  ;;  %13663 = vmatpush3.msra.mxu1 %v11700_v27  ;;  %v15841_v27 = vld [vmem:[%s16966_s3] sm:$0xff] }
 0x8eb   : > { %13633 = vmatprep.subr.mxu0 %v11680_v28  ;;  %13664 = vmatprep.subr.mxu1 %v11699_v29 }
 0x8ec   : > { %13634 = vmatpush3.msra.mxu0 %v11680_v28  ;;  %13665 = vmatpush3.msra.mxu1 %v11699_v29 }
 0x8ed   : > { %13636 = vmatmul.mubr.msk.f32.vlgmr.msra.gmra.mxu0 %vm3072_vm3, %v13562_v58  ;;  %13649 = vmatprep.subr.mxu0 %v11695_v30 }
 0x8ee   : > { %13650 = vmatpush3.msra.mxu0 %v11695_v30  ;;  %13657 = vmatprep.mubr.msk.f32.mxu0 %vm3072_vm3, %v5029_v26 }
 0x8ef   : > { %13651 = vmatprep.subr.mxu0 %v11694_v32  ;;  %13666 = vmatprep.subr.mxu1 %v11698_v33 }
 0x8f0   : > { %13652 = vmatpush3.msra.mxu0 %v11694_v32  ;;  %13667 = vmatpush3.msra.mxu1 %v11698_v33  ;;  %v11713_v32 = vld [vmem:[%s16930_s15] ss:$0 sm:$0xff] }
 0x8f1   : > { %13653 = vmatprep.subr.mxu0 %v11693_v35  ;;  %13668 = vmatprep.mubr.msk.f32.mxu1 %vm3072_vm3, %v5039_v34 }
 0x8f2   : > { %13654 = vmatpush3.msra.mxu0 %v11693_v35  ;;  %13669 = vmatmul.mubr.msk.f32.vlgmr.msra.gmra.mxu1 %vm3072_vm3, %v13571_v31 }
 0x8f3   : > { %13655 = vmatprep.subr.mxu0 %v11692_v36  ;;  %13687 = vmatprep.subr.msk.mxu1 %vm4807_vm4, %v6016_v62 }
 0x8f4   : > { %13656 = vmatpush3.msra.mxu0 %v11692_v36  ;;  %13688 = vmatpush3.xpose.msk.msra.mxu1 %vm4807_vm4, %v6016_v62 }
 0x8f5   : > { %13658 = vmatmul.mubr.msk.f32.vlgmr.msra.gmra.mxu0 %vm3072_vm3, %v13568_v6  ;;  %13671 = vmatprep.subr.mxu0 %v5837_v38 }
 0x8f6   : > { %13672 = vmatpush3.msra.mxu0 %v5837_v38  ;;  %13689 = vmatprep.subr.msk.mxu1 %vm4807_vm4, %v6015_v23  ;;  %v6121_v38 = vlaneseq }
 0x8f7   : > { %13676 = vmatprep.subr.mxu0 %v5926_v59 }
 0x8f8   : > { %13690 = vmatpush3.xpose.msk.msra.mxu1 %vm4807_vm4, %v6015_v23 }
 0x98d   : > { %v13582_v40 = vpop.f32.mrf.mxu0 }
 0x98f   : > { %v5129_v17 = vpop.f32.mrf.mxu0 }
 0x995   : > { %v13593_v18 = vpop.f32.mrf.mxu0 }
 0x996   : > { %v5216_v49 = vadd.f32 %v13593_v18, %v13582_v40  ;;  %v6122_v40 = vand.u32 127, %v6121_v38 }
 0x997   : > { %v5210_v20 = vpop.f32.mrf.mxu0 }
 0x998   : > { %v5211_v41 = vadd.f32 %v5210_v20, %v5129_v17 }
 0x999   : > { %v13626_v42 = vpop.f32.mrf.mxu1 }
 0x99b   : > { %v5472_v7 = vpop.f32.mrf.mxu1 }
 0x99d   : > { %v13604_v21 = vpop.f32.mrf.mxu0 }
 0x99e   : > { %v5306_v0 = vadd.f32 %v13604_v21, %v5216_v49 }
 0x99f   : > { %v5296_v46 = vpop.f32.mrf.mxu0 }
 0x9a0   : > { %v5305_v44 = vadd.f32 %v5296_v46, %v5211_v41 }
 0x9a4   : > { %v13648_v10 = vpop.f32.mrf.mxu1 }
 0x9a5   : > { %v13615_v47 = vpop.f32.mrf.mxu0 }
 0x9a6   : > { %v5394_v45 = vadd.f32 %v13615_v47, %v5306_v0  ;;  %v5648_v15 = vpop.f32.mrf.mxu1 }
 0x9a7   : > { %v5384_v43 = vpop.f32.mrf.mxu0 }
 0x9a8   : > { %v5393_v5 = vadd.f32 %v5384_v43, %v5305_v44  ;;  %v5482_v9 = vadd.f32 %v13626_v42, %v5394_v45 }
 0x9aa   : > { %v5481_v13 = vadd.f32 %v5472_v7, %v5393_v5 }
 0x9ad   : > { %v13637_v8 = vpop.f32.mrf.mxu0 }
 0x9ae   : > { %v5570_v12 = vadd.f32 %v13637_v8, %v5482_v9 }
 0x9af   : > { %v5560_v11 = vpop.f32.mrf.mxu0 }
 0x9b0   : > { %v5569_v14 = vadd.f32 %v5560_v11, %v5481_v13  ;;  %v5658_v16 = vadd.f32 %v13648_v10, %v5570_v12 }
 0x9b2   : > { %v13670_v37 = vpop.f32.mrf.mxu1  ;;  %v5657_v51 = vadd.f32 %v5648_v15, %v5569_v14 }
 0x9b4   : > { %v5824_v54 = vpop.f32.mrf.mxu1 }
 0x9b5   : > { %v13659_v39 = vpop.f32.mrf.mxu0 }
 0x9b6   : > { %v5746_v50 = vadd.f32 %v13659_v39, %v5658_v16 }
 0x9b7   : > { %v5736_v52 = vpop.f32.mrf.mxu0 }
 0x9b8   : > { %v5745_v53 = vadd.f32 %v5736_v52, %v5657_v51  ;;  %v5834_v55 = vadd.f32 %v13670_v37, %v5746_v50  ;;  %v14450_v51 = vmov 0.0  }
 0x9ba   : > { %v5833_v56 = vadd.f32 %v5824_v54, %v5745_v53  ;;  %v5836_v58 = vmax.f32 %v5834_v55, 0.0 }
 0x9bc   : > { %v5835_v57 = vmax.f32 %v5833_v56, 0.0 }
 0x9be   : > { %13673 = vmatprep.mubr.msk.f32.mxu0 %vm4807_vm4, %v5835_v57  ;;  %v15861_v57 = vld [vmem:[%s16966_s3 + $0x8] sm:$0xff] }
 0x9bf   : > { %13674 = vmatmul.mubr.msk.f32.vlgmr.msra.gmra.mxu0 %vm4807_vm4, %v5836_v58  ;;  %v15868_v58 = vld [vmem:[%s16966_s3 + $0x10] sm:$0xff] }
 0x9c0   : > { %13677 = vmatpush3.msra.mxu0 %v5926_v59  ;;  %v15875_v59 = vld [vmem:[%s16966_s3 + $0x18] sm:$0xff] }
 0x9c1   : > { %13678 = vmatprep.subr.mxu0 %v5925_v60 }
 0x9c2   : > { %13679 = vmatpush3.msra.mxu0 %v5925_v60  ;;  %v15882_v60 = vld [vmem:[%s16966_s3 + $0x20] sm:$0xff] }
 0x9c3   : > { %13680 = vmatprep.subr.mxu0 %v5924_v61 }
 0x9c4   : > { %13681 = vmatpush3.msra.mxu0 %v5924_v61  ;;  %v15889_v61 = vld [vmem:[%s16966_s3 + $0x28] sm:$0xff] }
 0x9c5   : > { %13682 = vmatprep.subr.mxu0 %v5923_v19 }
 0x9c6   : > { %13683 = vmatpush3.msra.mxu0 %v5923_v19  ;;  %v15896_v19 = vld [vmem:[%s16966_s3 + $0x30] sm:$0xff] }
 0x9c7   : > { %13694 = vmatprep.subr.mxu0 %v6016_v62 }
 0xa7f   : > { %v13675_v63 = vpop.f32.mrf.mxu0 }
 0xa80   : > { %v5920_v1 = vadd.f32 %v13675_v63, %v15632_v22  ;;  %v11706_v22 = vld [vmem:[%s16928_s13] ss:$0 sm:$0xff] }
 0xa81   : > { %v5910_v2 = vpop.f32.mrf.mxu0  ;;  %v15910_v63 = vld [vmem:[%s16966_s3 + $0x40] sm:$0xff] }
 0xa82   : > { %v5919_v3 = vadd.f32 %v5910_v2, %v15636_v48  ;;  %v5922_v6 = vmax.f32 %v5920_v1, 0.0  ;;  %v15917_v1 = vld [vmem:[%s16966_s3 + $0x48] sm:$0xff]  ;;  %v15924_v2 = vld [vmem:[%s16966_s3 + $0x50] sm:$0xff] }
 0xa84   : > { %v5921_v4 = vmax.f32 %v5919_v3, 0.0  ;;  %v15931_v3 = vld [vmem:[%s16966_s3 + $0x58] sm:$0xff] }
 0xa86   : > { %13684 = vmatprep.mubr.msk.f32.mxu0 %vm3072_vm3, %v5921_v4  ;;  %v15938_v4 = vld [vmem:[%s16966_s3 + $0x60] sm:$0xff] }
 0xa87   : > { %13685 = vmatmul.mubr.msk.f32.vlgmr.msra.gmra.mxu0 %vm3072_vm3, %v5922_v6  ;;  %v15945_v6 = vld [vmem:[%s16966_s3 + $0x68] sm:$0xff] }
 0xa88   : > { %13695 = vmatpush3.msra.mxu0 %v6016_v62  ;;  %v15903_v62 = vld [vmem:[%s16966_s3 + $0x38] sm:$0xff] }
 0xa89   : > { %13696 = vmatprep.subr.mxu0 %v6015_v23 }
 0xa8a   : > { %13697 = vmatpush3.msra.mxu0 %v6015_v23  ;;  %v15952_v23 = vld [vmem:[%s16966_s3 + $0x70] sm:$0xff] }
 0xb47   : > { %v13686_v48 = vpop.f32.mrf.mxu0 }
 0xb48   : > { %v6012_v24 = vadd.f32 %v13686_v48, %v11706_v22  ;;  %v15966_v48 = vld [vmem:[%s16966_s3 + $0x80] sm:$0xff] }
 0xb49   : > { %v6006_v25 = vpop.f32.mrf.mxu0 }
 0xb4a   : > { %6245 = vst.msk [vmem:[%s865_s5 + $0x8] sm:$0xff] %vm4807_vm4, %v6012_v24  ;;  %v6007_v26 = vadd.f32 %v11706_v22, %v6006_v25  ;;  %v15959_v22 = vld [vmem:[%s16966_s3 + $0x78] sm:$0xff]  ;;  %v11736_v25 = vld [vmem:[%s16931_s16 + $0x8] sm:$0xff] }
 0xb4b   : > { %13732 = vmatprep.subr.mxu0 %v11736_v25 }
 0xb4c   : > { %6244 = vst.msk [vmem:[%s865_s5] sm:$0xff] %vm4807_vm4, %v6007_v26  ;;  %13691 = vmatprep.mubr.msk.f32.mxu1 %vm4807_vm4, %v6007_v26  ;;  %v6404_v26 = vld [vmem:[%s16931_s16] sm:$0xff] }
 0xb4d   : > { %13692 = vmatmul.mubr.msk.f32.vlgmr.msra.gmra.mxu1 %vm4807_vm4, %v6012_v24  ;;  %v15973_v24 = vld [vmem:[%s16966_s3 + $0x88] sm:$0xff] }
 0xb4e   : > { %13705 = vmatprep.mubr.msk.f32.mxu1 %vm891_vm0, %v15841_v27 }
 0xc0d   : > { %v13693_v28 = vpop.f32.mrf.mxu1 }
 0xc0e   : > { %v6106_v30 = vmul.f32 2.0, %v13693_v28 }
 0xc0f   : > { %v6095_v29 = vpop.f32.mrf.mxu1 }
 0xc10   : > { %v6105_v31 = vmul.f32 2.0, %v6095_v29  ;;  %v6114_v35 = vsub.f32 %v11713_v32, %v6106_v30 }
 0xc12   : > { %v6113_v33 = vsub.f32 %v11713_v32, %v6105_v31  ;;  %v6118_v36 = vsel %vm891_vm0, %v6114_v35, inf  ;;  %v11741_v32 = vld [vmem:[%s16931_s16 + $0x10] sm:$0xff] }
 0xc14   : > { %v6115_v34 = vsel %vm891_vm0, %v6113_v33, inf }
 0xc15   : > { %6116 = vmin.xlane.f32.xlu0 %v6115_v34 }
 0xc19   : > { %6119 = vmin.xlane.f32.xlu0 %v6118_v36 }
 0xc9e   : > { %v6117_v17 = vpop.xlane.xlu0 %6116 }
 0xc9f   : > { %vm6123_vm5 = vcmp.le.f32.partialorder %v6113_v33, %v6117_v17 }
 0xca0   : > { %v6125_v18 = vsel %vm6123_vm5, %v6122_v40, 16 }
 0xca1   : > { %v6127_v20 = vsel %vm891_vm0, %v6125_v18, 2147483647 }
 0xca2   : > { %v6120_v21 = vpop.xlane.xlu0 %6119  ;;  %v6129_v46 = vshra.s32 %v6127_v20, 16  ;;  %v6128_v43 = vand.u32 65535, %v6127_v20  ;;  %v11750_v20 = vld [vmem:[%s16931_s16 + $0x28] sm:$0xff] }
 0xca3   : > { %vm6124_vm6 = vcmp.le.f32.partialorder %v6114_v35, %v6120_v21  ;;  %v11744_v35 = vld [vmem:[%s16931_s16 + $0x18] sm:$0xff] }
 0xca4   : > { %v6126_v47 = vsel %vm6124_vm6, %v6122_v40, 16  ;;  %v6131_v49 = vcvt.s32.f32 %v6129_v46  ;;  %v6130_v45 = vcvt.s32.f32 %v6128_v43 }
 0xca5   : > { %v6142_v41 = vsel %vm891_vm0, %v6126_v47, 2147483647  ;;  %v11753_v47 = vld [vmem:[%s16931_s16 + $0x30] sm:$0xff] }
 0xca6   : > { %6132 = vmin.xlane.f32.xlu1 %v6131_v49  ;;  %v6144_v0 = vshra.s32 %v6142_v41, 16  ;;  %v6143_v5 = vand.u32 65535, %v6142_v41 }
 0xca8   : > { %v6146_v42 = vcvt.s32.f32 %v6144_v0  ;;  %v6145_v9 = vcvt.s32.f32 %v6143_v5  ;;  %v11756_v0 = vld [vmem:[%s16931_s16 + $0x38] sm:$0xff] }
 0xcaa   : > { %6147 = vmin.xlane.f32.xlu1 %v6146_v42 }
 0xd2f   : > { %v6133_v44 = vpop.xlane.xlu1 %6132 }
 0xd30   : > { %vm6134_vm7 = vcmp.eq.f32.partialorder %v6131_v49, %v6133_v44  ;;  %v6139_v11 = vcvt.f32.s32 %v6133_v44  ;;  %v11759_v44 = vld [vmem:[%s16931_s16 + $0x40] sm:$0xff] }
 0xd31   : > { %v6135_v7 = vsel %vm6134_vm7, %v6130_v45, inf }
 0xd32   : > { %6136 = vmin.xlane.f32.xlu0 %v6135_v7  ;;  %v6140_v13 = vshll.u32 %v6139_v11, 16  ;;  %v11784_v7 = vld [vmem:[%s16933_s18 + $0x38] sm:$0xff] }
 0xd33   : > { %v6148_v8 = vpop.xlane.xlu1 %6147 }
 0xd34   : > { %vm6149_vm8 = vcmp.eq.f32.partialorder %v6146_v42, %v6148_v8  ;;  %v6154_v14 = vcvt.f32.s32 %v6148_v8 }
 0xd35   : > { %v6150_v10 = vsel %vm6149_vm8, %v6145_v9, inf }
 0xd36   : > { %6151 = vmin.xlane.f32.xlu1 %v6150_v10  ;;  %v6155_v39 = vshll.u32 %v6154_v14, 16 }
 0xdbb   : > { %v6137_v12 = vpop.xlane.xlu0 %6136 }
 0xdbc   : > { %v6138_v15 = vcvt.f32.s32 %v6137_v12 }
 0xdbe   : > { %v6141_v16 = vadd.s32 %v6140_v13, %v6138_v15 }
 0xdbf   : > { %v6152_v37 = vpop.xlane.xlu1 %6151 }
 0xdc0   : > { %vm6157_vm10 = vcmp.eq.s32.totalorder %v6122_v40, %v6141_v16  ;;  %6247 = vst.msk [vmem:[%s870_s1] sm:$0xff] %vm6246_vm9, %v6141_v16  ;;  %v6153_v50 = vcvt.f32.s32 %v6152_v37 }
 0xdc1   : > { %v11714_v52 = vsel %vm6157_vm10, 1.0, %v14450_v51 }
 0xdc2   : > { %v6156_v53 = vadd.s32 %v6155_v39, %v6153_v50  ;;  %13698 = vmatprep.mubr.msk.f32.mxu0 %vm891_vm0, %v11714_v52 }
 0xdc4   : > { %vm6158_vm11 = vcmp.eq.s32.totalorder %v6122_v40, %v6156_v53  ;;  %6248 = vst.msk [vmem:[%s870_s1 + $0x8] sm:$0xff] %vm6246_vm9, %v6156_v53  ;;  %v11747_v40 = vld [vmem:[%s16931_s16 + $0x20] sm:$0xff] }
 0xdc5   : > { %v11715_v54 = vsel %vm6158_vm11, 1.0, %v14450_v51 }
 0xdc6   : > { %13699 = vmatmul.mubr.msk.f32.vlgmr.msra.gmra.mxu0 %vm891_vm0, %v11715_v54 }
 0xdc7   : > { %13733 = vmatpush3.msra.mxu0 %v11736_v25 }
 0xdc8   : > { %13737 = vmatprep.subr.mxu0 %v6404_v26 }
 0xe86   : > { %v13700_v55 = vpop.f32.mrf.mxu0 }
 0xe87   : > { %13701 = vmatprep.subr.mxu1 %v13700_v55 }
 0xe88   : > { %v6235_v56 = vpop.f32.mrf.mxu0  ;;  %13702 = vmatpush3.msra.mxu1 %v13700_v55 }
 0xe89   : > { %13703 = vmatprep.subr.mxu1 %v6235_v56 }
 0xe8a   : > { %13704 = vmatpush3.msra.mxu1 %v6235_v56 }
 0xe8b   : > { %13706 = vmatmul.mubr.msk.f32.vlgmr.msra.gmra.mxu1 %vm891_vm0, %v15861_v57 }
 0xe8c   : > { %13708 = vmatprep.mubr.msk.f32.mxu1 %vm891_vm0, %v15868_v58 }
 0xe8f   : > { %13709 = vmatmul.mubr.msk.f32.gmra.mxu1 %vm891_vm0, %v15875_v59 }
 0xe90   : > { %13711 = vmatprep.mubr.msk.f32.mxu1 %vm891_vm0, %v15882_v60 }
 0xe93   : > { %13712 = vmatmul.mubr.msk.f32.gmra.mxu1 %vm891_vm0, %v15889_v61 }
 0xe94   : > { %13714 = vmatprep.mubr.msk.f32.mxu1 %vm891_vm0, %v15896_v19 }
 0xe97   : > { %13715 = vmatmul.mubr.msk.f32.gmra.mxu1 %vm891_vm0, %v15903_v62 }
 0xe98   : > { %13717 = vmatprep.mubr.msk.f32.mxu1 %vm891_vm0, %v15910_v63 }
 0xe9b   : > { %13718 = vmatmul.mubr.msk.f32.gmra.mxu1 %vm891_vm0, %v15917_v1 }
 0xe9c   : > { %13720 = vmatprep.mubr.msk.f32.mxu1 %vm891_vm0, %v15924_v2 }
 0xe9f   : > { %13721 = vmatmul.mubr.msk.f32.gmra.mxu1 %vm891_vm0, %v15931_v3 }
 0xea0   : > { %13723 = vmatprep.mubr.msk.f32.mxu1 %vm891_vm0, %v15938_v4 }
 0xea3   : > { %13724 = vmatmul.mubr.msk.f32.gmra.mxu1 %vm891_vm0, %v15945_v6 }
 0xea4   : > { %13726 = vmatprep.mubr.msk.f32.mxu1 %vm891_vm0, %v15952_v23 }
 0xea7   : > { %13727 = vmatmul.mubr.msk.f32.gmra.mxu1 %vm891_vm0, %v15959_v22 }
 0xea8   : > { %13729 = vmatprep.mubr.msk.f32.mxu1 %vm891_vm0, %v15966_v48 }
 0xeab   : > { %13730 = vmatmul.mubr.msk.f32.gmra.mxu1 %vm891_vm0, %v15973_v24 }
 0xeac   : > { %13781 = vmatprep.mubr.msk.f32.mxu1 %vm891_vm0, %v15841_v27 }
 0xf4b   : > { %v13707_v28 = vpop.f32.mrf.mxu1 }
 0xf4d   : > { %v6315_v29 = vpop.f32.mrf.mxu1 }
 0xf4f   : > { %v13710_v30 = vpop.f32.mrf.mxu1 }
 0xf51   : > { %v6325_v31 = vpop.f32.mrf.mxu1 }
 0xf52   : > { %13734 = vmatprep.mubr.msk.f32.mxu0 %vm4807_vm4, %v6325_v31 }
 0xf53   : > { %13735 = vmatmul.mubr.msk.f32.vlgmr.msra.gmra.mxu0 %vm4807_vm4, %v13710_v30  ;;  %v13713_v33 = vpop.f32.mrf.mxu1 }
 0xf54   : > { %13739 = vmatprep.mubr.msk.f32.mxu0 %vm4807_vm4, %v6315_v29  ;;  %13738 = vmatpush3.msra.mxu0 %v6404_v26 }
 0xf55   : > { %v6335_v34 = vpop.f32.mrf.mxu1  ;;  %13742 = vmatprep.subr.mxu0 %v11741_v32 }
 0xf57   : > { %13740 = vmatmul.mubr.msk.f32.vlgmr.msra.gmra.mxu0 %vm4807_vm4, %v13707_v28  ;;  %v13716_v36 = vpop.f32.mrf.mxu1 }
 0xf58   : > { %13744 = vmatprep.mubr.msk.f32.mxu0 %vm4807_vm4, %v6335_v34  ;;  %13743 = vmatpush3.msra.mxu0 %v11741_v32 }
 0xf59   : > { %v6345_v38 = vpop.f32.mrf.mxu1  ;;  %13747 = vmatprep.subr.mxu0 %v11744_v35 }
 0xf5b   : > { %13745 = vmatmul.mubr.msk.f32.vlgmr.msra.gmra.mxu0 %vm4807_vm4, %v13713_v33  ;;  %v13719_v17 = vpop.f32.mrf.mxu1 }
 0xf5c   : > { %13749 = vmatprep.mubr.msk.f32.mxu0 %vm4807_vm4, %v6345_v38  ;;  %13748 = vmatpush3.msra.mxu0 %v11744_v35 }
 0xf5d   : > { %v6355_v18 = vpop.f32.mrf.mxu1  ;;  %13752 = vmatprep.subr.mxu0 %v11747_v40 }
 0xf5f   : > { %13750 = vmatmul.mubr.msk.f32.vlgmr.msra.gmra.mxu0 %vm4807_vm4, %v13716_v36  ;;  %v13722_v21 = vpop.f32.mrf.mxu1 }
 0xf60   : > { %13754 = vmatprep.mubr.msk.f32.mxu0 %vm4807_vm4, %v6355_v18  ;;  %13753 = vmatpush3.msra.mxu0 %v11747_v40  ;;  %v11762_v40 = vld [vmem:[%s16932_s17] ss:$0 sm:$0xff] }
 0xf61   : > { %v6365_v46 = vpop.f32.mrf.mxu1  ;;  %13757 = vmatprep.subr.mxu0 %v11750_v20 }
 0xf63   : > { %13755 = vmatmul.mubr.msk.f32.vlgmr.msra.gmra.mxu0 %vm4807_vm4, %v13719_v17  ;;  %v13725_v49 = vpop.f32.mrf.mxu1 }
 0xf64   : > { %13759 = vmatprep.mubr.msk.f32.mxu0 %vm4807_vm4, %v6365_v46  ;;  %13758 = vmatpush3.msra.mxu0 %v11750_v20 }
 0xf65   : > { %v6375_v41 = vpop.f32.mrf.mxu1  ;;  %13762 = vmatprep.subr.mxu0 %v11753_v47 }
 0xf67   : > { %13760 = vmatmul.mubr.msk.f32.vlgmr.msra.gmra.mxu0 %vm4807_vm4, %v13722_v21  ;;  %v13728_v42 = vpop.f32.mrf.mxu1 }
 0xf68   : > { %13764 = vmatprep.mubr.msk.f32.mxu0 %vm4807_vm4, %v6375_v41  ;;  %13763 = vmatpush3.msra.mxu0 %v11753_v47 }
 0xf69   : > { %v6385_v43 = vpop.f32.mrf.mxu1  ;;  %13767 = vmatprep.subr.mxu0 %v11756_v0 }
 0xf6b   : > { %13765 = vmatmul.mubr.msk.f32.vlgmr.msra.gmra.mxu0 %vm4807_vm4, %v13725_v49  ;;  %v13731_v45 = vpop.f32.mrf.mxu1 }
 0xf6c   : > { %13769 = vmatprep.mubr.msk.f32.mxu0 %vm4807_vm4, %v6385_v43  ;;  %13768 = vmatpush3.msra.mxu0 %v11756_v0  ;;  %v11783_v0 = vld [vmem:[%s16933_s18 + $0x30] sm:$0xff]  ;;  %v11781_v43 = vld [vmem:[%s16933_s18 + $0x20] sm:$0xff] }
 0xf6d   : > { %v6395_v5 = vpop.f32.mrf.mxu1  ;;  %13772 = vmatprep.subr.mxu0 %v11759_v44 }
 0xf6f   : > { %13770 = vmatmul.mubr.msk.f32.vlgmr.msra.gmra.mxu0 %vm4807_vm4, %v13728_v42  ;;  %v11782_v42 = vld [vmem:[%s16933_s18 + $0x28] sm:$0xff] }
 0xf70   : > { %13774 = vmatprep.mubr.msk.f32.mxu0 %vm4807_vm4, %v6395_v5  ;;  %13773 = vmatpush3.msra.mxu0 %v11759_v44  ;;  %v7333_v44 = vld [vmem:[%s16933_s18 + $0x18] sm:$0xff]  ;;  %v11803_v5 = vld [vmem:[%s16933_s18 + $0x90] sm:$0xff] }
 0xf71   : > { %13808 = vmatprep.subr.mxu0 %v11784_v7 }
 0xf73   : > { %13775 = vmatmul.mubr.msk.f32.vlgmr.msra.gmra.mxu0 %vm4807_vm4, %v13731_v45  ;;  %v11804_v45 = vld [vmem:[%s16933_s18 + $0x98] sm:$0xff] }
 0xf74   : > { %13809 = vmatpush3.msra.mxu0 %v11784_v7  ;;  %v11802_v7 = vld [vmem:[%s16933_s18 + $0x88] sm:$0xff] }
 0xf75   : > { %13810 = vmatprep.subr.mxu0 %v11783_v0 }
 0xf76   : > { %13811 = vmatpush3.msra.mxu0 %v11783_v0  ;;  %v11807_v0 = vld [vmem:[%s16933_s18 + $0xa0] sm:$0xff] }
 0xf77   : > { %13812 = vmatprep.subr.mxu0 %v11782_v42 }
 0xf78   : > { %13813 = vmatpush3.msra.mxu0 %v11782_v42  ;;  %v11826_v42 = vld [vmem:[%s16933_s18 + $0x108] sm:$0xff] }
 0xf79   : > { %13814 = vmatprep.subr.mxu0 %v11781_v43 }
 0xf7a   : > { %13815 = vmatpush3.msra.mxu0 %v11781_v43  ;;  %v11822_v43 = vld [vmem:[%s16933_s18 + $0xf8] sm:$0xff] }
 0xf7b   : > { %13819 = vmatprep.subr.mxu0 %v7333_v44 }
0x1013   : > { %v13736_v8 = vpop.f32.mrf.mxu0 }
0x1015   : > { %v6479_v9 = vpop.f32.mrf.mxu0 }
0x1017   : > { %v13741_v10 = vpop.f32.mrf.mxu0 }
0x1018   : > { %v6566_v39 = vadd.f32 %v13741_v10, %v13736_v8  ;;  %v11801_v8 = vld [vmem:[%s16933_s18 + $0x80] sm:$0xff] }
0x1019   : > { %v6560_v11 = vpop.f32.mrf.mxu0 }
0x101a   : > { %v6561_v51 = vadd.f32 %v6560_v11, %v6479_v9  ;;  %v11816_v9 = vld [vmem:[%s16933_s18 + $0xd8] sm:$0xff] }
0x101b   : > { %v13746_v12 = vpop.f32.mrf.mxu0 }
0x101c   : > { %v6653_v52 = vadd.f32 %v13746_v12, %v6566_v39  ;;  %v7330_v39 = vld [vmem:[%s16933_s18] sm:$0xff] }
0x101d   : > { %v6643_v13 = vpop.f32.mrf.mxu0 }
0x101e   : > { %v6652_v54 = vadd.f32 %v6643_v13, %v6561_v51  ;;  %v11792_v51 = vld [vmem:[%s16933_s18 + $0x58] sm:$0xff] }
0x101f   : > { %v13751_v14 = vpop.f32.mrf.mxu0 }
0x1020   : > { %v6738_v55 = vadd.f32 %v13751_v14, %v6653_v52  ;;  %v7332_v14 = vld [vmem:[%s16933_s18 + $0x10] sm:$0xff] }
0x1021   : > { %v6728_v15 = vpop.f32.mrf.mxu0 }
0x1022   : > { %v6737_v25 = vadd.f32 %v6728_v15, %v6652_v54 }
0x1023   : > { %v13756_v16 = vpop.f32.mrf.mxu0 }
0x1024   : > { %v6823_v26 = vadd.f32 %v13756_v16, %v6738_v55  ;;  %v7331_v16 = vld [vmem:[%s16933_s18 + $0x8] sm:$0xff] }
0x1025   : > { %v6813_v37 = vpop.f32.mrf.mxu0  ;;  %v11790_v55 = vld [vmem:[%s16933_s18 + $0x48] sm:$0xff] }
0x1026   : > { %v6822_v29 = vadd.f32 %v6813_v37, %v6737_v25  ;;  %v11789_v25 = vld [vmem:[%s16933_s18 + $0x40] sm:$0xff] }
0x1027   : > { %v13761_v50 = vpop.f32.mrf.mxu0 }
0x1028   : > { %v6908_v30 = vadd.f32 %v13761_v50, %v6823_v26  ;;  %v11815_v26 = vld [vmem:[%s16933_s18 + $0xd0] sm:$0xff] }
0x1029   : > { %v6898_v53 = vpop.f32.mrf.mxu0 }
0x102a   : > { %v6907_v32 = vadd.f32 %v6898_v53, %v6822_v29  ;;  %v11791_v53 = vld [vmem:[%s16933_s18 + $0x50] sm:$0xff]  ;;  %v11798_v29 = vld [vmem:[%s16933_s18 + $0x78] sm:$0xff] }
0x102b   : > { %v13766_v56 = vpop.f32.mrf.mxu0 }
0x102c   : > { %v6993_v33 = vadd.f32 %v13766_v56, %v6908_v30 }
0x102d   : > { %v6983_v28 = vpop.f32.mrf.mxu0 }
0x102e   : > { %v6992_v35 = vadd.f32 %v6983_v28, %v6907_v32  ;;  %v11814_v32 = vld [vmem:[%s16933_s18 + $0xc8] sm:$0xff] }
0x102f   : > { %v13771_v31 = vpop.f32.mrf.mxu0 }
0x1030   : > { %v7078_v36 = vadd.f32 %v13771_v31, %v6993_v33  ;;  %v11797_v31 = vld [vmem:[%s16933_s18 + $0x70] sm:$0xff] }
0x1031   : > { %v7068_v34 = vpop.f32.mrf.mxu0 }
0x1032   : > { %v7077_v17 = vadd.f32 %v7068_v34, %v6992_v35  ;;  %v11796_v34 = vld [vmem:[%s16933_s18 + $0x68] sm:$0xff]  ;;  %v11813_v35 = vld [vmem:[%s16933_s18 + $0xc0] sm:$0xff] }
0x1033   : > { %v13776_v38 = vpop.f32.mrf.mxu0 }
0x1034   : > { %v7163_v18 = vadd.f32 %v13776_v38, %v7078_v36  ;;  %v11795_v38 = vld [vmem:[%s16933_s18 + $0x60] sm:$0xff] }
0x1035   : > { %v7153_v20 = vpop.f32.mrf.mxu0 }
0x1036   : > { %v16030_v21 = vadd.f32 %v11762_v40, %v7163_v18  ;;  %v7162_v46 = vadd.f32 %v7153_v20, %v7077_v17  ;;  %v11809_v18 = vld [vmem:[%s16933_s18 + $0xb0] sm:$0xff]  ;;  %v11828_v20 = vld [vmem:[%s16933_s18 + $0x118] sm:$0xff] }
0x1038   : > { %v16032_v47 = vadd.f32 %v11762_v40, %v7162_v46  ;;  %v7174_v49 = vmax.f32 %v16030_v21, 0.0  ;;  %v11810_v40 = vld [vmem:[%s16933_s18 + $0xb8] sm:$0xff]  ;;  %v11808_v46 = vld [vmem:[%s16933_s18 + $0xa8] sm:$0xff] }
0x103a   : > { %13777 = vmatprep.subr.mxu1 %v7174_v49  ;;  %v7173_v41 = vmax.f32 %v16032_v47, 0.0 }
0x103b   : > { %13778 = vmatpush3.msra.mxu1 %v7174_v49 }
0x103c   : > { %13779 = vmatprep.subr.mxu1 %v7173_v41 }
0x103d   : > { %13780 = vmatpush3.msra.mxu1 %v7173_v41  ;;  %v11827_v41 = vld [vmem:[%s16933_s18 + $0x110] sm:$0xff] }
0x103e   : > { %13782 = vmatmul.mubr.msk.f32.vlgmr.msra.gmra.mxu1 %vm891_vm0, %v15861_v57  ;;  %13852 = vmatprep.subr.mxu1 %v11804_v45 }
0x103f   : > { %13784 = vmatprep.mubr.msk.f32.mxu1 %vm891_vm0, %v15868_v58  ;;  %13853 = vmatpush3.msra.mxu1 %v11804_v45  ;;  %v11821_v45 = vld [vmem:[%s16933_s18 + $0xf0] sm:$0xff] }
0x1040   : > { %13854 = vmatprep.subr.mxu1 %v11803_v5 }
0x1041   : > { %13855 = vmatpush3.msra.mxu1 %v11803_v5  ;;  %v11825_v5 = vld [vmem:[%s16933_s18 + $0x100] sm:$0xff] }
0x1042   : > { %13785 = vmatmul.mubr.msk.f32.gmra.mxu1 %vm891_vm0, %v15875_v59  ;;  %13856 = vmatprep.subr.mxu1 %v11802_v7 }
0x1043   : > { %13787 = vmatprep.mubr.msk.f32.mxu1 %vm891_vm0, %v15882_v60  ;;  %13857 = vmatpush3.msra.mxu1 %v11802_v7  ;;  %v11820_v7 = vld [vmem:[%s16933_s18 + $0xe8] sm:$0xff] }
0x1044   : > { %13858 = vmatprep.subr.mxu1 %v11801_v8 }
0x1045   : > { %13859 = vmatpush3.msra.mxu1 %v11801_v8 }
0x1046   : > { %13788 = vmatmul.mubr.msk.f32.gmra.mxu1 %vm891_vm0, %v15889_v61  ;;  %13874 = vmatprep.subr.mxu1 %v11816_v9 }
0x1047   : > { %13790 = vmatprep.mubr.msk.f32.mxu1 %vm891_vm0, %v15896_v19 }
0x104a   : > { %13791 = vmatmul.mubr.msk.f32.gmra.mxu1 %vm891_vm0, %v15903_v62 }
0x104b   : > { %13793 = vmatprep.mubr.msk.f32.mxu1 %vm891_vm0, %v15910_v63 }
0x104e   : > { %13794 = vmatmul.mubr.msk.f32.gmra.mxu1 %vm891_vm0, %v15917_v1 }
0x104f   : > { %13796 = vmatprep.mubr.msk.f32.mxu1 %vm891_vm0, %v15924_v2 }
0x1052   : > { %13797 = vmatmul.mubr.msk.f32.gmra.mxu1 %vm891_vm0, %v15931_v3 }
0x1053   : > { %13799 = vmatprep.mubr.msk.f32.mxu1 %vm891_vm0, %v15938_v4 }
0x1056   : > { %13800 = vmatmul.mubr.msk.f32.gmra.mxu1 %vm891_vm0, %v15945_v6 }
0x1057   : > { %13802 = vmatprep.mubr.msk.f32.mxu1 %vm891_vm0, %v15952_v23 }
0x105a   : > { %13803 = vmatmul.mubr.msk.f32.gmra.mxu1 %vm891_vm0, %v15959_v22 }
0x105b   : > { %13805 = vmatprep.mubr.msk.f32.mxu1 %vm891_vm0, %v15966_v48 }
0x105e   : > { %13806 = vmatmul.mubr.msk.f32.gmra.mxu1 %vm891_vm0, %v15973_v24 }
0x10fe   : > { %v13783_v10 = vpop.f32.mrf.mxu1 }
0x1100   : > { %v7241_v11 = vpop.f32.mrf.mxu1 }
0x1102   : > { %v13786_v12 = vpop.f32.mrf.mxu1 }
0x1104   : > { %v7251_v13 = vpop.f32.mrf.mxu1 }
0x1105   : > { %13816 = vmatprep.mubr.msk.f32.mxu0 %vm3072_vm3, %v7251_v13 }
0x1106   : > { %13817 = vmatmul.mubr.msk.f32.vlgmr.msra.gmra.mxu0 %vm3072_vm3, %v13786_v12  ;;  %v13789_v15 = vpop.f32.mrf.mxu1 }
0x1107   : > { %13820 = vmatpush3.msra.mxu0 %v7333_v44  ;;  %13827 = vmatprep.mubr.msk.f32.mxu0 %vm3072_vm3, %v7241_v11 }
0x1108   : > { %13821 = vmatprep.subr.mxu0 %v7332_v14  ;;  %v7261_v37 = vpop.f32.mrf.mxu1 }
0x1109   : > { %13822 = vmatpush3.msra.mxu0 %v7332_v14 }
0x110a   : > { %13823 = vmatprep.subr.mxu0 %v7331_v16  ;;  %v13792_v50 = vpop.f32.mrf.mxu1 }
0x110b   : > { %13824 = vmatpush3.msra.mxu0 %v7331_v16 }
0x110c   : > { %13825 = vmatprep.subr.mxu0 %v7330_v39  ;;  %v7271_v52 = vpop.f32.mrf.mxu1 }
0x110d   : > { %13826 = vmatpush3.msra.mxu0 %v7330_v39 }
0x110e   : > { %13830 = vmatprep.subr.mxu0 %v11792_v51  ;;  %13828 = vmatmul.mubr.msk.f32.vlgmr.msra.gmra.mxu0 %vm3072_vm3, %v13783_v10  ;;  %v13795_v54 = vpop.f32.mrf.mxu1  ;;  %v8119_v10 = vld [vmem:[%s16934_s19] sm:$0xff] }
0x110f   : > { %13831 = vmatpush3.msra.mxu0 %v11792_v51  ;;  %13838 = vmatprep.mubr.msk.f32.mxu0 %vm3072_vm3, %v7261_v37 }
0x1110   : > { %13832 = vmatprep.subr.mxu0 %v11791_v53  ;;  %v7281_v56 = vpop.f32.mrf.mxu1 }
0x1111   : > { %13833 = vmatpush3.msra.mxu0 %v11791_v53  ;;  %13860 = vmatprep.mubr.msk.f32.mxu1 %vm3072_vm3, %v7281_v56 }
0x1112   : > { %13834 = vmatprep.subr.mxu0 %v11790_v55  ;;  %v13798_v28 = vpop.f32.mrf.mxu1  ;;  %13861 = vmatmul.mubr.msk.f32.vlgmr.msra.gmra.mxu1 %vm3072_vm3, %v13795_v54 }
0x1113   : > { %13835 = vmatpush3.msra.mxu0 %v11790_v55  ;;  %13875 = vmatpush3.msra.mxu1 %v11816_v9  ;;  %v11819_v9 = vld [vmem:[%s16933_s18 + $0xe0] sm:$0xff] }
0x1114   : > { %13836 = vmatprep.subr.mxu0 %v11789_v25  ;;  %v7291_v30 = vpop.f32.mrf.mxu1  ;;  %13876 = vmatprep.subr.mxu1 %v11815_v26 }
0x1115   : > { %13837 = vmatpush3.msra.mxu0 %v11789_v25  ;;  %13877 = vmatpush3.msra.mxu1 %v11815_v26 }
0x1116   : > { %13841 = vmatprep.subr.mxu0 %v11798_v29  ;;  %13839 = vmatmul.mubr.msk.f32.vlgmr.msra.gmra.mxu0 %vm3072_vm3, %v13789_v15  ;;  %v13801_v33 = vpop.f32.mrf.mxu1 }
0x1117   : > { %13842 = vmatpush3.msra.mxu0 %v11798_v29  ;;  %13849 = vmatprep.mubr.msk.f32.mxu0 %vm3072_vm3, %v7271_v52 }
0x1118   : > { %13843 = vmatprep.subr.mxu0 %v11797_v31  ;;  %13878 = vmatprep.subr.mxu1 %v11814_v32  ;;  %v7301_v36 = vpop.f32.mrf.mxu1 }
0x1119   : > { %13844 = vmatpush3.msra.mxu0 %v11797_v31  ;;  %13879 = vmatpush3.msra.mxu1 %v11814_v32 }
0x111a   : > { %13845 = vmatprep.subr.mxu0 %v11796_v34  ;;  %13880 = vmatprep.subr.mxu1 %v11813_v35  ;;  %v13804_v17 = vpop.f32.mrf.mxu1 }
0x111b   : > { %13846 = vmatpush3.msra.mxu0 %v11796_v34  ;;  %13881 = vmatpush3.msra.mxu1 %v11813_v35 }
0x111c   : > { %13847 = vmatprep.subr.mxu0 %v11795_v38  ;;  %13882 = vmatprep.mubr.msk.f32.mxu1 %vm3072_vm3, %v7301_v36  ;;  %v7311_v49 = vpop.f32.mrf.mxu1 }
0x111d   : > { %13848 = vmatpush3.msra.mxu0 %v11795_v38  ;;  %13883 = vmatmul.mubr.msk.f32.vlgmr.msra.gmra.mxu1 %vm3072_vm3, %v13801_v33 }
0x111e   : > { %13863 = vmatprep.subr.mxu0 %v11810_v40  ;;  %13850 = vmatmul.mubr.msk.f32.vlgmr.msra.gmra.mxu0 %vm3072_vm3, %v13792_v50  ;;  %v13807_v44 = vpop.f32.mrf.mxu1 }
0x111f   : > { %13864 = vmatpush3.msra.mxu0 %v11810_v40  ;;  %13871 = vmatprep.mubr.msk.f32.mxu0 %vm3072_vm3, %v7291_v30 }
0x1120   : > { %13865 = vmatprep.subr.mxu0 %v11809_v18  ;;  %13896 = vmatprep.subr.mxu1 %v11828_v20  ;;  %v7321_v8 = vpop.f32.mrf.mxu1 }
0x1121   : > { %13866 = vmatpush3.msra.mxu0 %v11809_v18  ;;  %13897 = vmatpush3.msra.mxu1 %v11828_v20 }
0x1122   : > { %13867 = vmatprep.subr.mxu0 %v11808_v46  ;;  %13898 = vmatprep.subr.mxu1 %v11827_v41 }
0x1123   : > { %13868 = vmatpush3.msra.mxu0 %v11808_v46  ;;  %13899 = vmatpush3.msra.mxu1 %v11827_v41 }
0x1124   : > { %13869 = vmatprep.subr.mxu0 %v11807_v0  ;;  %13900 = vmatprep.subr.mxu1 %v11826_v42 }
0x1125   : > { %13870 = vmatpush3.msra.mxu0 %v11807_v0  ;;  %13901 = vmatpush3.msra.mxu1 %v11826_v42 }
0x1126   : > { %13872 = vmatmul.mubr.msk.f32.vlgmr.msra.gmra.mxu0 %vm3072_vm3, %v13798_v28  ;;  %13885 = vmatprep.subr.mxu0 %v11822_v43 }
0x1127   : > { %13886 = vmatpush3.msra.mxu0 %v11822_v43  ;;  %13893 = vmatprep.mubr.msk.f32.mxu0 %vm3072_vm3, %v7311_v49  ;;  %v11854_v43 = vld [vmem:[%s16935_s20 + $0x38] sm:$0xff] }
0x1128   : > { %13887 = vmatprep.subr.mxu0 %v11821_v45  ;;  %13902 = vmatprep.subr.mxu1 %v11825_v5 }
0x1129   : > { %13888 = vmatpush3.msra.mxu0 %v11821_v45  ;;  %13903 = vmatpush3.msra.mxu1 %v11825_v5 }
0x112a   : > { %13889 = vmatprep.subr.mxu0 %v11820_v7  ;;  %13904 = vmatprep.mubr.msk.f32.mxu1 %vm3072_vm3, %v7321_v8 }
0x112b   : > { %13890 = vmatpush3.msra.mxu0 %v11820_v7  ;;  %13905 = vmatmul.mubr.msk.f32.vlgmr.msra.gmra.mxu1 %vm3072_vm3, %v13807_v44 }
0x112c   : > { %13891 = vmatprep.subr.mxu0 %v11819_v9  ;;  %13943 = vmatprep.subr.mxu1 %v11854_v43 }
0x112d   : > { %13892 = vmatpush3.msra.mxu0 %v11819_v9  ;;  %13944 = vmatpush3.msra.mxu1 %v11854_v43 }
0x112e   : > { %13894 = vmatmul.mubr.msk.f32.vlgmr.msra.gmra.mxu0 %vm3072_vm3, %v13804_v17  ;;  %13907 = vmatprep.subr.mxu0 %v8119_v10 }
0x112f   : > { %13908 = vmatpush3.msra.mxu0 %v8119_v10 }
0x11c6   : > { %v13818_v11 = vpop.f32.mrf.mxu0 }
0x11c8   : > { %v7411_v12 = vpop.f32.mrf.mxu0 }
0x11ce   : > { %v13829_v13 = vpop.f32.mrf.mxu0 }
0x11cf   : > { %v7498_v39 = vadd.f32 %v13829_v13, %v13818_v11  ;;  %v11861_v11 = vld [vmem:[%s16935_s20 + $0x50] sm:$0xff]  ;;  %v11860_v13 = vld [vmem:[%s16935_s20 + $0x48] sm:$0xff] }
0x11d0   : > { %v7492_v14 = vpop.f32.mrf.mxu0 }
0x11d1   : > { %v7493_v50 = vadd.f32 %v7492_v14, %v7411_v12 }
0x11d2   : > { %v13862_v53 = vpop.f32.mrf.mxu1 }
0x11d4   : > { %v7754_v25 = vpop.f32.mrf.mxu1 }
0x11d6   : > { %v13840_v15 = vpop.f32.mrf.mxu0 }
0x11d7   : > { %v7588_v51 = vadd.f32 %v13840_v15, %v7498_v39  ;;  %v11859_v15 = vld [vmem:[%s16935_s20 + $0x40] sm:$0xff]  ;;  %v11868_v39 = vld [vmem:[%s16935_s20 + $0x78] sm:$0xff] }
0x11d8   : > { %v7578_v16 = vpop.f32.mrf.mxu0 }
0x11d9   : > { %v7587_v54 = vadd.f32 %v7578_v16, %v7493_v50  ;;  %v11885_v16 = vld [vmem:[%s16935_s20 + $0xd0] sm:$0xff] }
0x11dd   : > { %v13884_v30 = vpop.f32.mrf.mxu1 }
0x11de   : > { %v13851_v37 = vpop.f32.mrf.mxu0 }
0x11df   : > { %v7676_v55 = vadd.f32 %v13851_v37, %v7588_v51  ;;  %v7930_v34 = vpop.f32.mrf.mxu1  ;;  %v11867_v51 = vld [vmem:[%s16935_s20 + $0x70] sm:$0xff] }
0x11e0   : > { %v7666_v52 = vpop.f32.mrf.mxu0 }
0x11e1   : > { %v7675_v56 = vadd.f32 %v7666_v52, %v7587_v54  ;;  %v7764_v28 = vadd.f32 %v13862_v53, %v7676_v55  ;;  %v11884_v52 = vld [vmem:[%s16935_s20 + $0xc8] sm:$0xff]  ;;  %v11883_v55 = vld [vmem:[%s16935_s20 + $0xc0] sm:$0xff] }
0x11e2   : > { %v11866_v54 = vld [vmem:[%s16935_s20 + $0x68] sm:$0xff] }
0x11e3   : > { %v7763_v31 = vadd.f32 %v7754_v25, %v7675_v56  ;;  %v11865_v25 = vld [vmem:[%s16935_s20 + $0x60] sm:$0xff] }
0x11e6   : > { %v13873_v26 = vpop.f32.mrf.mxu0 }
0x11e7   : > { %v7852_v32 = vadd.f32 %v13873_v26, %v7764_v28  ;;  %v11880_v26 = vld [vmem:[%s16935_s20 + $0xb8] sm:$0xff] }
0x11e8   : > { %v7842_v29 = vpop.f32.mrf.mxu0 }
0x11e9   : > { %v7851_v33 = vadd.f32 %v7842_v29, %v7763_v31  ;;  %v7940_v35 = vadd.f32 %v13884_v30, %v7852_v32  ;;  %v11879_v29 = vld [vmem:[%s16935_s20 + $0xb0] sm:$0xff]  ;;  %v11898_v30 = vld [vmem:[%s16935_s20 + $0x118] sm:$0xff]  ;;  %v11878_v31 = vld [vmem:[%s16935_s20 + $0xa8] sm:$0xff] }
0x11eb   : > { %v13906_v38 = vpop.f32.mrf.mxu1  ;;  %v7939_v40 = vadd.f32 %v7930_v34, %v7851_v33  ;;  %v11897_v33 = vld [vmem:[%s16935_s20 + $0x110] sm:$0xff]  ;;  %v11877_v34 = vld [vmem:[%s16935_s20 + $0xa0] sm:$0xff] }
0x11ed   : > { %v8106_v49 = vpop.f32.mrf.mxu1 }
0x11ee   : > { %v13895_v36 = vpop.f32.mrf.mxu0 }
0x11ef   : > { %v8028_v17 = vadd.f32 %v13895_v36, %v7940_v35  ;;  %v11896_v35 = vld [vmem:[%s16935_s20 + $0x108] sm:$0xff]  ;;  %v11892_v36 = vld [vmem:[%s16935_s20 + $0xf8] sm:$0xff] }
0x11f0   : > { %v8018_v18 = vpop.f32.mrf.mxu0 }
0x11f1   : > { %v8027_v20 = vadd.f32 %v8018_v18, %v7939_v40  ;;  %v8116_v46 = vadd.f32 %v13906_v38, %v8028_v17  ;;  %v11891_v40 = vld [vmem:[%s16935_s20 + $0xf0] sm:$0xff]  ;;  %v11895_v17 = vld [vmem:[%s16935_s20 + $0x100] sm:$0xff]  ;;  %v11890_v18 = vld [vmem:[%s16935_s20 + $0xe8] sm:$0xff] }
0x11f3   : > { %v8115_v41 = vadd.f32 %v8106_v49, %v8027_v20  ;;  %v8118_v42 = vmax.f32 %v8116_v46, 0.0  ;;  %v11889_v46 = vld [vmem:[%s16935_s20 + $0xe0] sm:$0xff] }
0x11f4   : > { %v9149_v49 = vld [vmem:[%s16936_s21] sm:$0xff] }
0x11f5   : > { %v8117_v0 = vmax.f32 %v8115_v41, 0.0 }
0x11f7   : > { %13909 = vmatprep.mubr.msk.f32.mxu0 %vm4807_vm4, %v8117_v0 }
0x11f8   : > { %13910 = vmatmul.mubr.msk.f32.vlgmr.msra.gmra.mxu0 %vm4807_vm4, %v8118_v42 }
0x11f9   : > { %13916 = vmatprep.mubr.msk.f32.mxu0 %vm891_vm0, %v15841_v27  ;;  %v11853_v27 = vld [vmem:[%s16935_s20 + $0x30] sm:$0xff] }
0x11fa   : > { %13945 = vmatprep.subr.mxu1 %v11853_v27 }
0x11fb   : > { %13946 = vmatpush3.msra.mxu1 %v11853_v27 }
0x12b8   : > { %v13911_v44 = vpop.f32.mrf.mxu0 }
0x12b9   : > { %v16204_v45 = vadd.f32 %v13911_v44, %v16030_v21 }
0x12ba   : > { %v8192_v5 = vpop.f32.mrf.mxu0 }
0x12bb   : > { %v8204_v7 = vmax.f32 %v16204_v45, 0.0  ;;  %v16208_v8 = vadd.f32 %v8192_v5, %v16032_v47  ;;  %v11862_v47 = vld [vmem:[%s16935_s20 + $0x58] sm:$0xff] }
0x12bd   : > { %v8203_v9 = vmax.f32 %v16208_v8, 0.0  ;;  %13912 = vmatprep.subr.mxu0 %v8204_v7 }
0x12be   : > { %13913 = vmatpush3.msra.mxu0 %v8204_v7 }
0x12bf   : > { %13914 = vmatprep.subr.mxu0 %v8203_v9 }
0x12c0   : > { %13915 = vmatpush3.msra.mxu0 %v8203_v9 }
0x12c1   : > { %13917 = vmatmul.mubr.msk.f32.vlgmr.msra.gmra.mxu0 %vm891_vm0, %v15861_v57  ;;  %v11852_v57 = vld [vmem:[%s16935_s20 + $0x28] sm:$0xff] }
0x12c2   : > { %13919 = vmatprep.mubr.msk.f32.mxu0 %vm891_vm0, %v15868_v58  ;;  %13947 = vmatprep.subr.mxu1 %v11852_v57  ;;  %v11851_v58 = vld [vmem:[%s16935_s20 + $0x20] sm:$0xff] }
0x12c3   : > { %13948 = vmatpush3.msra.mxu1 %v11852_v57 }
0x12c4   : > { %13949 = vmatprep.subr.mxu1 %v11851_v58 }
0x12c5   : > { %13920 = vmatmul.mubr.msk.f32.gmra.mxu0 %vm891_vm0, %v15875_v59  ;;  %13950 = vmatpush3.msra.mxu1 %v11851_v58  ;;  %v8363_v59 = vld [vmem:[%s16935_s20 + $0x18] sm:$0xff] }
0x12c6   : > { %13922 = vmatprep.mubr.msk.f32.mxu0 %vm891_vm0, %v15882_v60  ;;  %13954 = vmatprep.subr.mxu1 %v8363_v59  ;;  %v11874_v60 = vld [vmem:[%s16935_s20 + $0x98] sm:$0xff] }
0x12c7   : > { %13987 = vmatprep.subr.mxu0 %v11874_v60 }
0x12c8   : > { %13988 = vmatpush3.msra.mxu0 %v11874_v60 }
0x12c9   : > { %13923 = vmatmul.mubr.msk.f32.gmra.mxu0 %vm891_vm0, %v15889_v61  ;;  %v11873_v61 = vld [vmem:[%s16935_s20 + $0x90] sm:$0xff] }
0x12ca   : > { %13925 = vmatprep.mubr.msk.f32.mxu0 %vm891_vm0, %v15896_v19  ;;  %13989 = vmatprep.subr.mxu0 %v11873_v61  ;;  %v11872_v19 = vld [vmem:[%s16935_s20 + $0x88] sm:$0xff] }
0x12cb   : > { %13990 = vmatpush3.msra.mxu0 %v11873_v61 }
0x12cc   : > { %13991 = vmatprep.subr.mxu0 %v11872_v19 }
0x12cd   : > { %13926 = vmatmul.mubr.msk.f32.gmra.mxu0 %vm891_vm0, %v15903_v62  ;;  %v11871_v62 = vld [vmem:[%s16935_s20 + $0x80] sm:$0xff] }
0x12ce   : > { %13928 = vmatprep.mubr.msk.f32.mxu0 %vm891_vm0, %v15910_v63  ;;  %13992 = vmatpush3.msra.mxu0 %v11872_v19  ;;  %v11886_v63 = vld [vmem:[%s16935_s20 + $0xd8] sm:$0xff] }
0x12cf   : > { %13993 = vmatprep.subr.mxu0 %v11871_v62 }
0x12d0   : > { %13994 = vmatpush3.msra.mxu0 %v11871_v62 }
0x12d1   : > { %13929 = vmatmul.mubr.msk.f32.gmra.mxu0 %vm891_vm0, %v15917_v1  ;;  %14009 = vmatprep.subr.mxu0 %v11886_v63 }
0x12d2   : > { %13931 = vmatprep.mubr.msk.f32.mxu0 %vm891_vm0, %v15924_v2 }
0x12d5   : > { %13932 = vmatmul.mubr.msk.f32.gmra.mxu0 %vm891_vm0, %v15931_v3 }
0x12d6   : > { %13934 = vmatprep.mubr.msk.f32.mxu0 %vm891_vm0, %v15938_v4 }
0x12d9   : > { %13935 = vmatmul.mubr.msk.f32.gmra.mxu0 %vm891_vm0, %v15945_v6  ;;  %v8362_v6 = vld [vmem:[%s16935_s20 + $0x10] sm:$0xff] }
0x12da   : > { %13937 = vmatprep.mubr.msk.f32.mxu0 %vm891_vm0, %v15952_v23 }
0x12dd   : > { %13938 = vmatmul.mubr.msk.f32.gmra.mxu0 %vm891_vm0, %v15959_v22  ;;  %v8361_v22 = vld [vmem:[%s16935_s20 + $0x8] sm:$0xff] }
0x12de   : > { %13940 = vmatprep.mubr.msk.f32.mxu0 %vm891_vm0, %v15966_v48 }
0x12e1   : > { %13941 = vmatmul.mubr.msk.f32.gmra.mxu0 %vm891_vm0, %v15973_v24  ;;  %v8360_v24 = vld [vmem:[%s16935_s20] sm:$0xff] }
0x1381   : > { %v13918_v1 = vpop.f32.mrf.mxu0 }
0x1383   : > { %v8271_v2 = vpop.f32.mrf.mxu0 }
0x1385   : > { %v13921_v3 = vpop.f32.mrf.mxu0 }
0x1387   : > { %v8281_v4 = vpop.f32.mrf.mxu0 }
0x1388   : > { %13951 = vmatprep.mubr.msk.f32.mxu1 %vm3072_vm3, %v8281_v4 }
0x1389   : > { %13952 = vmatmul.mubr.msk.f32.vlgmr.msra.gmra.mxu1 %vm3072_vm3, %v13921_v3  ;;  %v13924_v23 = vpop.f32.mrf.mxu0 }
0x138a   : > { %13955 = vmatpush3.msra.mxu1 %v8363_v59  ;;  %13962 = vmatprep.mubr.msk.f32.mxu1 %vm3072_vm3, %v8271_v2 }
0x138b   : > { %13956 = vmatprep.subr.mxu1 %v8362_v6  ;;  %v8291_v48 = vpop.f32.mrf.mxu0 }
0x138c   : > { %13957 = vmatpush3.msra.mxu1 %v8362_v6 }
0x138d   : > { %13958 = vmatprep.subr.mxu1 %v8361_v22  ;;  %v13927_v21 = vpop.f32.mrf.mxu0 }
0x138e   : > { %13959 = vmatpush3.msra.mxu1 %v8361_v22 }
0x138f   : > { %13960 = vmatprep.subr.mxu1 %v8360_v24  ;;  %v8301_v10 = vpop.f32.mrf.mxu0 }
0x1390   : > { %13961 = vmatpush3.msra.mxu1 %v8360_v24 }
0x1391   : > { %13965 = vmatprep.subr.mxu1 %v11862_v47  ;;  %13963 = vmatmul.mubr.msk.f32.vlgmr.msra.gmra.mxu1 %vm3072_vm3, %v13918_v1  ;;  %v13930_v12 = vpop.f32.mrf.mxu0 }
0x1392   : > { %13966 = vmatpush3.msra.mxu1 %v11862_v47  ;;  %13973 = vmatprep.mubr.msk.f32.mxu1 %vm3072_vm3, %v8291_v48 }
0x1393   : > { %13967 = vmatprep.subr.mxu1 %v11861_v11  ;;  %v8311_v14 = vpop.f32.mrf.mxu0 }
0x1394   : > { %13968 = vmatpush3.msra.mxu1 %v11861_v11  ;;  %13995 = vmatprep.mubr.msk.f32.mxu0 %vm3072_vm3, %v8311_v14 }
0x1395   : > { %13969 = vmatprep.subr.mxu1 %v11860_v13  ;;  %v13933_v37 = vpop.f32.mrf.mxu0  ;;  %13996 = vmatmul.mubr.msk.f32.vlgmr.msra.gmra.mxu0 %vm3072_vm3, %v13930_v12 }
0x1396   : > { %13970 = vmatpush3.msra.mxu1 %v11860_v13  ;;  %14010 = vmatpush3.msra.mxu0 %v11886_v63 }
0x1397   : > { %13971 = vmatprep.subr.mxu1 %v11859_v15  ;;  %v8321_v50 = vpop.f32.mrf.mxu0  ;;  %14011 = vmatprep.subr.mxu0 %v11885_v16 }
0x1398   : > { %13972 = vmatpush3.msra.mxu1 %v11859_v15  ;;  %14012 = vmatpush3.msra.mxu0 %v11885_v16 }
0x1399   : > { %13976 = vmatprep.subr.mxu1 %v11868_v39  ;;  %13974 = vmatmul.mubr.msk.f32.vlgmr.msra.gmra.mxu1 %vm3072_vm3, %v13924_v23  ;;  %v13936_v53 = vpop.f32.mrf.mxu0 }
0x139a   : > { %13977 = vmatpush3.msra.mxu1 %v11868_v39  ;;  %13984 = vmatprep.mubr.msk.f32.mxu1 %vm3072_vm3, %v8301_v10  ;;  %v16376_v39 = vld [vmem:[%s16966_s3] sm:$0xff] }
0x139b   : > { %13978 = vmatprep.subr.mxu1 %v11867_v51  ;;  %14013 = vmatprep.subr.mxu0 %v11884_v52  ;;  %v8331_v56 = vpop.f32.mrf.mxu0 }
0x139c   : > { %13979 = vmatpush3.msra.mxu1 %v11867_v51  ;;  %14014 = vmatpush3.msra.mxu0 %v11884_v52 }
0x139d   : > { %13980 = vmatprep.subr.mxu1 %v11866_v54  ;;  %14015 = vmatprep.subr.mxu0 %v11883_v55  ;;  %v13939_v28 = vpop.f32.mrf.mxu0 }
0x139e   : > { %13981 = vmatpush3.msra.mxu1 %v11866_v54  ;;  %14016 = vmatpush3.msra.mxu0 %v11883_v55 }
0x139f   : > { %13982 = vmatprep.subr.mxu1 %v11865_v25  ;;  %14017 = vmatprep.mubr.msk.f32.mxu0 %vm3072_vm3, %v8331_v56  ;;  %v8341_v32 = vpop.f32.mrf.mxu0 }
0x13a0   : > { %13983 = vmatpush3.msra.mxu1 %v11865_v25  ;;  %14018 = vmatmul.mubr.msk.f32.vlgmr.msra.gmra.mxu0 %vm3072_vm3, %v13936_v53  ;;  %v16388_v25 = vld [vmem:[%s16966_s3 + $0x8] sm:$0xff] }
0x13a1   : > { %13998 = vmatprep.subr.mxu1 %v11880_v26  ;;  %13985 = vmatmul.mubr.msk.f32.vlgmr.msra.gmra.mxu1 %vm3072_vm3, %v13927_v21  ;;  %v13942_v38 = vpop.f32.mrf.mxu0 }
0x13a2   : > { %13999 = vmatpush3.msra.mxu1 %v11880_v26  ;;  %14006 = vmatprep.mubr.msk.f32.mxu1 %vm3072_vm3, %v8321_v50  ;;  %v11924_v50 = vld [vmem:[%s16937_s22 + $0x38] sm:$0xff]  ;;  %v16409_v26 = vld [vmem:[%s16966_s3 + $0x20] sm:$0xff] }
0x13a3   : > { %14000 = vmatprep.subr.mxu1 %v11879_v29  ;;  %14031 = vmatprep.subr.mxu0 %v11898_v30  ;;  %v8351_v20 = vpop.f32.mrf.mxu0 }
0x13a4   : > { %14001 = vmatpush3.msra.mxu1 %v11879_v29  ;;  %14032 = vmatpush3.msra.mxu0 %v11898_v30  ;;  %v16423_v29 = vld [vmem:[%s16966_s3 + $0x30] sm:$0xff]  ;;  %v16430_v30 = vld [vmem:[%s16966_s3 + $0x38] sm:$0xff] }
0x13a5   : > { %14002 = vmatprep.subr.mxu1 %v11878_v31  ;;  %14033 = vmatprep.subr.mxu0 %v11897_v33 }
0x13a6   : > { %14003 = vmatpush3.msra.mxu1 %v11878_v31  ;;  %14034 = vmatpush3.msra.mxu0 %v11897_v33  ;;  %v16437_v31 = vld [vmem:[%s16966_s3 + $0x40] sm:$0xff]  ;;  %v16451_v33 = vld [vmem:[%s16966_s3 + $0x50] sm:$0xff] }
0x13a7   : > { %14004 = vmatprep.subr.mxu1 %v11877_v34  ;;  %14035 = vmatprep.subr.mxu0 %v11896_v35 }
0x13a8   : > { %14005 = vmatpush3.msra.mxu1 %v11877_v34  ;;  %14036 = vmatpush3.msra.mxu0 %v11896_v35  ;;  %v16458_v34 = vld [vmem:[%s16966_s3 + $0x58] sm:$0xff]  ;;  %v16465_v35 = vld [vmem:[%s16966_s3 + $0x60] sm:$0xff] }
0x13a9   : > { %14007 = vmatmul.mubr.msk.f32.vlgmr.msra.gmra.mxu1 %vm3072_vm3, %v13933_v37  ;;  %14020 = vmatprep.subr.mxu1 %v11892_v36 }
0x13aa   : > { %14021 = vmatpush3.msra.mxu1 %v11892_v36  ;;  %14028 = vmatprep.mubr.msk.f32.mxu1 %vm3072_vm3, %v8341_v32  ;;  %v16444_v32 = vld [vmem:[%s16966_s3 + $0x48] sm:$0xff] }
0x13ab   : > { %14022 = vmatprep.subr.mxu1 %v11891_v40  ;;  %14037 = vmatprep.subr.mxu0 %v11895_v17  ;;  %v16472_v36 = vld [vmem:[%s16966_s3 + $0x68] sm:$0xff] }
0x13ac   : > { %14023 = vmatpush3.msra.mxu1 %v11891_v40  ;;  %14038 = vmatpush3.msra.mxu0 %v11895_v17  ;;  %v16486_v40 = vld [vmem:[%s16966_s3 + $0x78] sm:$0xff]  ;;  %v16493_v17 = vld [vmem:[%s16966_s3 + $0x80] sm:$0xff] }
0x13ad   : > { %14024 = vmatprep.subr.mxu1 %v11890_v18  ;;  %14039 = vmatprep.mubr.msk.f32.mxu0 %vm3072_vm3, %v8351_v20  ;;  %v11923_v20 = vld [vmem:[%s16937_s22 + $0x30] sm:$0xff] }
0x13ae   : > { %14025 = vmatpush3.msra.mxu1 %v11890_v18  ;;  %14040 = vmatmul.mubr.msk.f32.vlgmr.msra.gmra.mxu0 %vm3072_vm3, %v13942_v38  ;;  %v16479_v38 = vld [vmem:[%s16966_s3 + $0x70] sm:$0xff]  ;;  %v16500_v18 = vld [vmem:[%s16966_s3 + $0x88] sm:$0xff] }
0x13af   : > { %14026 = vmatprep.subr.mxu1 %v11889_v46  ;;  %14078 = vmatprep.subr.mxu0 %v11924_v50 }
0x13b0   : > { %14027 = vmatpush3.msra.mxu1 %v11889_v46  ;;  %14079 = vmatpush3.msra.mxu0 %v11924_v50  ;;  %v11922_v46 = vld [vmem:[%s16937_s22 + $0x28] sm:$0xff]  ;;  %v11949_v50 = vld [vmem:[%s16937_s22 + $0xb0] sm:$0xff] }
0x13b1   : > { %14029 = vmatmul.mubr.msk.f32.vlgmr.msra.gmra.mxu1 %vm3072_vm3, %v13939_v28  ;;  %14042 = vmatprep.subr.mxu1 %v9149_v49  ;;  %v16416_v28 = vld [vmem:[%s16966_s3 + $0x28] sm:$0xff] }
0x13b2   : > { %14043 = vmatpush3.msra.mxu1 %v9149_v49  ;;  %14080 = vmatprep.subr.mxu0 %v11923_v20  ;;  %v11921_v49 = vld [vmem:[%s16937_s22 + $0x20] sm:$0xff] }
0x13b3   : > { %14081 = vmatpush3.msra.mxu0 %v11923_v20  ;;  %v11962_v20 = vld [vmem:[%s16937_s22 + $0xf8] sm:$0xff] }
0x13b4   : > { %14082 = vmatprep.subr.mxu0 %v11922_v46 }
0x13b5   : > { %14083 = vmatpush3.msra.mxu0 %v11922_v46 }
0x13b6   : > { %14084 = vmatprep.subr.mxu0 %v11921_v49 }
0x13b7   : > { %14085 = vmatpush3.msra.mxu0 %v11921_v49  ;;  %v11961_v49 = vld [vmem:[%s16937_s22 + $0xf0] sm:$0xff] }
0x1449   : > { %v13953_v41 = vpop.f32.mrf.mxu1 }
0x144b   : > { %v8441_v0 = vpop.f32.mrf.mxu1 }
0x1451   : > { %v13964_v42 = vpop.f32.mrf.mxu1 }
0x1452   : > { %v8528_v9 = vadd.f32 %v13964_v42, %v13953_v41  ;;  %v9393_v41 = vld [vmem:[%s16937_s22 + $0x18] sm:$0xff]  ;;  %v11943_v42 = vld [vmem:[%s16937_s22 + $0x90] sm:$0xff] }
0x1453   : > { %v8522_v43 = vpop.f32.mrf.mxu1  ;;  %14089 = vmatprep.subr.mxu0 %v9393_v41 }
0x1454   : > { %v8523_v27 = vadd.f32 %v8522_v43, %v8441_v0  ;;  %v11944_v0 = vld [vmem:[%s16937_s22 + $0x98] sm:$0xff]  ;;  %v11942_v43 = vld [vmem:[%s16937_s22 + $0x88] sm:$0xff] }
0x1455   : > { %v13997_v59 = vpop.f32.mrf.mxu0 }
0x1457   : > { %v8784_v62 = vpop.f32.mrf.mxu0 }
0x1459   : > { %v13975_v44 = vpop.f32.mrf.mxu1 }
0x145a   : > { %v8618_v57 = vadd.f32 %v13975_v44, %v8528_v9  ;;  %v11941_v44 = vld [vmem:[%s16937_s22 + $0x80] sm:$0xff] }
0x145b   : > { %v8608_v5 = vpop.f32.mrf.mxu1 }
0x145c   : > { %v8617_v60 = vadd.f32 %v8608_v5, %v8523_v27  ;;  %v11956_v5 = vld [vmem:[%s16937_s22 + $0xd8] sm:$0xff] }
0x1460   : > { %v14019_v3 = vpop.f32.mrf.mxu0 }
0x1461   : > { %v13986_v7 = vpop.f32.mrf.mxu1 }
0x1462   : > { %v8706_v61 = vadd.f32 %v13986_v7, %v8618_v57  ;;  %v8960_v22 = vpop.f32.mrf.mxu0 }
0x1463   : > { %v8696_v58 = vpop.f32.mrf.mxu1 }
0x1464   : > { %v8705_v19 = vadd.f32 %v8696_v58, %v8617_v60  ;;  %v8794_v1 = vadd.f32 %v13997_v59, %v8706_v61  ;;  %v9392_v58 = vld [vmem:[%s16937_s22 + $0x10] sm:$0xff]  ;;  %v9391_v60 = vld [vmem:[%s16937_s22 + $0x8] sm:$0xff] }
0x1466   : > { %v8793_v4 = vadd.f32 %v8784_v62, %v8705_v19  ;;  %v9390_v19 = vld [vmem:[%s16937_s22] sm:$0xff] }
0x1469   : > { %v14008_v63 = vpop.f32.mrf.mxu1 }
0x146a   : > { %v8882_v6 = vadd.f32 %v14008_v63, %v8794_v1  ;;  %v11932_v63 = vld [vmem:[%s16937_s22 + $0x58] sm:$0xff] }
0x146b   : > { %v8872_v2 = vpop.f32.mrf.mxu1 }
0x146c   : > { %v8881_v23 = vadd.f32 %v8872_v2, %v8793_v4  ;;  %v8970_v48 = vadd.f32 %v14019_v3, %v8882_v6  ;;  %v11931_v2 = vld [vmem:[%s16937_s22 + $0x50] sm:$0xff]  ;;  %v11930_v4 = vld [vmem:[%s16937_s22 + $0x48] sm:$0xff] }
0x146e   : > { %v14041_v21 = vpop.f32.mrf.mxu0  ;;  %v8969_v47 = vadd.f32 %v8960_v22, %v8881_v23  ;;  %v11929_v23 = vld [vmem:[%s16937_s22 + $0x40] sm:$0xff]  ;;  %v11955_v22 = vld [vmem:[%s16937_s22 + $0xd0] sm:$0xff] }
0x1470   : > { %v9136_v14 = vpop.f32.mrf.mxu0 }
0x1471   : > { %v14030_v24 = vpop.f32.mrf.mxu1 }
0x1472   : > { %v9058_v10 = vadd.f32 %v14030_v24, %v8970_v48  ;;  %v11938_v24 = vld [vmem:[%s16937_s22 + $0x78] sm:$0xff] }
0x1473   : > { %v9048_v11 = vpop.f32.mrf.mxu1 }
0x1474   : > { %v9057_v12 = vadd.f32 %v9048_v11, %v8969_v47  ;;  %v9146_v13 = vadd.f32 %v14041_v21, %v9058_v10  ;;  %v11937_v47 = vld [vmem:[%s16937_s22 + $0x70] sm:$0xff]  ;;  %v11954_v10 = vld [vmem:[%s16937_s22 + $0xc8] sm:$0xff] }
0x1476   : > { %v9145_v15 = vadd.f32 %v9136_v14, %v9057_v12  ;;  %v9148_v37 = vmax.f32 %v9146_v13, 0.0  ;;  %v11936_v12 = vld [vmem:[%s16937_s22 + $0x68] sm:$0xff]  ;;  %v11953_v13 = vld [vmem:[%s16937_s22 + $0xc0] sm:$0xff] }
0x1478   : > { %v9147_v16 = vmax.f32 %v9145_v15, 0.0  ;;  %v11935_v15 = vld [vmem:[%s16937_s22 + $0x60] sm:$0xff] }
0x147a   : > { %14044 = vmatprep.mubr.msk.f32.mxu1 %vm4807_vm4, %v9147_v16  ;;  %v11950_v16 = vld [vmem:[%s16937_s22 + $0xb8] sm:$0xff] }
0x147b   : > { %14045 = vmatmul.mubr.msk.f32.vlgmr.msra.gmra.mxu1 %vm4807_vm4, %v9148_v37 }
0x147c   : > { %14051 = vmatprep.mubr.msk.f32.mxu1 %vm891_vm0, %v16376_v39 }
0x153b   : > { %v14046_v51 = vpop.f32.mrf.mxu1 }
0x153c   : > { %v9232_v52 = vadd.f32 %v14046_v51, %v16204_v45  ;;  %v16395_v45 = vld [vmem:[%s16966_s3 + $0x10] sm:$0xff]  ;;  %v11968_v51 = vld [vmem:[%s16937_s22 + $0x118] sm:$0xff] }
0x153d   : > { %v9222_v53 = vpop.f32.mrf.mxu1 }
0x153e   : > { %v9234_v54 = vmax.f32 %v9232_v52, 0.0  ;;  %v9231_v55 = vadd.f32 %v9222_v53, %v16208_v8  ;;  %v16402_v8 = vld [vmem:[%s16966_s3 + $0x18] sm:$0xff]  ;;  %v11948_v52 = vld [vmem:[%s16937_s22 + $0xa8] sm:$0xff] }
0x1540   : > { %v9233_v56 = vmax.f32 %v9231_v55, 0.0  ;;  %14047 = vmatprep.subr.mxu1 %v9234_v54  ;;  %v11947_v55 = vld [vmem:[%s16937_s22 + $0xa0] sm:$0xff] }
0x1541   : > { %14048 = vmatpush3.msra.mxu1 %v9234_v54  ;;  %v11967_v54 = vld [vmem:[%s16937_s22 + $0x110] sm:$0xff] }
0x1542   : > { %14049 = vmatprep.subr.mxu1 %v9233_v56 }
0x1543   : > { %14050 = vmatpush3.msra.mxu1 %v9233_v56  ;;  %v11966_v56 = vld [vmem:[%s16937_s22 + $0x108] sm:$0xff] }
0x1544   : > { %14052 = vmatmul.mubr.msk.f32.vlgmr.msra.gmra.mxu1 %vm891_vm0, %v16388_v25  ;;  %14122 = vmatprep.subr.mxu1 %v11944_v0 }
0x1545   : > { %14054 = vmatprep.mubr.msk.f32.mxu1 %vm891_vm0, %v16395_v45  ;;  %14123 = vmatpush3.msra.mxu1 %v11944_v0  ;;  %v11960_v0 = vld [vmem:[%s16937_s22 + $0xe8] sm:$0xff] }
0x1546   : > { %14124 = vmatprep.subr.mxu1 %v11943_v42 }
0x1547   : > { %14125 = vmatpush3.msra.mxu1 %v11943_v42 }
0x1548   : > { %14055 = vmatmul.mubr.msk.f32.gmra.mxu1 %vm891_vm0, %v16402_v8  ;;  %14126 = vmatprep.subr.mxu1 %v11942_v43 }
0x1549   : > { %14057 = vmatprep.mubr.msk.f32.mxu1 %vm891_vm0, %v16409_v26  ;;  %14127 = vmatpush3.msra.mxu1 %v11942_v43  ;;  %v11959_v43 = vld [vmem:[%s16937_s22 + $0xe0] sm:$0xff] }
0x154a   : > { %14128 = vmatprep.subr.mxu1 %v11941_v44 }
0x154b   : > { %14129 = vmatpush3.msra.mxu1 %v11941_v44  ;;  %v11997_v44 = vld [vmem:[%s16939_s24 + $0x78] sm:$0xff] }
0x154c   : > { %14058 = vmatmul.mubr.msk.f32.gmra.mxu1 %vm891_vm0, %v16416_v28  ;;  %14144 = vmatprep.subr.mxu1 %v11956_v5 }
0x154d   : > { %14060 = vmatprep.mubr.msk.f32.mxu1 %vm891_vm0, %v16423_v29 }
0x1550   : > { %14061 = vmatmul.mubr.msk.f32.gmra.mxu1 %vm891_vm0, %v16430_v30 }
0x1551   : > { %14063 = vmatprep.mubr.msk.f32.mxu1 %vm891_vm0, %v16437_v31 }
0x1554   : > { %14064 = vmatmul.mubr.msk.f32.gmra.mxu1 %vm891_vm0, %v16444_v32 }
0x1555   : > { %14066 = vmatprep.mubr.msk.f32.mxu1 %vm891_vm0, %v16451_v33 }
0x1558   : > { %14067 = vmatmul.mubr.msk.f32.gmra.mxu1 %vm891_vm0, %v16458_v34 }
0x1559   : > { %14069 = vmatprep.mubr.msk.f32.mxu1 %vm891_vm0, %v16465_v35 }
0x155c   : > { %14070 = vmatmul.mubr.msk.f32.gmra.mxu1 %vm891_vm0, %v16472_v36 }
0x155d   : > { %14072 = vmatprep.mubr.msk.f32.mxu1 %vm891_vm0, %v16479_v38 }
0x1560   : > { %14073 = vmatmul.mubr.msk.f32.gmra.mxu1 %vm891_vm0, %v16486_v40 }
0x1561   : > { %14075 = vmatprep.mubr.msk.f32.mxu1 %vm891_vm0, %v16493_v17 }
0x1564   : > { %14076 = vmatmul.mubr.msk.f32.gmra.mxu1 %vm891_vm0, %v16500_v18 }
0x1604   : > { %v14053_v7 = vpop.f32.mrf.mxu1 }
0x1606   : > { %v9301_v9 = vpop.f32.mrf.mxu1 }
0x1608   : > { %v14056_v27 = vpop.f32.mrf.mxu1 }
0x160a   : > { %v9311_v57 = vpop.f32.mrf.mxu1 }
0x160b   : > { %14086 = vmatprep.mubr.msk.f32.mxu0 %vm3072_vm3, %v9311_v57 }
0x160c   : > { %14087 = vmatmul.mubr.msk.f32.vlgmr.msra.gmra.mxu0 %vm3072_vm3, %v14056_v27  ;;  %v14059_v59 = vpop.f32.mrf.mxu1 }
0x160d   : > { %14090 = vmatpush3.msra.mxu0 %v9393_v41  ;;  %14097 = vmatprep.mubr.msk.f32.mxu0 %vm3072_vm3, %v9301_v9  ;;  %v11965_v41 = vld [vmem:[%s16937_s22 + $0x100] sm:$0xff]  ;;  %v11993_v9 = vld [vmem:[%s16939_s24 + $0x58] sm:$0xff] }
0x160e   : > { %14091 = vmatprep.subr.mxu0 %v9392_v58  ;;  %v9321_v61 = vpop.f32.mrf.mxu1 }
0x160f   : > { %14092 = vmatpush3.msra.mxu0 %v9392_v58 }
0x1610   : > { %14093 = vmatprep.subr.mxu0 %v9391_v60  ;;  %v14062_v62 = vpop.f32.mrf.mxu1 }
0x1611   : > { %14094 = vmatpush3.msra.mxu0 %v9391_v60 }
0x1612   : > { %14095 = vmatprep.subr.mxu0 %v9390_v19  ;;  %v9331_v1 = vpop.f32.mrf.mxu1 }
0x1613   : > { %14096 = vmatpush3.msra.mxu0 %v9390_v19 }
0x1614   : > { %14100 = vmatprep.subr.mxu0 %v11932_v63  ;;  %14098 = vmatmul.mubr.msk.f32.vlgmr.msra.gmra.mxu0 %vm3072_vm3, %v14053_v7  ;;  %v14065_v3 = vpop.f32.mrf.mxu1  ;;  %v11995_v7 = vld [vmem:[%s16939_s24 + $0x68] sm:$0xff] }
0x1615   : > { %14101 = vmatpush3.msra.mxu0 %v11932_v63  ;;  %14108 = vmatprep.mubr.msk.f32.mxu0 %vm3072_vm3, %v9321_v61 }
0x1616   : > { %14102 = vmatprep.subr.mxu0 %v11931_v2  ;;  %v9341_v6 = vpop.f32.mrf.mxu1 }
0x1617   : > { %14103 = vmatpush3.msra.mxu0 %v11931_v2  ;;  %14130 = vmatprep.mubr.msk.f32.mxu1 %vm3072_vm3, %v9341_v6 }
0x1618   : > { %14104 = vmatprep.subr.mxu0 %v11930_v4  ;;  %v14068_v48 = vpop.f32.mrf.mxu1  ;;  %14131 = vmatmul.mubr.msk.f32.vlgmr.msra.gmra.mxu1 %vm3072_vm3, %v14065_v3 }
0x1619   : > { %14105 = vmatpush3.msra.mxu0 %v11930_v4  ;;  %14145 = vmatpush3.msra.mxu1 %v11956_v5  ;;  %v11996_v5 = vld [vmem:[%s16939_s24 + $0x70] sm:$0xff] }
0x161a   : > { %14106 = vmatprep.subr.mxu0 %v11929_v23  ;;  %v9351_v21 = vpop.f32.mrf.mxu1  ;;  %14146 = vmatprep.subr.mxu1 %v11955_v22 }
0x161b   : > { %14107 = vmatpush3.msra.mxu0 %v11929_v23  ;;  %14147 = vmatpush3.msra.mxu1 %v11955_v22 }
0x161c   : > { %14111 = vmatprep.subr.mxu0 %v11938_v24  ;;  %14109 = vmatmul.mubr.msk.f32.vlgmr.msra.gmra.mxu0 %vm3072_vm3, %v14059_v59  ;;  %v14071_v11 = vpop.f32.mrf.mxu1 }
0x161d   : > { %14112 = vmatpush3.msra.mxu0 %v11938_v24  ;;  %14119 = vmatprep.mubr.msk.f32.mxu0 %vm3072_vm3, %v9331_v1 }
0x161e   : > { %14113 = vmatprep.subr.mxu0 %v11937_v47  ;;  %14148 = vmatprep.subr.mxu1 %v11954_v10  ;;  %v9361_v14 = vpop.f32.mrf.mxu1 }
0x161f   : > { %14114 = vmatpush3.msra.mxu0 %v11937_v47  ;;  %14149 = vmatpush3.msra.mxu1 %v11954_v10 }
0x1620   : > { %14115 = vmatprep.subr.mxu0 %v11936_v12  ;;  %14150 = vmatprep.subr.mxu1 %v11953_v13  ;;  %v14074_v37 = vpop.f32.mrf.mxu1 }
0x1621   : > { %14116 = vmatpush3.msra.mxu0 %v11936_v12  ;;  %14151 = vmatpush3.msra.mxu1 %v11953_v13 }
0x1622   : > { %14117 = vmatprep.subr.mxu0 %v11935_v15  ;;  %14152 = vmatprep.mubr.msk.f32.mxu1 %vm3072_vm3, %v9361_v14  ;;  %v9371_v53 = vpop.f32.mrf.mxu1 }
0x1623   : > { %14118 = vmatpush3.msra.mxu0 %v11935_v15  ;;  %14153 = vmatmul.mubr.msk.f32.vlgmr.msra.gmra.mxu1 %vm3072_vm3, %v14071_v11 }
0x1624   : > { %14133 = vmatprep.subr.mxu0 %v11950_v16  ;;  %14120 = vmatmul.mubr.msk.f32.vlgmr.msra.gmra.mxu0 %vm3072_vm3, %v14062_v62  ;;  %v14077_v46 = vpop.f32.mrf.mxu1 }
0x1625   : > { %14134 = vmatpush3.msra.mxu0 %v11950_v16  ;;  %14141 = vmatprep.mubr.msk.f32.mxu0 %vm3072_vm3, %v9351_v21 }
0x1626   : > { %14135 = vmatprep.subr.mxu0 %v11949_v50  ;;  %14166 = vmatprep.subr.mxu1 %v11968_v51  ;;  %v9381_v42 = vpop.f32.mrf.mxu1 }
0x1627   : > { %14136 = vmatpush3.msra.mxu0 %v11949_v50  ;;  %14167 = vmatpush3.msra.mxu1 %v11968_v51 }
0x1628   : > { %14137 = vmatprep.subr.mxu0 %v11948_v52  ;;  %14168 = vmatprep.subr.mxu1 %v11967_v54 }
0x1629   : > { %14138 = vmatpush3.msra.mxu0 %v11948_v52  ;;  %14169 = vmatpush3.msra.mxu1 %v11967_v54  ;;  %v11971_v52 = vld [vmem:[%s16938_s23] ss:$0 sm:$0xff] }
0x162a   : > { %14139 = vmatprep.subr.mxu0 %v11947_v55  ;;  %14170 = vmatprep.subr.mxu1 %v11966_v56 }
0x162b   : > { %14140 = vmatpush3.msra.mxu0 %v11947_v55  ;;  %14171 = vmatpush3.msra.mxu1 %v11966_v56 }
0x162c   : > { %14142 = vmatmul.mubr.msk.f32.vlgmr.msra.gmra.mxu0 %vm3072_vm3, %v14068_v48  ;;  %14155 = vmatprep.subr.mxu0 %v11962_v20 }
0x162d   : > { %14156 = vmatpush3.msra.mxu0 %v11962_v20  ;;  %14163 = vmatprep.mubr.msk.f32.mxu0 %vm3072_vm3, %v9371_v53 }
0x162e   : > { %14157 = vmatprep.subr.mxu0 %v11961_v49  ;;  %14172 = vmatprep.subr.mxu1 %v11965_v41 }
0x162f   : > { %14158 = vmatpush3.msra.mxu0 %v11961_v49  ;;  %14173 = vmatpush3.msra.mxu1 %v11965_v41 }
0x1630   : > { %14159 = vmatprep.subr.mxu0 %v11960_v0  ;;  %14174 = vmatprep.mubr.msk.f32.mxu1 %vm3072_vm3, %v9381_v42 }
0x1631   : > { %14160 = vmatpush3.msra.mxu0 %v11960_v0  ;;  %14175 = vmatmul.mubr.msk.f32.vlgmr.msra.gmra.mxu1 %vm3072_vm3, %v14077_v46  ;;  %v10349_v0 = vld [vmem:[%s16939_s24 + $0x30] sm:$0xff] }
0x1632   : > { %14161 = vmatprep.subr.mxu0 %v11959_v43  ;;  %14208 = vmatprep.subr.mxu1 %v11997_v44 }
0x1633   : > { %14162 = vmatpush3.msra.mxu0 %v11959_v43  ;;  %14209 = vmatpush3.msra.mxu1 %v11997_v44  ;;  %v10348_v43 = vld [vmem:[%s16939_s24 + $0x28] sm:$0xff] }
0x1634   : > { %14164 = vmatmul.mubr.msk.f32.vlgmr.msra.gmra.mxu0 %vm3072_vm3, %v14074_v37  ;;  %14210 = vmatprep.subr.mxu1 %v11996_v5 }
0x1635   : > { %14181 = vmatprep.mubr.msk.f32.mxu0 %vm891_vm0, %v16376_v39  ;;  %14211 = vmatpush3.msra.mxu1 %v11996_v5  ;;  %v11994_v39 = vld [vmem:[%s16939_s24 + $0x60] sm:$0xff] }
0x1636   : > { %14212 = vmatprep.subr.mxu1 %v11995_v7  ;;  %v10347_v5 = vld [vmem:[%s16939_s24 + $0x20] sm:$0xff] }
0x1637   : > { %14213 = vmatpush3.msra.mxu1 %v11995_v7  ;;  %v12028_v7 = vld [vmem:[%s16939_s24 + $0x130] sm:$0xff] }
0x1638   : > { %14214 = vmatprep.subr.mxu1 %v11994_v39 }
0x1639   : > { %14215 = vmatpush3.msra.mxu1 %v11994_v39  ;;  %v10346_v39 = vld [vmem:[%s16939_s24 + $0x18] sm:$0xff] }
0x163a   : > { %14216 = vmatprep.subr.mxu1 %v11993_v9 }
0x163b   : > { %14217 = vmatpush3.msra.mxu1 %v11993_v9  ;;  %v12027_v9 = vld [vmem:[%s16939_s24 + $0x128] sm:$0xff] }
0x16cc   : > { %v14088_v27 = vpop.f32.mrf.mxu0 }
0x16ce   : > { %v9471_v57 = vpop.f32.mrf.mxu0 }
0x16d4   : > { %v14099_v58 = vpop.f32.mrf.mxu0 }
0x16d5   : > { %v9558_v62 = vadd.f32 %v14099_v58, %v14088_v27  ;;  %v10345_v27 = vld [vmem:[%s16939_s24 + $0x10] sm:$0xff] }
0x16d6   : > { %v9552_v59 = vpop.f32.mrf.mxu0 }
0x16d7   : > { %v9553_v63 = vadd.f32 %v9552_v59, %v9471_v57  ;;  %v12026_v57 = vld [vmem:[%s16939_s24 + $0x120] sm:$0xff]  ;;  %v10344_v59 = vld [vmem:[%s16939_s24 + $0x8] sm:$0xff] }
0x16d8   : > { %v14132_v3 = vpop.f32.mrf.mxu1 }
0x16da   : > { %v9814_v22 = vpop.f32.mrf.mxu1 }
0x16dc   : > { %v14110_v60 = vpop.f32.mrf.mxu0 }
0x16dd   : > { %v9648_v1 = vadd.f32 %v14110_v60, %v9558_v62  ;;  %v12025_v60 = vld [vmem:[%s16939_s24 + $0x118] sm:$0xff]  ;;  %v12024_v62 = vld [vmem:[%s16939_s24 + $0x110] sm:$0xff] }
0x16de   : > { %v9638_v61 = vpop.f32.mrf.mxu0 }
0x16df   : > { %v9647_v4 = vadd.f32 %v9638_v61, %v9553_v63  ;;  %v10343_v61 = vld [vmem:[%s16939_s24] sm:$0xff]  ;;  %v12019_v63 = vld [vmem:[%s16939_s24 + $0xf8] sm:$0xff] }
0x16e3   : > { %v14154_v47 = vpop.f32.mrf.mxu1 }
0x16e4   : > { %v14121_v19 = vpop.f32.mrf.mxu0 }
0x16e5   : > { %v9736_v6 = vadd.f32 %v14121_v19, %v9648_v1  ;;  %v9990_v13 = vpop.f32.mrf.mxu1  ;;  %v12023_v1 = vld [vmem:[%s16939_s24 + $0x108] sm:$0xff] }
0x16e6   : > { %v9726_v2 = vpop.f32.mrf.mxu0 }
0x16e7   : > { %v9735_v23 = vadd.f32 %v9726_v2, %v9647_v4  ;;  %v9824_v24 = vadd.f32 %v14132_v3, %v9736_v6  ;;  %v12018_v2 = vld [vmem:[%s16939_s24 + $0xf0] sm:$0xff]  ;;  %v12017_v4 = vld [vmem:[%s16939_s24 + $0xe8] sm:$0xff]  ;;  %v12022_v6 = vld [vmem:[%s16939_s24 + $0x100] sm:$0xff] }
0x16e9   : > { %v9823_v10 = vadd.f32 %v9814_v22, %v9735_v23  ;;  %v12016_v23 = vld [vmem:[%s16939_s24 + $0xe0] sm:$0xff] }
0x16ec   : > { %v14143_v48 = vpop.f32.mrf.mxu0 }
0x16ed   : > { %v9912_v11 = vadd.f32 %v14143_v48, %v9824_v24  ;;  %v12015_v48 = vld [vmem:[%s16939_s24 + $0xd8] sm:$0xff] }
0x16ee   : > { %v9902_v21 = vpop.f32.mrf.mxu0  ;;  %v12049_v24 = vld [vmem:[%s16939_s24 + $0x1b8] sm:$0xff] }
0x16ef   : > { %v9911_v12 = vadd.f32 %v9902_v21, %v9823_v10  ;;  %v10000_v14 = vadd.f32 %v14154_v47, %v9912_v11  ;;  %v12014_v21 = vld [vmem:[%s16939_s24 + $0xd0] sm:$0xff]  ;;  %v12013_v10 = vld [vmem:[%s16939_s24 + $0xc8] sm:$0xff] }
0x16f0   : > { %v12048_v47 = vld [vmem:[%s16939_s24 + $0x1b0] sm:$0xff]  ;;  %v12047_v11 = vld [vmem:[%s16939_s24 + $0x1a8] sm:$0xff] }
0x16f1   : > { %v14176_v16 = vpop.f32.mrf.mxu1  ;;  %v9999_v37 = vadd.f32 %v9990_v13, %v9911_v12  ;;  %v12012_v12 = vld [vmem:[%s16939_s24 + $0xc0] sm:$0xff] }
0x16f2   : > { %v12046_v13 = vld [vmem:[%s16939_s24 + $0x1a0] sm:$0xff] }
0x16f3   : > { %v10166_v55 = vpop.f32.mrf.mxu1 }
0x16f4   : > { %v14165_v15 = vpop.f32.mrf.mxu0 }
0x16f5   : > { %v10088_v50 = vadd.f32 %v14165_v15, %v10000_v14  ;;  %v12039_v15 = vld [vmem:[%s16939_s24 + $0x178] sm:$0xff] }
0x16f6   : > { %v10078_v51 = vpop.f32.mrf.mxu0 }
0x16f7   : > { %v10087_v53 = vadd.f32 %v10078_v51, %v9999_v37  ;;  %v10176_v54 = vadd.f32 %v14176_v16, %v10088_v50  ;;  %v12045_v16 = vld [vmem:[%s16939_s24 + $0x198] sm:$0xff]  ;;  %v12038_v37 = vld [vmem:[%s16939_s24 + $0x170] sm:$0xff] }
0x16f8   : > { %v12044_v51 = vld [vmem:[%s16939_s24 + $0x190] sm:$0xff] }
0x16f9   : > { %v10185_v56 = vadd.f32 %v11971_v52, %v10176_v54  ;;  %v10175_v20 = vadd.f32 %v10166_v55, %v10087_v53  ;;  %v12043_v53 = vld [vmem:[%s16939_s24 + $0x188] sm:$0xff]  ;;  %v12036_v54 = vld [vmem:[%s16939_s24 + $0x160] sm:$0xff] }
0x16fb   : > { %v10187_v46 = vmax.f32 %v10185_v56, 0.0  ;;  %v10184_v49 = vadd.f32 %v11971_v52, %v10175_v20  ;;  %v12037_v52 = vld [vmem:[%s16939_s24 + $0x168] sm:$0xff]  ;;  %v12035_v56 = vld [vmem:[%s16939_s24 + $0x158] sm:$0xff]  ;;  %v12042_v20 = vld [vmem:[%s16939_s24 + $0x180] sm:$0xff] }
0x16fd   : > { %v10186_v41 = vmax.f32 %v10184_v49, 0.0  ;;  %14177 = vmatprep.subr.mxu0 %v10187_v46 }
0x16fe   : > { %14178 = vmatpush3.msra.mxu0 %v10187_v46  ;;  %v12034_v46 = vld [vmem:[%s16939_s24 + $0x150] sm:$0xff] }
0x16ff   : > { %14179 = vmatprep.subr.mxu0 %v10186_v41 }
0x1700   : > { %14180 = vmatpush3.msra.mxu0 %v10186_v41  ;;  %v12033_v41 = vld [vmem:[%s16939_s24 + $0x148] sm:$0xff] }
0x1701   : > { %14182 = vmatmul.mubr.msk.f32.vlgmr.msra.gmra.mxu0 %vm891_vm0, %v16388_v25  ;;  %v11992_v25 = vld [vmem:[%s16939_s24 + $0x50] sm:$0xff] }
0x1702   : > { %14184 = vmatprep.mubr.msk.f32.mxu0 %vm891_vm0, %v16395_v45  ;;  %14218 = vmatprep.subr.mxu1 %v11992_v25  ;;  %v11991_v45 = vld [vmem:[%s16939_s24 + $0x48] sm:$0xff] }
0x1703   : > { %14219 = vmatpush3.msra.mxu1 %v11992_v25  ;;  %v12069_v25 = vld [vmem:[%s16939_s24 + $0x238] sm:$0xff] }
0x1704   : > { %14220 = vmatprep.subr.mxu1 %v11991_v45 }
0x1705   : > { %14185 = vmatmul.mubr.msk.f32.gmra.mxu0 %vm891_vm0, %v16402_v8  ;;  %14221 = vmatpush3.msra.mxu1 %v11991_v45  ;;  %v11990_v8 = vld [vmem:[%s16939_s24 + $0x40] sm:$0xff] }
0x1706   : > { %14187 = vmatprep.mubr.msk.f32.mxu0 %vm891_vm0, %v16409_v26  ;;  %v12009_v26 = vld [vmem:[%s16939_s24 + $0xb8] sm:$0xff]  ;;  %14222 = vmatprep.subr.mxu1 %v11990_v8  ;;  %v12032_v45 = vld [vmem:[%s16939_s24 + $0x140] sm:$0xff] }
0x1707   : > { %14246 = vmatprep.subr.mxu0 %v12009_v26  ;;  %14223 = vmatpush3.msra.mxu1 %v11990_v8  ;;  %v12068_v8 = vld [vmem:[%s16939_s24 + $0x230] sm:$0xff] }
0x1708   : > { %14247 = vmatpush3.msra.mxu0 %v12009_v26  ;;  %v12059_v26 = vld [vmem:[%s16939_s24 + $0x1f8] sm:$0xff] }
0x1709   : > { %14188 = vmatmul.mubr.msk.f32.gmra.mxu0 %vm891_vm0, %v16416_v28  ;;  %v10350_v28 = vld [vmem:[%s16939_s24 + $0x38] sm:$0xff] }
0x170a   : > { %14190 = vmatprep.mubr.msk.f32.mxu0 %vm891_vm0, %v16423_v29  ;;  %v12008_v29 = vld [vmem:[%s16939_s24 + $0xb0] sm:$0xff]  ;;  %14227 = vmatprep.subr.mxu1 %v10350_v28 }
0x170b   : > { %14248 = vmatprep.subr.mxu0 %v12008_v29 }
0x170c   : > { %14249 = vmatpush3.msra.mxu0 %v12008_v29  ;;  %v12058_v29 = vld [vmem:[%s16939_s24 + $0x1f0] sm:$0xff] }
0x170d   : > { %14191 = vmatmul.mubr.msk.f32.gmra.mxu0 %vm891_vm0, %v16430_v30  ;;  %v12007_v30 = vld [vmem:[%s16939_s24 + $0xa8] sm:$0xff] }
0x170e   : > { %14193 = vmatprep.mubr.msk.f32.mxu0 %vm891_vm0, %v16437_v31  ;;  %14250 = vmatprep.subr.mxu0 %v12007_v30  ;;  %v12006_v31 = vld [vmem:[%s16939_s24 + $0xa0] sm:$0xff] }
0x170f   : > { %14251 = vmatpush3.msra.mxu0 %v12007_v30 }
0x1710   : > { %14252 = vmatprep.subr.mxu0 %v12006_v31 }
0x1711   : > { %14194 = vmatmul.mubr.msk.f32.gmra.mxu0 %vm891_vm0, %v16444_v32  ;;  %v12005_v32 = vld [vmem:[%s16939_s24 + $0x98] sm:$0xff] }
0x1712   : > { %14196 = vmatprep.mubr.msk.f32.mxu0 %vm891_vm0, %v16451_v33  ;;  %14253 = vmatpush3.msra.mxu0 %v12006_v31  ;;  %v12004_v33 = vld [vmem:[%s16939_s24 + $0x90] sm:$0xff]  ;;  %v12066_v31 = vld [vmem:[%s16939_s24 + $0x220] sm:$0xff] }
0x1713   : > { %14254 = vmatprep.subr.mxu0 %v12005_v32 }
0x1714   : > { %14255 = vmatpush3.msra.mxu0 %v12005_v32  ;;  %v12057_v32 = vld [vmem:[%s16939_s24 + $0x1e8] sm:$0xff] }
0x1715   : > { %14197 = vmatmul.mubr.msk.f32.gmra.mxu0 %vm891_vm0, %v16458_v34  ;;  %14256 = vmatprep.subr.mxu0 %v12004_v33  ;;  %v12003_v34 = vld [vmem:[%s16939_s24 + $0x88] sm:$0xff] }
0x1716   : > { %14199 = vmatprep.mubr.msk.f32.mxu0 %vm891_vm0, %v16465_v35  ;;  %14257 = vmatpush3.msra.mxu0 %v12004_v33  ;;  %v12002_v35 = vld [vmem:[%s16939_s24 + $0x80] sm:$0xff]  ;;  %v12065_v33 = vld [vmem:[%s16939_s24 + $0x218] sm:$0xff] }
0x1717   : > { %14258 = vmatprep.subr.mxu0 %v12003_v34 }
0x1718   : > { %14259 = vmatpush3.msra.mxu0 %v12003_v34  ;;  %v12056_v34 = vld [vmem:[%s16939_s24 + $0x1e0] sm:$0xff] }
0x1719   : > { %14200 = vmatmul.mubr.msk.f32.gmra.mxu0 %vm891_vm0, %v16472_v36  ;;  %14260 = vmatprep.subr.mxu0 %v12002_v35  ;;  %v12029_v36 = vld [vmem:[%s16939_s24 + $0x138] sm:$0xff] }
0x171a   : > { %14202 = vmatprep.mubr.msk.f32.mxu0 %vm891_vm0, %v16479_v38  ;;  %14261 = vmatpush3.msra.mxu0 %v12002_v35 }
0x171b   : > { %14284 = vmatprep.subr.mxu0 %v12029_v36 }
0x171d   : > { %14203 = vmatmul.mubr.msk.f32.gmra.mxu0 %vm891_vm0, %v16486_v40 }
0x171e   : > { %14205 = vmatprep.mubr.msk.f32.mxu0 %vm891_vm0, %v16493_v17 }
0x1721   : > { %14206 = vmatmul.mubr.msk.f32.gmra.mxu0 %vm891_vm0, %v16500_v18 }
0x17c1   : > { %v14183_v38 = vpop.f32.mrf.mxu0 }
0x17c3   : > { %v10254_v40 = vpop.f32.mrf.mxu0 }
0x17c5   : > { %v14186_v17 = vpop.f32.mrf.mxu0 }
0x17c7   : > { %v10264_v18 = vpop.f32.mrf.mxu0 }
0x17c8   : > { %14224 = vmatprep.mubr.msk.f32.mxu1 %vm2090_vm2, %v10264_v18 }
0x17c9   : > { %14225 = vmatmul.mubr.msk.f32.vlgmr.msra.gmra.mxu1 %vm2090_vm2, %v14186_v17  ;;  %v14189_v42 = vpop.f32.mrf.mxu0  ;;  %v12054_v17 = vld [vmem:[%s16939_s24 + $0x1d0] sm:$0xff] }
0x17ca   : > { %14228 = vmatpush3.msra.mxu1 %v10350_v28  ;;  %14243 = vmatprep.mubr.msk.f32.mxu1 %vm2090_vm2, %v10254_v40  ;;  %v12067_v28 = vld [vmem:[%s16939_s24 + $0x228] sm:$0xff] }
0x17cb   : > { %14229 = vmatprep.subr.mxu1 %v10349_v0  ;;  %v10274_v44 = vpop.f32.mrf.mxu0  ;;  %v12063_v40 = vld [vmem:[%s16939_s24 + $0x208] sm:$0xff] }
0x17cc   : > { %14230 = vmatpush3.msra.mxu1 %v10349_v0  ;;  %14262 = vmatprep.mubr.msk.f32.mxu0 %vm2090_vm2, %v10274_v44  ;;  %v12053_v0 = vld [vmem:[%s16939_s24 + $0x1c8] sm:$0xff] }
0x17cd   : > { %14231 = vmatprep.subr.mxu1 %v10348_v43  ;;  %14263 = vmatmul.mubr.msk.f32.vlgmr.msra.gmra.mxu0 %vm2090_vm2, %v14189_v42  ;;  %v16749_v58 = vpop.f32.mrf.mxu0  ;;  %v12062_v42 = vld [vmem:[%s16939_s24 + $0x200] sm:$0xff] }
0x17ce   : > { %14232 = vmatpush3.msra.mxu1 %v10348_v43  ;;  %14285 = vmatpush3.msra.mxu0 %v12029_v36  ;;  %v12064_v36 = vld [vmem:[%s16939_s24 + $0x210] sm:$0xff]  ;;  %v12052_v43 = vld [vmem:[%s16939_s24 + $0x1c0] sm:$0xff] }
0x17cf   : > { %14233 = vmatprep.subr.mxu1 %v10347_v5  ;;  %14286 = vmatprep.subr.mxu0 %v12028_v7  ;;  %v10284_v19 = vpop.f32.mrf.mxu0 }
0x17d0   : > { %14234 = vmatpush3.msra.mxu1 %v10347_v5  ;;  %14287 = vmatpush3.msra.mxu0 %v12028_v7 }
0x17d1   : > { %14235 = vmatprep.subr.mxu1 %v10346_v39  ;;  %14288 = vmatprep.subr.mxu0 %v12027_v9  ;;  %v14195_v3 = vpop.f32.mrf.mxu0 }
0x17d2   : > { %14236 = vmatpush3.msra.mxu1 %v10346_v39  ;;  %14289 = vmatpush3.msra.mxu0 %v12027_v9 }
0x17d3   : > { %14237 = vmatprep.subr.mxu1 %v10345_v27  ;;  %14290 = vmatprep.subr.mxu0 %v12026_v57  ;;  %v10294_v22 = vpop.f32.mrf.mxu0 }
0x17d4   : > { %14238 = vmatpush3.msra.mxu1 %v10345_v27  ;;  %14291 = vmatpush3.msra.mxu0 %v12026_v57 }
0x17d5   : > { %14239 = vmatprep.subr.mxu1 %v10344_v59  ;;  %14292 = vmatprep.subr.mxu0 %v12025_v60  ;;  %v14198_v14 = vpop.f32.mrf.mxu0 }
0x17d6   : > { %14240 = vmatpush3.msra.mxu1 %v10344_v59  ;;  %14293 = vmatpush3.msra.mxu0 %v12025_v60 }
0x17d7   : > { %14241 = vmatprep.subr.mxu1 %v10343_v61  ;;  %14294 = vmatprep.subr.mxu0 %v12024_v62  ;;  %v10304_v50 = vpop.f32.mrf.mxu0 }
0x17d8   : > { %14242 = vmatpush3.msra.mxu1 %v10343_v61  ;;  %14295 = vmatpush3.msra.mxu0 %v12024_v62 }
0x17d9   : > { %14265 = vmatprep.subr.mxu1 %v12019_v63  ;;  %14244 = vmatmul.mubr.msk.f32.vlgmr.msra.gmra.mxu1 %vm2090_vm2, %v14183_v38  ;;  %v14201_v55 = vpop.f32.mrf.mxu0  ;;  %v12055_v38 = vld [vmem:[%s16939_s24 + $0x1d8] sm:$0xff] }
0x17da   : > { %14266 = vmatpush3.msra.mxu1 %v12019_v63  ;;  %14296 = vmatprep.subr.mxu0 %v12023_v1 }
0x17db   : > { %14267 = vmatprep.subr.mxu1 %v12018_v2  ;;  %14281 = vmatprep.mubr.msk.f32.mxu1 %vm2090_vm2, %v10284_v19  ;;  %v10314_v49 = vpop.f32.mrf.mxu0 }
0x17dc   : > { %14268 = vmatpush3.msra.mxu1 %v12018_v2  ;;  %14297 = vmatpush3.msra.mxu0 %v12023_v1 }
0x17dd   : > { %14269 = vmatprep.subr.mxu1 %v12017_v4  ;;  %14298 = vmatprep.subr.mxu0 %v12022_v6  ;;  %v14204_v30 = vpop.f32.mrf.mxu0 }
0x17de   : > { %14270 = vmatpush3.msra.mxu1 %v12017_v4  ;;  %14299 = vmatpush3.msra.mxu0 %v12022_v6 }
0x17df   : > { %14271 = vmatprep.subr.mxu1 %v12016_v23  ;;  %14300 = vmatprep.mubr.msk.f32.mxu0 %vm2090_vm2, %v10294_v22  ;;  %v10324_v35 = vpop.f32.mrf.mxu0 }
0x17e0   : > { %14272 = vmatpush3.msra.mxu1 %v12016_v23  ;;  %14301 = vmatmul.mubr.msk.f32.vlgmr.msra.gmra.mxu0 %vm2090_vm2, %v14195_v3 }
0x17e1   : > { %14273 = vmatprep.subr.mxu1 %v12015_v48  ;;  %14322 = vmatprep.subr.mxu0 %v12049_v24  ;;  %v14207_v18 = vpop.f32.mrf.mxu0 }
0x17e2   : > { %14274 = vmatpush3.msra.mxu1 %v12015_v48  ;;  %14323 = vmatpush3.msra.mxu0 %v12049_v24 }
0x17e3   : > { %14275 = vmatprep.subr.mxu1 %v12014_v21  ;;  %14324 = vmatprep.subr.mxu0 %v12048_v47  ;;  %v10334_v44 = vpop.f32.mrf.mxu0 }
0x17e4   : > { %14276 = vmatpush3.msra.mxu1 %v12014_v21  ;;  %14325 = vmatpush3.msra.mxu0 %v12048_v47 }
0x17e5   : > { %14277 = vmatprep.subr.mxu1 %v12013_v10  ;;  %14326 = vmatprep.subr.mxu0 %v12047_v11 }
0x17e6   : > { %14278 = vmatpush3.msra.mxu1 %v12013_v10  ;;  %14327 = vmatpush3.msra.mxu0 %v12047_v11 }
0x17e7   : > { %14279 = vmatprep.subr.mxu1 %v12012_v12  ;;  %14328 = vmatprep.subr.mxu0 %v12046_v13 }
0x17e8   : > { %14280 = vmatpush3.msra.mxu1 %v12012_v12  ;;  %14329 = vmatpush3.msra.mxu0 %v12046_v13 }
0x17e9   : > { %14282 = vmatmul.mubr.msk.f32.vlgmr.msra.gmra.mxu1 %vm2090_vm2, %v16749_v58  ;;  %14303 = vmatprep.subr.mxu1 %v12039_v15 }
0x17ea   : > { %14304 = vmatpush3.msra.mxu1 %v12039_v15  ;;  %14330 = vmatprep.subr.mxu0 %v12045_v16 }
0x17eb   : > { %14305 = vmatprep.subr.mxu1 %v12038_v37  ;;  %14331 = vmatpush3.msra.mxu0 %v12045_v16  ;;  %v12072_v16 = vld [vmem:[%s16940_s25] ss:$0 sm:$0xff] }
0x17ec   : > { %14306 = vmatpush3.msra.mxu1 %v12038_v37  ;;  %14332 = vmatprep.subr.mxu0 %v12044_v51 }
0x17ed   : > { %14307 = vmatprep.subr.mxu1 %v12037_v52  ;;  %14333 = vmatpush3.msra.mxu0 %v12044_v51 }
0x17ee   : > { %14308 = vmatpush3.msra.mxu1 %v12037_v52  ;;  %14334 = vmatprep.subr.mxu0 %v12043_v53 }
0x17ef   : > { %14309 = vmatprep.subr.mxu1 %v12036_v54  ;;  %14319 = vmatprep.mubr.msk.f32.mxu1 %vm2090_vm2, %v10304_v50 }
0x17f0   : > { %14310 = vmatpush3.msra.mxu1 %v12036_v54  ;;  %14335 = vmatpush3.msra.mxu0 %v12043_v53 }
0x17f1   : > { %14311 = vmatprep.subr.mxu1 %v12035_v56  ;;  %14336 = vmatprep.subr.mxu0 %v12042_v20 }
0x17f2   : > { %14312 = vmatpush3.msra.mxu1 %v12035_v56  ;;  %14337 = vmatpush3.msra.mxu0 %v12042_v20 }
0x17f3   : > { %14313 = vmatprep.subr.mxu1 %v12034_v46  ;;  %14338 = vmatprep.mubr.msk.f32.mxu0 %vm2090_vm2, %v10314_v49 }
0x17f4   : > { %14314 = vmatpush3.msra.mxu1 %v12034_v46  ;;  %14339 = vmatmul.mubr.msk.f32.vlgmr.msra.gmra.mxu0 %vm2090_vm2, %v14201_v55 }
0x17f5   : > { %14315 = vmatprep.subr.mxu1 %v12033_v41  ;;  %14360 = vmatprep.subr.mxu0 %v12069_v25 }
0x17f6   : > { %14316 = vmatpush3.msra.mxu1 %v12033_v41  ;;  %14361 = vmatpush3.msra.mxu0 %v12069_v25 }
0x17f7   : > { %14317 = vmatprep.subr.mxu1 %v12032_v45  ;;  %14362 = vmatprep.subr.mxu0 %v12068_v8 }
0x17f8   : > { %14318 = vmatpush3.msra.mxu1 %v12032_v45  ;;  %14363 = vmatpush3.msra.mxu0 %v12068_v8 }
0x17f9   : > { %14320 = vmatmul.mubr.msk.f32.vlgmr.msra.gmra.mxu1 %vm2090_vm2, %v14198_v14  ;;  %14341 = vmatprep.subr.mxu1 %v12059_v26 }
0x17fa   : > { %14342 = vmatpush3.msra.mxu1 %v12059_v26  ;;  %14364 = vmatprep.subr.mxu0 %v12067_v28 }
0x17fb   : > { %14343 = vmatprep.subr.mxu1 %v12058_v29  ;;  %14365 = vmatpush3.msra.mxu0 %v12067_v28 }
0x17fc   : > { %14344 = vmatpush3.msra.mxu1 %v12058_v29  ;;  %14366 = vmatprep.subr.mxu0 %v12066_v31 }
0x17fd   : > { %14345 = vmatprep.subr.mxu1 %v12057_v32  ;;  %14367 = vmatpush3.msra.mxu0 %v12066_v31 }
0x17fe   : > { %14346 = vmatpush3.msra.mxu1 %v12057_v32  ;;  %14368 = vmatprep.subr.mxu0 %v12065_v33 }
0x17ff   : > { %14347 = vmatprep.subr.mxu1 %v12056_v34  ;;  %14369 = vmatpush3.msra.mxu0 %v12065_v33 }
0x1800   : > { %14348 = vmatpush3.msra.mxu1 %v12056_v34  ;;  %14370 = vmatprep.subr.mxu0 %v12064_v36 }
0x1801   : > { %14349 = vmatprep.subr.mxu1 %v12055_v38  ;;  %14371 = vmatpush3.msra.mxu0 %v12064_v36 }
0x1802   : > { %14350 = vmatpush3.msra.mxu1 %v12055_v38  ;;  %14372 = vmatprep.subr.mxu0 %v12063_v40 }
0x1803   : > { %14351 = vmatprep.subr.mxu1 %v12054_v17  ;;  %14357 = vmatprep.mubr.msk.f32.mxu1 %vm2090_vm2, %v10324_v35 }
0x1804   : > { %14352 = vmatpush3.msra.mxu1 %v12054_v17  ;;  %14373 = vmatpush3.msra.mxu0 %v12063_v40 }
0x1805   : > { %14353 = vmatprep.subr.mxu1 %v12053_v0  ;;  %14374 = vmatprep.subr.mxu0 %v12062_v42 }
0x1806   : > { %14354 = vmatpush3.msra.mxu1 %v12053_v0  ;;  %14375 = vmatpush3.msra.mxu0 %v12062_v42 }
0x1807   : > { %14355 = vmatprep.subr.mxu1 %v12052_v43  ;;  %14376 = vmatprep.mubr.msk.f32.mxu0 %vm2090_vm2, %v10334_v44 }
0x1808   : > { %14356 = vmatpush3.msra.mxu1 %v12052_v43  ;;  %14377 = vmatmul.mubr.msk.f32.vlgmr.msra.gmra.mxu0 %vm2090_vm2, %v14207_v18 }
0x1809   : > { %14358 = vmatmul.mubr.msk.f32.vlgmr.msra.gmra.mxu1 %vm2090_vm2, %v14204_v30 }
0x1889   : > { %v14226_v5 = vpop.f32.mrf.mxu1 }
0x188b   : > { %v10432_v7 = vpop.f32.mrf.mxu1 }
0x188d   : > { %v14264_v27 = vpop.f32.mrf.mxu0 }
0x188f   : > { %v10603_v60 = vpop.f32.mrf.mxu0 }
0x1899   : > { %v14245_v39 = vpop.f32.mrf.mxu1 }
0x189a   : > { %v10519_v57 = vadd.f32 %v14245_v39, %v14226_v5 }
0x189b   : > { %v10513_v9 = vpop.f32.mrf.mxu1 }
0x189c   : > { %v10514_v59 = vadd.f32 %v10513_v9, %v10432_v7  ;;  %v10613_v61 = vadd.f32 %v14264_v27, %v10519_v57 }
0x189e   : > { %v10612_v63 = vadd.f32 %v10603_v60, %v10514_v59 }
0x18a0   : > { %v14302_v62 = vpop.f32.mrf.mxu0 }
0x18a2   : > { %v10787_v4 = vpop.f32.mrf.mxu0 }
0x18a9   : > { %v14283_v58 = vpop.f32.mrf.mxu1 }
0x18aa   : > { %v10705_v1 = vadd.f32 %v14283_v58, %v10613_v61 }
0x18ab   : > { %v10695_v19 = vpop.f32.mrf.mxu1 }
0x18ac   : > { %v10704_v3 = vadd.f32 %v10695_v19, %v10612_v63  ;;  %v10797_v6 = vadd.f32 %v14302_v62, %v10705_v1 }
0x18ae   : > { %v10796_v48 = vadd.f32 %v10787_v4, %v10704_v3 }
0x18b4   : > { %v14340_v22 = vpop.f32.mrf.mxu0 }
0x18b6   : > { %v10971_v47 = vpop.f32.mrf.mxu0 }
0x18b9   : > { %v14321_v2 = vpop.f32.mrf.mxu1 }
0x18ba   : > { %v10889_v24 = vadd.f32 %v14321_v2, %v10797_v6 }
0x18bb   : > { %v10879_v23 = vpop.f32.mrf.mxu1 }
0x18bc   : > { %v10888_v21 = vadd.f32 %v10879_v23, %v10796_v48  ;;  %v10981_v10 = vadd.f32 %v14340_v22, %v10889_v24 }
0x18be   : > { %v10980_v13 = vadd.f32 %v10971_v47, %v10888_v21 }
0x18c8   : > { %v14378_v12 = vpop.f32.mrf.mxu0 }
0x18c9   : > { %v14359_v11 = vpop.f32.mrf.mxu1 }
0x18ca   : > { %v11073_v14 = vadd.f32 %v14359_v11, %v10981_v10  ;;  %v11155_v51 = vpop.f32.mrf.mxu0 }
0x18cb   : > { %v11063_v15 = vpop.f32.mrf.mxu1 }
0x18cc   : > { %v11072_v37 = vadd.f32 %v11063_v15, %v10980_v13  ;;  %v11165_v50 = vadd.f32 %v14378_v12, %v11073_v14 }
0x18ce   : > { %v11174_v52 = vadd.f32 %v12072_v16, %v11165_v50  ;;  %v11164_v53 = vadd.f32 %v11155_v51, %v11072_v37 }
0x18d0   : > { %11176 = vst.msk [vmem:[%s860_s0 + $0x8] sm:$0xff] %vm1114_vm1, %v11174_v52  ;;  %v11173_v54 = vadd.f32 %v12072_v16, %v11164_v53 }
0x18d2   : > { %11175 = vst.msk [vmem:[%s860_s0] sm:$0xff] %vm1114_vm1, %v11173_v54 }
0x18d3 PF: > { %s39_s8 = sadd.s32 1, %s14448_s8  }
0x18d4   : > { %p36_p4 = scmp.ge.s32.totalorder %s39_s8, 4  }
0x18d6   :  { %38 = sbr.rel (!%p36_p4) target bundleno = 14 (0xe), region = 258 }

</bundles_post_ra>
